<compile_context>
chip_gen: v7x
topology: tpu7x:2x2x1
jax: 0.10.0
libtpu: 0.0.40
codegen_flags: <defaults>
</compile_context>

<pallas_src>
import math

import jax
import jax.numpy as jnp
from jax import lax
from jax.experimental import pallas as pl
from jax.experimental.pallas import tpu as pltpu


def _round_up(x, m):
    return ((x + m - 1) // m) * m


# --------------------------------------------------------------------------
# Kernel
# --------------------------------------------------------------------------
def _make_bigru_kernel(num_layers, seq, hidden_pad, fc_batch_idx, unroll):
    Hp = hidden_pad
    H2, H4, H6 = 2 * Hp, 4 * Hp, 6 * Hp

    def kernel(*refs):
        # inputs: x_cat, (wih, bih, whh, bhh) per layer, wfc, bfc
        x_ref = refs[0]
        wrefs = refs[1:1 + 4 * num_layers]
        wfc_ref = refs[1 + 4 * num_layers]
        bfc_ref = refs[2 + 4 * num_layers]
        out_ref = refs[3 + 4 * num_layers]
        xg_ref = refs[4 + 4 * num_layers]                      # (seq, B, 6Hp)
        hbufs = (refs[5 + 4 * num_layers], refs[6 + 4 * num_layers])  # (seq, B, 4Hp)

        batch = x_ref.shape[1]

        def run_layer(src_ref, wih_ref, bih_ref, whh_ref, bhh_ref, dst_ref):
            # ---- hoisted input projection: ONE lane-dense MXU matmul covers
            # every timestep of BOTH directions (src row t = [in(t)|in(seq-1-t)]).
            src = src_ref[...]
            feat = src.shape[-1]
            xg = jnp.dot(src.reshape(seq * batch, feat), wih_ref[...],
                         preferred_element_type=jnp.float32) + bih_ref[...]
            xg_ref[...] = xg.reshape(seq, batch, H6)

            whh = whh_ref[...]          # (2Hp, 6Hp) = blockdiag(fwd, bwd), gate-major cols
            bhh = bhh_ref[...]

            def step(t, h):             # h = [h_f(t-1) | h_b(seq-t)]  (batch, 2Hp)
                tb = seq - 1 - t
                xg_t = xg_ref[t]                               # (batch, 6Hp) contiguous
                hg = jnp.dot(h, whh,
                             preferred_element_type=jnp.float32) + bhh
                # gate cols: [r_f r_b | z_f z_b | n_f n_b], each chunk Hp (128-aligned)
                rz = jax.nn.sigmoid(xg_t[:, :H4] + hg[:, :H4])
                r, z = rz[:, :H2], rz[:, H2:]
                n = jnp.tanh(xg_t[:, H4:] + r * hg[:, H4:])    # b_hn stays inside r*(.)
                h_new = (1.0 - z) * n + z * h                  # [h_f(t) | h_b(tb)]
                # Dual aligned stores make row u of dst equal
                #   [h_f(u), h_b(seq-1-u), h_f(seq-1-u), h_b(u)]
                # i.e. the next layer's pre-concatenated input row (no flips).
                dst_ref[t, :, :H2] = h_new
                dst_ref[tb, :, H2:] = h_new
                return h_new

            h0 = jnp.zeros((batch, H2), jnp.float32)
            lax.fori_loop(0, seq, step, h0, unroll=unroll)

        src = x_ref
        for layer in range(num_layers):
            wih_ref, bih_ref, whh_ref, bhh_ref = wrefs[4 * layer:4 * layer + 4]
            dst = hbufs[layer % 2]
            run_layer(src, wih_ref, bih_ref, whh_ref, bhh_ref, dst)
            src = dst

        # ---- FC epilogue, only on the batch row torch keeps (output[:, -1, :]).
        # Row t of the last slab already contains [h_f(t), h_b(tb), h_f(tb), h_b(t)];
        # wfc has zero rows everywhere except the real h_f(t) / h_b(t) positions.
        h_last = src[...][:, fc_batch_idx, :]                  # (seq, 4Hp)
        y = jnp.dot(h_last, wfc_ref[...],
                    preferred_element_type=jnp.float32) + bfc_ref[...]
        out_ref[...] = y

    return kernel


# --------------------------------------------------------------------------
# Host-side parameter packing (torch layout -> fused kernel layout)
# --------------------------------------------------------------------------
def _scatter_gate_cols(dst, block_t, row0, direction, H, Hp):
    """Place a (rows, 3H) transposed torch weight block into the gate-major /
    direction-minor padded column layout [r_f r_b z_f z_b n_f n_b]."""
    rows = block_t.shape[0]
    for g in range(3):
        c0 = (2 * g + direction) * Hp
        dst = dst.at[row0:row0 + rows, c0:c0 + H].set(block_t[:, g * H:(g + 1) * H])
    return dst


def _scatter_gate_bias(dst, b, direction, H, Hp):
    for g in range(3):
        c0 = (2 * g + direction) * Hp
        dst = dst.at[0, c0:c0 + H].set(b[g * H:(g + 1) * H])
    return dst


def pack_params(raw, input_size, hidden_size, output_size):
    """Pad the hidden size to Hp (multiple of 64 -> 128-lane gate pairs) and
    fuse fwd/bwd weights.  Padded rows/cols and biases are exactly zero, so
    padded hidden lanes stay identically 0 through the recurrence."""
    H = hidden_size
    Hp = _round_up(H, 64)
    layers = []
    for layer, lp in enumerate(raw["gru"]):
        if layer == 0:
            in_feat = input_size
            wih = jnp.zeros((2 * in_feat, 6 * Hp), jnp.float32)
            wih = _scatter_gate_cols(wih, lp["w_ih_f"].T, 0, 0, H, Hp)
            wih = _scatter_gate_cols(wih, lp["w_ih_b"].T, in_feat, 1, H, Hp)
        else:
            # input rows (scan order): [h_f(t), h_b(tb), h_f(tb), h_b(t)]
            wih = jnp.zeros((4 * Hp, 6 * Hp), jnp.float32)
            wih = _scatter_gate_cols(wih, lp["w_ih_f"][:, :H].T, 0 * Hp, 0, H, Hp)
            wih = _scatter_gate_cols(wih, lp["w_ih_f"][:, H:].T, 3 * Hp, 0, H, Hp)
            wih = _scatter_gate_cols(wih, lp["w_ih_b"][:, :H].T, 2 * Hp, 1, H, Hp)
            wih = _scatter_gate_cols(wih, lp["w_ih_b"][:, H:].T, 1 * Hp, 1, H, Hp)
        whh = jnp.zeros((2 * Hp, 6 * Hp), jnp.float32)      # blockdiag(fwd, bwd)
        whh = _scatter_gate_cols(whh, lp["w_hh_f"].T, 0, 0, H, Hp)
        whh = _scatter_gate_cols(whh, lp["w_hh_b"].T, Hp, 1, H, Hp)
        bih = jnp.zeros((1, 6 * Hp), jnp.float32)
        bih = _scatter_gate_bias(bih, lp["b_ih_f"], 0, H, Hp)
        bih = _scatter_gate_bias(bih, lp["b_ih_b"], 1, H, Hp)
        bhh = jnp.zeros((1, 6 * Hp), jnp.float32)
        bhh = _scatter_gate_bias(bhh, lp["b_hh_f"], 0, H, Hp)
        bhh = _scatter_gate_bias(bhh, lp["b_hh_b"], 1, H, Hp)
        layers.append((wih, bih, whh, bhh))
    w_fc, b_fc = raw["fc"]
    wfc = jnp.zeros((4 * Hp, output_size), jnp.float32)
    wfc = wfc.at[0:H, :].set(w_fc[:, :H].T)                 # h_f(t) rows
    wfc = wfc.at[3 * Hp:3 * Hp + H, :].set(w_fc[:, H:].T)   # h_b(t) rows
    bfc = b_fc.reshape(1, output_size)
    return {"layers": layers, "fc": (wfc, bfc)}


def init_raw_params(key, input_size, hidden_size, num_layers, output_size):
    """Synthetic params in torch.nn.GRU / nn.Linear layout and init ranges."""
    bound = 1.0 / math.sqrt(hidden_size)
    layers = []
    for layer in range(num_layers):
        in_feat = input_size if layer == 0 else 2 * hidden_size
        key, *ks = jax.random.split(key, 9)

        def u(k, shape, b=bound):
            return jax.random.uniform(k, shape, jnp.float32, -b, b)

        layers.append(dict(
            w_ih_f=u(ks[0], (3 * hidden_size, in_feat)),
            w_hh_f=u(ks[1], (3 * hidden_size, hidden_size)),
            b_ih_f=u(ks[2], (3 * hidden_size,)),
            b_hh_f=u(ks[3], (3 * hidden_size,)),
            w_ih_b=u(ks[4], (3 * hidden_size, in_feat)),
            w_hh_b=u(ks[5], (3 * hidden_size, hidden_size)),
            b_ih_b=u(ks[6], (3 * hidden_size,)),
            b_hh_b=u(ks[7], (3 * hidden_size,)),
        ))
    key, k1, k2 = jax.random.split(key, 3)
    fcb = 1.0 / math.sqrt(2 * hidden_size)
    w_fc = jax.random.uniform(k1, (output_size, 2 * hidden_size), jnp.float32, -fcb, fcb)
    b_fc = jax.random.uniform(k2, (output_size,), jnp.float32, -fcb, fcb)
    return {"gru": layers, "fc": (w_fc, b_fc)}


# --------------------------------------------------------------------------
# Wrapper
# --------------------------------------------------------------------------
def bigru_forward(packed, x):
    x = x.astype(jnp.float32)
    d0, d1, d2 = x.shape
    # torch: x.reshape([d0, d2, d1]) — a raw row-major reshape, NOT a transpose.
    h = x.reshape(d0, d2, d1)                       # (seq, batch, input_size)
    seq, batch, _ = h.shape

    batch_pad = _round_up(batch, 8)                 # full sublanes
    if batch_pad != batch:
        h = jnp.pad(h, ((0, 0), (0, batch_pad - batch), (0, 0)))
    # First-layer input rows pre-concatenated as [x(t) | x(seq-1-t)] (XLA side,
    # one-time) so the in-kernel hoisted projection feeds both directions at once.
    xcat0 = jnp.concatenate([h, jnp.flip(h, axis=0)], axis=-1)

    layers = packed["layers"]
    wfc, bfc = packed["fc"]
    num_layers = len(layers)
    Hp = layers[0][2].shape[0] // 2                 # whh is (2Hp, 6Hp)
    output_size = wfc.shape[1]
    unroll = seq if seq <= 8 else 8                 # partial unroll for long seq

    layer_args = []
    for lp in layers:
        layer_args.extend(lp)

    kernel = _make_bigru_kernel(num_layers, seq, Hp, batch - 1, unroll)
    # TODO(synk): for large seq/H on v7x (64 MiB VMEM) chunk the time axis and
    # stream the slabs with pltpu.emit_pipeline instead of whole-sequence scratch.
    return pl.pallas_call(
        kernel,
        out_shape=jax.ShapeDtypeStruct((seq, output_size), jnp.float32),
        scratch_shapes=[
            pltpu.VMEM((seq, batch_pad, 6 * Hp), jnp.float32),   # hoisted gate proj
            pltpu.VMEM((seq, batch_pad, 4 * Hp), jnp.float32),   # layer slab (ping)
            pltpu.VMEM((seq, batch_pad, 4 * Hp), jnp.float32),   # layer slab (pong)
        ],
    )(xcat0, *layer_args, wfc, bfc)


# --------------------------------------------------------------------------
# Pure-JAX reference (torch.nn.GRU semantics) for correctness checking
# --------------------------------------------------------------------------
def reference_forward(raw, x):
    x = x.astype(jnp.float32)
    d0, d1, d2 = x.shape
    h = x.reshape(d0, d2, d1)
    seq, batch, _ = h.shape

    def cell(x_t, h_prev, w_ih, w_hh, b_ih, b_hh):
        gi = x_t @ w_ih.T + b_ih
        gh = h_prev @ w_hh.T + b_hh
        i_r, i_z, i_n = jnp.split(gi, 3, axis=-1)
        h_r, h_z, h_n = jnp.split(gh, 3, axis=-1)
        r = jax.nn.sigmoid(i_r + h_r)
        z = jax.nn.sigmoid(i_z + h_z)
        n = jnp.tanh(i_n + r * h_n)
        return (1.0 - z) * n + z * h_prev

    out = h
    for lp in raw["gru"]:
        H = lp["w_hh_f"].shape[1]
        hf = jnp.zeros((batch, H), jnp.float32)
        hb = jnp.zeros((batch, H), jnp.float32)
        fwd, bwd = [], [None] * seq
        for t in range(seq):
            hf = cell(out[t], hf, lp["w_ih_f"], lp["w_hh_f"], lp["b_ih_f"], lp["b_hh_f"])
            fwd.append(hf)
        for t in range(seq - 1, -1, -1):
            hb = cell(out[t], hb, lp["w_ih_b"], lp["w_hh_b"], lp["b_ih_b"], lp["b_hh_b"])
            bwd[t] = hb
        out = jnp.stack([jnp.concatenate([fwd[t], bwd[t]], axis=-1) for t in range(seq)], 0)
    w_fc, b_fc = raw["fc"]
    return out[:, -1, :] @ w_fc.T + b_fc


if __name__ == "__main__":
    input_size, hidden_size, num_layers, output_size = 16, 32, 2, 8
    seq_len, batch = 8, 4      # torch x dims: (d0=seq, d1=input_size, d2=batch)

    key = jax.random.PRNGKey(0)
    pkey, xkey = jax.random.split(key)
    raw = init_raw_params(pkey, input_size, hidden_size, num_layers, output_size)
    packed = pack_params(raw, input_size, hidden_size, output_size)
    x = jax.random.normal(xkey, (seq_len, input_size, batch), jnp.float32)

    out = jax.jit(bigru_forward)(packed, x)
    out = jax.block_until_ready(out)

    ref = reference_forward(raw, x)
    assert out.shape == (seq_len, output_size) and out.dtype == jnp.float32
    err = float(jnp.max(jnp.abs(out - ref)))
    assert jnp.allclose(out, ref, atol=2e-4, rtol=2e-4), f"max_abs_err={err}"
    print("KERNEL_OK")
</pallas_src>

<mosaic_0001>
module attributes {stable_mosaic.version = 11 : i64} {
  func.func @kernel(%arg0: memref<8x8x32xf32, #tpu.memory_space<vmem>>, %arg1: memref<32x384xf32, #tpu.memory_space<vmem>>, %arg2: memref<1x384xf32, #tpu.memory_space<vmem>>, %arg3: memref<128x384xf32, #tpu.memory_space<vmem>>, %arg4: memref<1x384xf32, #tpu.memory_space<vmem>>, %arg5: memref<256x384xf32, #tpu.memory_space<vmem>>, %arg6: memref<1x384xf32, #tpu.memory_space<vmem>>, %arg7: memref<128x384xf32, #tpu.memory_space<vmem>>, %arg8: memref<1x384xf32, #tpu.memory_space<vmem>>, %arg9: memref<256x8xf32, #tpu.memory_space<vmem>>, %arg10: memref<1x8xf32, #tpu.memory_space<vmem>>, %arg11: memref<8x8xf32, #tpu.memory_space<vmem>>, %arg12: memref<8x8x384xf32, #tpu.memory_space<vmem>>, %arg13: memref<8x8x256xf32, #tpu.memory_space<vmem>>, %arg14: memref<8x8x256xf32, #tpu.memory_space<vmem>>) attributes {dimension_semantics = [], scalar_prefetch = 0 : i64, scratch_operands = 3 : i64, tpu.core_type = #tpu.core_type<tc>} {
    %c0 = arith.constant 0 : index
    %c0_0 = arith.constant 0 : index
    %c0_1 = arith.constant 0 : index
    %0 = vector.load %arg0[%c0, %c0_0, %c0_1] : memref<8x8x32xf32, #tpu.memory_space<vmem>>, vector<8x8x32xf32>
    %1 = vector.shape_cast %0 : vector<8x8x32xf32> to vector<64x32xf32>
    %c0_2 = arith.constant 0 : index
    %c0_3 = arith.constant 0 : index
    %2 = vector.load %arg1[%c0_2, %c0_3] : memref<32x384xf32, #tpu.memory_space<vmem>>, vector<32x384xf32>
    %cst = arith.constant dense<0.000000e+00> : vector<64x384xf32>
    %3 = tpu.matmul %1, %2, %cst {dimension_numbers = #tpu.dot_dimension_numbers<[1], [0], [0], [1], [0, 0, 1, 1], [], []>} : vector<64x32xf32>, vector<32x384xf32>, vector<64x384xf32> -> vector<64x384xf32>
    %c0_4 = arith.constant 0 : index
    %c0_5 = arith.constant 0 : index
    %4 = vector.load %arg2[%c0_4, %c0_5] : memref<1x384xf32, #tpu.memory_space<vmem>>, vector<1x384xf32>
    %5 = vector.broadcast %4 : vector<1x384xf32> to vector<64x384xf32>
    %6 = arith.addf %3, %5 : vector<64x384xf32>
    %7 = vector.shape_cast %6 : vector<64x384xf32> to vector<8x8x384xf32>
    %c0_6 = arith.constant 0 : index
    %c0_7 = arith.constant 0 : index
    %c0_8 = arith.constant 0 : index
    %8 = vector.load %arg12[%c0_6, %c0_7, %c0_8] : memref<8x8x384xf32, #tpu.memory_space<vmem>>, vector<8x8x384xf32>
    tpu.vector_store %arg12[%c0_6, %c0_7, %c0_8], %7 {strides = array<i32>} : memref<8x8x384xf32, #tpu.memory_space<vmem>>, vector<8x8x384xf32>,
    %c0_9 = arith.constant 0 : index
    %c0_10 = arith.constant 0 : index
    %9 = vector.load %arg3[%c0_9, %c0_10] : memref<128x384xf32, #tpu.memory_space<vmem>>, vector<128x384xf32>
    %c0_11 = arith.constant 0 : index
    %c0_12 = arith.constant 0 : index
    %10 = vector.load %arg4[%c0_11, %c0_12] : memref<1x384xf32, #tpu.memory_space<vmem>>, vector<1x384xf32>
    %cst_13 = arith.constant 0.000000e+00 : f32
    %11 = vector.broadcast %cst_13 : f32 to vector<8x128xf32>
    %c0_i32 = arith.constant 0 : i32
    %c7_i32 = arith.constant 7 : i32
    %12 = arith.subi %c7_i32, %c0_i32 : i32
    %13 = arith.index_cast %c0_i32 : i32 to index
    %c0_14 = arith.constant 0 : index
    %c0_15 = arith.constant 0 : index
    %14 = vector.load %arg12[%13, %c0_14, %c0_15] : memref<8x8x384xf32, #tpu.memory_space<vmem>>, vector<1x8x384xf32>
    %15 = vector.shape_cast %14 : vector<1x8x384xf32> to vector<8x384xf32>
    %cst_16 = arith.constant dense<0.000000e+00> : vector<8x384xf32>
    %16 = tpu.matmul %11, %9, %cst_16 {dimension_numbers = #tpu.dot_dimension_numbers<[1], [0], [0], [1], [0, 0, 1, 1], [], []>} : vector<8x128xf32>, vector<128x384xf32>, vector<8x384xf32> -> vector<8x384xf32>
    %17 = vector.broadcast %10 : vector<1x384xf32> to vector<8x384xf32>
    %18 = arith.addf %16, %17 : vector<8x384xf32>
    %19 = vector.extract_strided_slice %15 {offsets = [0, 0], sizes = [8, 256], strides = [1, 1]} : vector<8x384xf32> to vector<8x256xf32>
    %20 = vector.extract_strided_slice %18 {offsets = [0, 0], sizes = [8, 256], strides = [1, 1]} : vector<8x384xf32> to vector<8x256xf32>
    %21 = arith.addf %19, %20 : vector<8x256xf32>
    %22 = arith.negf %21 : vector<8x256xf32>
    %23 = math.exp %22 : vector<8x256xf32>
    %cst_17 = arith.constant 1.000000e+00 : f32
    %24 = vector.broadcast %cst_17 : f32 to vector<8x256xf32>
    %25 = arith.addf %24, %23 : vector<8x256xf32>
    %26 = arith.divf %24, %25 : vector<8x256xf32>
    %27 = vector.extract_strided_slice %26 {offsets = [0, 0], sizes = [8, 128], strides = [1, 1]} : vector<8x256xf32> to vector<8x128xf32>
    %28 = vector.extract_strided_slice %26 {offsets = [0, 128], sizes = [8, 128], strides = [1, 1]} : vector<8x256xf32> to vector<8x128xf32>
    %29 = vector.extract_strided_slice %15 {offsets = [0, 256], sizes = [8, 128], strides = [1, 1]} : vector<8x384xf32> to vector<8x128xf32>
    %30 = vector.extract_strided_slice %18 {offsets = [0, 256], sizes = [8, 128], strides = [1, 1]} : vector<8x384xf32> to vector<8x128xf32>
    %31 = arith.mulf %27, %30 : vector<8x128xf32>
    %32 = arith.addf %29, %31 : vector<8x128xf32>
    %33 = math.tanh %32 : vector<8x128xf32>
    %cst_18 = arith.constant 1.000000e+00 : f32
    %34 = vector.broadcast %cst_18 : f32 to vector<8x128xf32>
    %35 = arith.subf %34, %28 : vector<8x128xf32>
    %36 = arith.mulf %35, %33 : vector<8x128xf32>
    %37 = arith.mulf %28, %11 : vector<8x128xf32>
    %38 = arith.addf %36, %37 : vector<8x128xf32>
    %39 = arith.index_cast %c0_i32 : i32 to index
    %c0_19 = arith.constant 0 : index
    %c0_20 = arith.constant 0 : index
    %40 = vector.load %arg13[%39, %c0_19, %c0_20] : memref<8x8x256xf32, #tpu.memory_space<vmem>>, vector<1x8x128xf32>
    %41 = vector.shape_cast %40 : vector<1x8x128xf32> to vector<8x128xf32>
    %42 = vector.shape_cast %38 : vector<8x128xf32> to vector<1x8x128xf32>
    tpu.vector_store %arg13[%39, %c0_19, %c0_20], %42 {strides = array<i32>} : memref<8x8x256xf32, #tpu.memory_space<vmem>>, vector<1x8x128xf32>,
    %43 = arith.index_cast %12 : i32 to index
    %c0_21 = arith.constant 0 : index
    %c128 = arith.constant 128 : index
    %44 = vector.load %arg13[%43, %c0_21, %c128] : memref<8x8x256xf32, #tpu.memory_space<vmem>>, vector<1x8x128xf32>
    %45 = vector.shape_cast %44 : vector<1x8x128xf32> to vector<8x128xf32>
    %46 = vector.shape_cast %38 : vector<8x128xf32> to vector<1x8x128xf32>
    tpu.vector_store %arg13[%43, %c0_21, %c128], %46 {strides = array<i32>} : memref<8x8x256xf32, #tpu.memory_space<vmem>>, vector<1x8x128xf32>,
    %c1_i32 = arith.constant 1 : i32
    %c7_i32_22 = arith.constant 7 : i32
    %47 = arith.subi %c7_i32_22, %c1_i32 : i32
    %48 = arith.index_cast %c1_i32 : i32 to index
    %c0_23 = arith.constant 0 : index
    %c0_24 = arith.constant 0 : index
    %49 = vector.load %arg12[%48, %c0_23, %c0_24] : memref<8x8x384xf32, #tpu.memory_space<vmem>>, vector<1x8x384xf32>
    %50 = vector.shape_cast %49 : vector<1x8x384xf32> to vector<8x384xf32>
    %cst_25 = arith.constant dense<0.000000e+00> : vector<8x384xf32>
    %51 = tpu.matmul %38, %9, %cst_25 {dimension_numbers = #tpu.dot_dimension_numbers<[1], [0], [0], [1], [0, 0, 1, 1], [], []>} : vector<8x128xf32>, vector<128x384xf32>, vector<8x384xf32> -> vector<8x384xf32>
    %52 = vector.broadcast %10 : vector<1x384xf32> to vector<8x384xf32>
    %53 = arith.addf %51, %52 : vector<8x384xf32>
    %54 = vector.extract_strided_slice %50 {offsets = [0, 0], sizes = [8, 256], strides = [1, 1]} : vector<8x384xf32> to vector<8x256xf32>
    %55 = vector.extract_strided_slice %53 {offsets = [0, 0], sizes = [8, 256], strides = [1, 1]} : vector<8x384xf32> to vector<8x256xf32>
    %56 = arith.addf %54, %55 : vector<8x256xf32>
    %57 = arith.negf %56 : vector<8x256xf32>
    %58 = math.exp %57 : vector<8x256xf32>
    %cst_26 = arith.constant 1.000000e+00 : f32
    %59 = vector.broadcast %cst_26 : f32 to vector<8x256xf32>
    %60 = arith.addf %59, %58 : vector<8x256xf32>
    %61 = arith.divf %59, %60 : vector<8x256xf32>
    %62 = vector.extract_strided_slice %61 {offsets = [0, 0], sizes = [8, 128], strides = [1, 1]} : vector<8x256xf32> to vector<8x128xf32>
    %63 = vector.extract_strided_slice %61 {offsets = [0, 128], sizes = [8, 128], strides = [1, 1]} : vector<8x256xf32> to vector<8x128xf32>
    %64 = vector.extract_strided_slice %50 {offsets = [0, 256], sizes = [8, 128], strides = [1, 1]} : vector<8x384xf32> to vector<8x128xf32>
    %65 = vector.extract_strided_slice %53 {offsets = [0, 256], sizes = [8, 128], strides = [1, 1]} : vector<8x384xf32> to vector<8x128xf32>
    %66 = arith.mulf %62, %65 : vector<8x128xf32>
    %67 = arith.addf %64, %66 : vector<8x128xf32>
    %68 = math.tanh %67 : vector<8x128xf32>
    %cst_27 = arith.constant 1.000000e+00 : f32
    %69 = vector.broadcast %cst_27 : f32 to vector<8x128xf32>
    %70 = arith.subf %69, %63 : vector<8x128xf32>
    %71 = arith.mulf %70, %68 : vector<8x128xf32>
    %72 = arith.mulf %63, %38 : vector<8x128xf32>
    %73 = arith.addf %71, %72 : vector<8x128xf32>
    %74 = arith.index_cast %c1_i32 : i32 to index
    %c0_28 = arith.constant 0 : index
    %c0_29 = arith.constant 0 : index
    %75 = vector.load %arg13[%74, %c0_28, %c0_29] : memref<8x8x256xf32, #tpu.memory_space<vmem>>, vector<1x8x128xf32>
    %76 = vector.shape_cast %75 : vector<1x8x128xf32> to vector<8x128xf32>
    %77 = vector.shape_cast %73 : vector<8x128xf32> to vector<1x8x128xf32>
    tpu.vector_store %arg13[%74, %c0_28, %c0_29], %77 {strides = array<i32>} : memref<8x8x256xf32, #tpu.memory_space<vmem>>, vector<1x8x128xf32>,
    %78 = arith.index_cast %47 : i32 to index
    %c0_30 = arith.constant 0 : index
    %c128_31 = arith.constant 128 : index
    %79 = vector.load %arg13[%78, %c0_30, %c128_31] : memref<8x8x256xf32, #tpu.memory_space<vmem>>, vector<1x8x128xf32>
    %80 = vector.shape_cast %79 : vector<1x8x128xf32> to vector<8x128xf32>
    %81 = vector.shape_cast %73 : vector<8x128xf32> to vector<1x8x128xf32>
    tpu.vector_store %arg13[%78, %c0_30, %c128_31], %81 {strides = array<i32>} : memref<8x8x256xf32, #tpu.memory_space<vmem>>, vector<1x8x128xf32>,
    %c2_i32 = arith.constant 2 : i32
    %c7_i32_32 = arith.constant 7 : i32
    %82 = arith.subi %c7_i32_32, %c2_i32 : i32
    %83 = arith.index_cast %c2_i32 : i32 to index
    %c0_33 = arith.constant 0 : index
    %c0_34 = arith.constant 0 : index
    %84 = vector.load %arg12[%83, %c0_33, %c0_34] : memref<8x8x384xf32, #tpu.memory_space<vmem>>, vector<1x8x384xf32>
    %85 = vector.shape_cast %84 : vector<1x8x384xf32> to vector<8x384xf32>
    %cst_35 = arith.constant dense<0.000000e+00> : vector<8x384xf32>
    %86 = tpu.matmul %73, %9, %cst_35 {dimension_numbers = #tpu.dot_dimension_numbers<[1], [0], [0], [1], [0, 0, 1, 1], [], []>} : vector<8x128xf32>, vector<128x384xf32>, vector<8x384xf32> -> vector<8x384xf32>
    %87 = vector.broadcast %10 : vector<1x384xf32> to vector<8x384xf32>
    %88 = arith.addf %86, %87 : vector<8x384xf32>
    %89 = vector.extract_strided_slice %85 {offsets = [0, 0], sizes = [8, 256], strides = [1, 1]} : vector<8x384xf32> to vector<8x256xf32>
    %90 = vector.extract_strided_slice %88 {offsets = [0, 0], sizes = [8, 256], strides = [1, 1]} : vector<8x384xf32> to vector<8x256xf32>
    %91 = arith.addf %89, %90 : vector<8x256xf32>
    %92 = arith.negf %91 : vector<8x256xf32>
    %93 = math.exp %92 : vector<8x256xf32>
    %cst_36 = arith.constant 1.000000e+00 : f32
    %94 = vector.broadcast %cst_36 : f32 to vector<8x256xf32>
    %95 = arith.addf %94, %93 : vector<8x256xf32>
    %96 = arith.divf %94, %95 : vector<8x256xf32>
    %97 = vector.extract_strided_slice %96 {offsets = [0, 0], sizes = [8, 128], strides = [1, 1]} : vector<8x256xf32> to vector<8x128xf32>
    %98 = vector.extract_strided_slice %96 {offsets = [0, 128], sizes = [8, 128], strides = [1, 1]} : vector<8x256xf32> to vector<8x128xf32>
    %99 = vector.extract_strided_slice %85 {offsets = [0, 256], sizes = [8, 128], strides = [1, 1]} : vector<8x384xf32> to vector<8x128xf32>
    %100 = vector.extract_strided_slice %88 {offsets = [0, 256], sizes = [8, 128], strides = [1, 1]} : vector<8x384xf32> to vector<8x128xf32>
    %101 = arith.mulf %97, %100 : vector<8x128xf32>
    %102 = arith.addf %99, %101 : vector<8x128xf32>
    %103 = math.tanh %102 : vector<8x128xf32>
    %cst_37 = arith.constant 1.000000e+00 : f32
    %104 = vector.broadcast %cst_37 : f32 to vector<8x128xf32>
    %105 = arith.subf %104, %98 : vector<8x128xf32>
    %106 = arith.mulf %105, %103 : vector<8x128xf32>
    %107 = arith.mulf %98, %73 : vector<8x128xf32>
    %108 = arith.addf %106, %107 : vector<8x128xf32>
    %109 = arith.index_cast %c2_i32 : i32 to index
    %c0_38 = arith.constant 0 : index
    %c0_39 = arith.constant 0 : index
    %110 = vector.load %arg13[%109, %c0_38, %c0_39] : memref<8x8x256xf32, #tpu.memory_space<vmem>>, vector<1x8x128xf32>
    %111 = vector.shape_cast %110 : vector<1x8x128xf32> to vector<8x128xf32>
    %112 = vector.shape_cast %108 : vector<8x128xf32> to vector<1x8x128xf32>
    tpu.vector_store %arg13[%109, %c0_38, %c0_39], %112 {strides = array<i32>} : memref<8x8x256xf32, #tpu.memory_space<vmem>>, vector<1x8x128xf32>,
    %113 = arith.index_cast %82 : i32 to index
    %c0_40 = arith.constant 0 : index
    %c128_41 = arith.constant 128 : index
    %114 = vector.load %arg13[%113, %c0_40, %c128_41] : memref<8x8x256xf32, #tpu.memory_space<vmem>>, vector<1x8x128xf32>
    %115 = vector.shape_cast %114 : vector<1x8x128xf32> to vector<8x128xf32>
    %116 = vector.shape_cast %108 : vector<8x128xf32> to vector<1x8x128xf32>
    tpu.vector_store %arg13[%113, %c0_40, %c128_41], %116 {strides = array<i32>} : memref<8x8x256xf32, #tpu.memory_space<vmem>>, vector<1x8x128xf32>,
    %c3_i32 = arith.constant 3 : i32
    %c7_i32_42 = arith.constant 7 : i32
    %117 = arith.subi %c7_i32_42, %c3_i32 : i32
    %118 = arith.index_cast %c3_i32 : i32 to index
    %c0_43 = arith.constant 0 : index
    %c0_44 = arith.constant 0 : index
    %119 = vector.load %arg12[%118, %c0_43, %c0_44] : memref<8x8x384xf32, #tpu.memory_space<vmem>>, vector<1x8x384xf32>
    %120 = vector.shape_cast %119 : vector<1x8x384xf32> to vector<8x384xf32>
    %cst_45 = arith.constant dense<0.000000e+00> : vector<8x384xf32>
    %121 = tpu.matmul %108, %9, %cst_45 {dimension_numbers = #tpu.dot_dimension_numbers<[1], [0], [0], [1], [0, 0, 1, 1], [], []>} : vector<8x128xf32>, vector<128x384xf32>, vector<8x384xf32> -> vector<8x384xf32>
    %122 = vector.broadcast %10 : vector<1x384xf32> to vector<8x384xf32>
    %123 = arith.addf %121, %122 : vector<8x384xf32>
    %124 = vector.extract_strided_slice %120 {offsets = [0, 0], sizes = [8, 256], strides = [1, 1]} : vector<8x384xf32> to vector<8x256xf32>
    %125 = vector.extract_strided_slice %123 {offsets = [0, 0], sizes = [8, 256], strides = [1, 1]} : vector<8x384xf32> to vector<8x256xf32>
    %126 = arith.addf %124, %125 : vector<8x256xf32>
    %127 = arith.negf %126 : vector<8x256xf32>
    %128 = math.exp %127 : vector<8x256xf32>
    %cst_46 = arith.constant 1.000000e+00 : f32
    %129 = vector.broadcast %cst_46 : f32 to vector<8x256xf32>
    %130 = arith.addf %129, %128 : vector<8x256xf32>
    %131 = arith.divf %129, %130 : vector<8x256xf32>
    %132 = vector.extract_strided_slice %131 {offsets = [0, 0], sizes = [8, 128], strides = [1, 1]} : vector<8x256xf32> to vector<8x128xf32>
    %133 = vector.extract_strided_slice %131 {offsets = [0, 128], sizes = [8, 128], strides = [1, 1]} : vector<8x256xf32> to vector<8x128xf32>
    %134 = vector.extract_strided_slice %120 {offsets = [0, 256], sizes = [8, 128], strides = [1, 1]} : vector<8x384xf32> to vector<8x128xf32>
    %135 = vector.extract_strided_slice %123 {offsets = [0, 256], sizes = [8, 128], strides = [1, 1]} : vector<8x384xf32> to vector<8x128xf32>
    %136 = arith.mulf %132, %135 : vector<8x128xf32>
    %137 = arith.addf %134, %136 : vector<8x128xf32>
    %138 = math.tanh %137 : vector<8x128xf32>
    %cst_47 = arith.constant 1.000000e+00 : f32
    %139 = vector.broadcast %cst_47 : f32 to vector<8x128xf32>
    %140 = arith.subf %139, %133 : vector<8x128xf32>
    %141 = arith.mulf %140, %138 : vector<8x128xf32>
    %142 = arith.mulf %133, %108 : vector<8x128xf32>
    %143 = arith.addf %141, %142 : vector<8x128xf32>
    %144 = arith.index_cast %c3_i32 : i32 to index
    %c0_48 = arith.constant 0 : index
    %c0_49 = arith.constant 0 : index
    %145 = vector.load %arg13[%144, %c0_48, %c0_49] : memref<8x8x256xf32, #tpu.memory_space<vmem>>, vector<1x8x128xf32>
    %146 = vector.shape_cast %145 : vector<1x8x128xf32> to vector<8x128xf32>
    %147 = vector.shape_cast %143 : vector<8x128xf32> to vector<1x8x128xf32>
    tpu.vector_store %arg13[%144, %c0_48, %c0_49], %147 {strides = array<i32>} : memref<8x8x256xf32, #tpu.memory_space<vmem>>, vector<1x8x128xf32>,
    %148 = arith.index_cast %117 : i32 to index
    %c0_50 = arith.constant 0 : index
    %c128_51 = arith.constant 128 : index
    %149 = vector.load %arg13[%148, %c0_50, %c128_51] : memref<8x8x256xf32, #tpu.memory_space<vmem>>, vector<1x8x128xf32>
    %150 = vector.shape_cast %149 : vector<1x8x128xf32> to vector<8x128xf32>
    %151 = vector.shape_cast %143 : vector<8x128xf32> to vector<1x8x128xf32>
    tpu.vector_store %arg13[%148, %c0_50, %c128_51], %151 {strides = array<i32>} : memref<8x8x256xf32, #tpu.memory_space<vmem>>, vector<1x8x128xf32>,
    %c4_i32 = arith.constant 4 : i32
    %c7_i32_52 = arith.constant 7 : i32
    %152 = arith.subi %c7_i32_52, %c4_i32 : i32
    %153 = arith.index_cast %c4_i32 : i32 to index
    %c0_53 = arith.constant 0 : index
    %c0_54 = arith.constant 0 : index
    %154 = vector.load %arg12[%153, %c0_53, %c0_54] : memref<8x8x384xf32, #tpu.memory_space<vmem>>, vector<1x8x384xf32>
    %155 = vector.shape_cast %154 : vector<1x8x384xf32> to vector<8x384xf32>
    %cst_55 = arith.constant dense<0.000000e+00> : vector<8x384xf32>
    %156 = tpu.matmul %143, %9, %cst_55 {dimension_numbers = #tpu.dot_dimension_numbers<[1], [0], [0], [1], [0, 0, 1, 1], [], []>} : vector<8x128xf32>, vector<128x384xf32>, vector<8x384xf32> -> vector<8x384xf32>
    %157 = vector.broadcast %10 : vector<1x384xf32> to vector<8x384xf32>
    %158 = arith.addf %156, %157 : vector<8x384xf32>
    %159 = vector.extract_strided_slice %155 {offsets = [0, 0], sizes = [8, 256], strides = [1, 1]} : vector<8x384xf32> to vector<8x256xf32>
    %160 = vector.extract_strided_slice %158 {offsets = [0, 0], sizes = [8, 256], strides = [1, 1]} : vector<8x384xf32> to vector<8x256xf32>
    %161 = arith.addf %159, %160 : vector<8x256xf32>
    %162 = arith.negf %161 : vector<8x256xf32>
    %163 = math.exp %162 : vector<8x256xf32>
    %cst_56 = arith.constant 1.000000e+00 : f32
    %164 = vector.broadcast %cst_56 : f32 to vector<8x256xf32>
    %165 = arith.addf %164, %163 : vector<8x256xf32>
    %166 = arith.divf %164, %165 : vector<8x256xf32>
    %167 = vector.extract_strided_slice %166 {offsets = [0, 0], sizes = [8, 128], strides = [1, 1]} : vector<8x256xf32> to vector<8x128xf32>
    %168 = vector.extract_strided_slice %166 {offsets = [0, 128], sizes = [8, 128], strides = [1, 1]} : vector<8x256xf32> to vector<8x128xf32>
    %169 = vector.extract_strided_slice %155 {offsets = [0, 256], sizes = [8, 128], strides = [1, 1]} : vector<8x384xf32> to vector<8x128xf32>
    %170 = vector.extract_strided_slice %158 {offsets = [0, 256], sizes = [8, 128], strides = [1, 1]} : vector<8x384xf32> to vector<8x128xf32>
    %171 = arith.mulf %167, %170 : vector<8x128xf32>
    %172 = arith.addf %169, %171 : vector<8x128xf32>
    %173 = math.tanh %172 : vector<8x128xf32>
    %cst_57 = arith.constant 1.000000e+00 : f32
    %174 = vector.broadcast %cst_57 : f32 to vector<8x128xf32>
    %175 = arith.subf %174, %168 : vector<8x128xf32>
    %176 = arith.mulf %175, %173 : vector<8x128xf32>
    %177 = arith.mulf %168, %143 : vector<8x128xf32>
    %178 = arith.addf %176, %177 : vector<8x128xf32>
    %179 = arith.index_cast %c4_i32 : i32 to index
    %c0_58 = arith.constant 0 : index
    %c0_59 = arith.constant 0 : index
    %180 = vector.load %arg13[%179, %c0_58, %c0_59] : memref<8x8x256xf32, #tpu.memory_space<vmem>>, vector<1x8x128xf32>
    %181 = vector.shape_cast %180 : vector<1x8x128xf32> to vector<8x128xf32>
    %182 = vector.shape_cast %178 : vector<8x128xf32> to vector<1x8x128xf32>
    tpu.vector_store %arg13[%179, %c0_58, %c0_59], %182 {strides = array<i32>} : memref<8x8x256xf32, #tpu.memory_space<vmem>>, vector<1x8x128xf32>,
    %183 = arith.index_cast %152 : i32 to index
    %c0_60 = arith.constant 0 : index
    %c128_61 = arith.constant 128 : index
    %184 = vector.load %arg13[%183, %c0_60, %c128_61] : memref<8x8x256xf32, #tpu.memory_space<vmem>>, vector<1x8x128xf32>
    %185 = vector.shape_cast %184 : vector<1x8x128xf32> to vector<8x128xf32>
    %186 = vector.shape_cast %178 : vector<8x128xf32> to vector<1x8x128xf32>
    tpu.vector_store %arg13[%183, %c0_60, %c128_61], %186 {strides = array<i32>} : memref<8x8x256xf32, #tpu.memory_space<vmem>>, vector<1x8x128xf32>,
    %c5_i32 = arith.constant 5 : i32
    %c7_i32_62 = arith.constant 7 : i32
    %187 = arith.subi %c7_i32_62, %c5_i32 : i32
    %188 = arith.index_cast %c5_i32 : i32 to index
    %c0_63 = arith.constant 0 : index
    %c0_64 = arith.constant 0 : index
    %189 = vector.load %arg12[%188, %c0_63, %c0_64] : memref<8x8x384xf32, #tpu.memory_space<vmem>>, vector<1x8x384xf32>
    %190 = vector.shape_cast %189 : vector<1x8x384xf32> to vector<8x384xf32>
    %cst_65 = arith.constant dense<0.000000e+00> : vector<8x384xf32>
    %191 = tpu.matmul %178, %9, %cst_65 {dimension_numbers = #tpu.dot_dimension_numbers<[1], [0], [0], [1], [0, 0, 1, 1], [], []>} : vector<8x128xf32>, vector<128x384xf32>, vector<8x384xf32> -> vector<8x384xf32>
    %192 = vector.broadcast %10 : vector<1x384xf32> to vector<8x384xf32>
    %193 = arith.addf %191, %192 : vector<8x384xf32>
    %194 = vector.extract_strided_slice %190 {offsets = [0, 0], sizes = [8, 256], strides = [1, 1]} : vector<8x384xf32> to vector<8x256xf32>
    %195 = vector.extract_strided_slice %193 {offsets = [0, 0], sizes = [8, 256], strides = [1, 1]} : vector<8x384xf32> to vector<8x256xf32>
    %196 = arith.addf %194, %195 : vector<8x256xf32>
    %197 = arith.negf %196 : vector<8x256xf32>
    %198 = math.exp %197 : vector<8x256xf32>
    %cst_66 = arith.constant 1.000000e+00 : f32
    %199 = vector.broadcast %cst_66 : f32 to vector<8x256xf32>
    %200 = arith.addf %199, %198 : vector<8x256xf32>
    %201 = arith.divf %199, %200 : vector<8x256xf32>
    %202 = vector.extract_strided_slice %201 {offsets = [0, 0], sizes = [8, 128], strides = [1, 1]} : vector<8x256xf32> to vector<8x128xf32>
    %203 = vector.extract_strided_slice %201 {offsets = [0, 128], sizes = [8, 128], strides = [1, 1]} : vector<8x256xf32> to vector<8x128xf32>
    %204 = vector.extract_strided_slice %190 {offsets = [0, 256], sizes = [8, 128], strides = [1, 1]} : vector<8x384xf32> to vector<8x128xf32>
    %205 = vector.extract_strided_slice %193 {offsets = [0, 256], sizes = [8, 128], strides = [1, 1]} : vector<8x384xf32> to vector<8x128xf32>
    %206 = arith.mulf %202, %205 : vector<8x128xf32>
    %207 = arith.addf %204, %206 : vector<8x128xf32>
    %208 = math.tanh %207 : vector<8x128xf32>
    %cst_67 = arith.constant 1.000000e+00 : f32
    %209 = vector.broadcast %cst_67 : f32 to vector<8x128xf32>
    %210 = arith.subf %209, %203 : vector<8x128xf32>
    %211 = arith.mulf %210, %208 : vector<8x128xf32>
    %212 = arith.mulf %203, %178 : vector<8x128xf32>
    %213 = arith.addf %211, %212 : vector<8x128xf32>
    %214 = arith.index_cast %c5_i32 : i32 to index
    %c0_68 = arith.constant 0 : index
    %c0_69 = arith.constant 0 : index
    %215 = vector.load %arg13[%214, %c0_68, %c0_69] : memref<8x8x256xf32, #tpu.memory_space<vmem>>, vector<1x8x128xf32>
    %216 = vector.shape_cast %215 : vector<1x8x128xf32> to vector<8x128xf32>
    %217 = vector.shape_cast %213 : vector<8x128xf32> to vector<1x8x128xf32>
    tpu.vector_store %arg13[%214, %c0_68, %c0_69], %217 {strides = array<i32>} : memref<8x8x256xf32, #tpu.memory_space<vmem>>, vector<1x8x128xf32>,
    %218 = arith.index_cast %187 : i32 to index
    %c0_70 = arith.constant 0 : index
    %c128_71 = arith.constant 128 : index
    %219 = vector.load %arg13[%218, %c0_70, %c128_71] : memref<8x8x256xf32, #tpu.memory_space<vmem>>, vector<1x8x128xf32>
    %220 = vector.shape_cast %219 : vector<1x8x128xf32> to vector<8x128xf32>
    %221 = vector.shape_cast %213 : vector<8x128xf32> to vector<1x8x128xf32>
    tpu.vector_store %arg13[%218, %c0_70, %c128_71], %221 {strides = array<i32>} : memref<8x8x256xf32, #tpu.memory_space<vmem>>, vector<1x8x128xf32>,
    %c6_i32 = arith.constant 6 : i32
    %c7_i32_72 = arith.constant 7 : i32
    %222 = arith.subi %c7_i32_72, %c6_i32 : i32
    %223 = arith.index_cast %c6_i32 : i32 to index
    %c0_73 = arith.constant 0 : index
    %c0_74 = arith.constant 0 : index
    %224 = vector.load %arg12[%223, %c0_73, %c0_74] : memref<8x8x384xf32, #tpu.memory_space<vmem>>, vector<1x8x384xf32>
    %225 = vector.shape_cast %224 : vector<1x8x384xf32> to vector<8x384xf32>
    %cst_75 = arith.constant dense<0.000000e+00> : vector<8x384xf32>
    %226 = tpu.matmul %213, %9, %cst_75 {dimension_numbers = #tpu.dot_dimension_numbers<[1], [0], [0], [1], [0, 0, 1, 1], [], []>} : vector<8x128xf32>, vector<128x384xf32>, vector<8x384xf32> -> vector<8x384xf32>
    %227 = vector.broadcast %10 : vector<1x384xf32> to vector<8x384xf32>
    %228 = arith.addf %226, %227 : vector<8x384xf32>
    %229 = vector.extract_strided_slice %225 {offsets = [0, 0], sizes = [8, 256], strides = [1, 1]} : vector<8x384xf32> to vector<8x256xf32>
    %230 = vector.extract_strided_slice %228 {offsets = [0, 0], sizes = [8, 256], strides = [1, 1]} : vector<8x384xf32> to vector<8x256xf32>
    %231 = arith.addf %229, %230 : vector<8x256xf32>
    %232 = arith.negf %231 : vector<8x256xf32>
    %233 = math.exp %232 : vector<8x256xf32>
    %cst_76 = arith.constant 1.000000e+00 : f32
    %234 = vector.broadcast %cst_76 : f32 to vector<8x256xf32>
    %235 = arith.addf %234, %233 : vector<8x256xf32>
    %236 = arith.divf %234, %235 : vector<8x256xf32>
    %237 = vector.extract_strided_slice %236 {offsets = [0, 0], sizes = [8, 128], strides = [1, 1]} : vector<8x256xf32> to vector<8x128xf32>
    %238 = vector.extract_strided_slice %236 {offsets = [0, 128], sizes = [8, 128], strides = [1, 1]} : vector<8x256xf32> to vector<8x128xf32>
    %239 = vector.extract_strided_slice %225 {offsets = [0, 256], sizes = [8, 128], strides = [1, 1]} : vector<8x384xf32> to vector<8x128xf32>
    %240 = vector.extract_strided_slice %228 {offsets = [0, 256], sizes = [8, 128], strides = [1, 1]} : vector<8x384xf32> to vector<8x128xf32>
    %241 = arith.mulf %237, %240 : vector<8x128xf32>
    %242 = arith.addf %239, %241 : vector<8x128xf32>
    %243 = math.tanh %242 : vector<8x128xf32>
    %cst_77 = arith.constant 1.000000e+00 : f32
    %244 = vector.broadcast %cst_77 : f32 to vector<8x128xf32>
    %245 = arith.subf %244, %238 : vector<8x128xf32>
    %246 = arith.mulf %245, %243 : vector<8x128xf32>
    %247 = arith.mulf %238, %213 : vector<8x128xf32>
    %248 = arith.addf %246, %247 : vector<8x128xf32>
    %249 = arith.index_cast %c6_i32 : i32 to index
    %c0_78 = arith.constant 0 : index
    %c0_79 = arith.constant 0 : index
    %250 = vector.load %arg13[%249, %c0_78, %c0_79] : memref<8x8x256xf32, #tpu.memory_space<vmem>>, vector<1x8x128xf32>
    %251 = vector.shape_cast %250 : vector<1x8x128xf32> to vector<8x128xf32>
    %252 = vector.shape_cast %248 : vector<8x128xf32> to vector<1x8x128xf32>
    tpu.vector_store %arg13[%249, %c0_78, %c0_79], %252 {strides = array<i32>} : memref<8x8x256xf32, #tpu.memory_space<vmem>>, vector<1x8x128xf32>,
    %253 = arith.index_cast %222 : i32 to index
    %c0_80 = arith.constant 0 : index
    %c128_81 = arith.constant 128 : index
    %254 = vector.load %arg13[%253, %c0_80, %c128_81] : memref<8x8x256xf32, #tpu.memory_space<vmem>>, vector<1x8x128xf32>
    %255 = vector.shape_cast %254 : vector<1x8x128xf32> to vector<8x128xf32>
    %256 = vector.shape_cast %248 : vector<8x128xf32> to vector<1x8x128xf32>
    tpu.vector_store %arg13[%253, %c0_80, %c128_81], %256 {strides = array<i32>} : memref<8x8x256xf32, #tpu.memory_space<vmem>>, vector<1x8x128xf32>,
    %c7_i32_82 = arith.constant 7 : i32
    %c7_i32_83 = arith.constant 7 : i32
    %257 = arith.subi %c7_i32_83, %c7_i32_82 : i32
    %258 = arith.index_cast %c7_i32_82 : i32 to index
    %c0_84 = arith.constant 0 : index
    %c0_85 = arith.constant 0 : index
    %259 = vector.load %arg12[%258, %c0_84, %c0_85] : memref<8x8x384xf32, #tpu.memory_space<vmem>>, vector<1x8x384xf32>
    %260 = vector.shape_cast %259 : vector<1x8x384xf32> to vector<8x384xf32>
    %cst_86 = arith.constant dense<0.000000e+00> : vector<8x384xf32>
    %261 = tpu.matmul %248, %9, %cst_86 {dimension_numbers = #tpu.dot_dimension_numbers<[1], [0], [0], [1], [0, 0, 1, 1], [], []>} : vector<8x128xf32>, vector<128x384xf32>, vector<8x384xf32> -> vector<8x384xf32>
    %262 = vector.broadcast %10 : vector<1x384xf32> to vector<8x384xf32>
    %263 = arith.addf %261, %262 : vector<8x384xf32>
    %264 = vector.extract_strided_slice %260 {offsets = [0, 0], sizes = [8, 256], strides = [1, 1]} : vector<8x384xf32> to vector<8x256xf32>
    %265 = vector.extract_strided_slice %263 {offsets = [0, 0], sizes = [8, 256], strides = [1, 1]} : vector<8x384xf32> to vector<8x256xf32>
    %266 = arith.addf %264, %265 : vector<8x256xf32>
    %267 = arith.negf %266 : vector<8x256xf32>
    %268 = math.exp %267 : vector<8x256xf32>
    %cst_87 = arith.constant 1.000000e+00 : f32
    %269 = vector.broadcast %cst_87 : f32 to vector<8x256xf32>
    %270 = arith.addf %269, %268 : vector<8x256xf32>
    %271 = arith.divf %269, %270 : vector<8x256xf32>
    %272 = vector.extract_strided_slice %271 {offsets = [0, 0], sizes = [8, 128], strides = [1, 1]} : vector<8x256xf32> to vector<8x128xf32>
    %273 = vector.extract_strided_slice %271 {offsets = [0, 128], sizes = [8, 128], strides = [1, 1]} : vector<8x256xf32> to vector<8x128xf32>
    %274 = vector.extract_strided_slice %260 {offsets = [0, 256], sizes = [8, 128], strides = [1, 1]} : vector<8x384xf32> to vector<8x128xf32>
    %275 = vector.extract_strided_slice %263 {offsets = [0, 256], sizes = [8, 128], strides = [1, 1]} : vector<8x384xf32> to vector<8x128xf32>
    %276 = arith.mulf %272, %275 : vector<8x128xf32>
    %277 = arith.addf %274, %276 : vector<8x128xf32>
    %278 = math.tanh %277 : vector<8x128xf32>
    %cst_88 = arith.constant 1.000000e+00 : f32
    %279 = vector.broadcast %cst_88 : f32 to vector<8x128xf32>
    %280 = arith.subf %279, %273 : vector<8x128xf32>
    %281 = arith.mulf %280, %278 : vector<8x128xf32>
    %282 = arith.mulf %273, %248 : vector<8x128xf32>
    %283 = arith.addf %281, %282 : vector<8x128xf32>
    %284 = arith.index_cast %c7_i32_82 : i32 to index
    %c0_89 = arith.constant 0 : index
    %c0_90 = arith.constant 0 : index
    %285 = vector.load %arg13[%284, %c0_89, %c0_90] : memref<8x8x256xf32, #tpu.memory_space<vmem>>, vector<1x8x128xf32>
    %286 = vector.shape_cast %285 : vector<1x8x128xf32> to vector<8x128xf32>
    %287 = vector.shape_cast %283 : vector<8x128xf32> to vector<1x8x128xf32>
    tpu.vector_store %arg13[%284, %c0_89, %c0_90], %287 {strides = array<i32>} : memref<8x8x256xf32, #tpu.memory_space<vmem>>, vector<1x8x128xf32>,
    %288 = arith.index_cast %257 : i32 to index
    %c0_91 = arith.constant 0 : index
    %c128_92 = arith.constant 128 : index
    %289 = vector.load %arg13[%288, %c0_91, %c128_92] : memref<8x8x256xf32, #tpu.memory_space<vmem>>, vector<1x8x128xf32>
    %290 = vector.shape_cast %289 : vector<1x8x128xf32> to vector<8x128xf32>
    %291 = vector.shape_cast %283 : vector<8x128xf32> to vector<1x8x128xf32>
    tpu.vector_store %arg13[%288, %c0_91, %c128_92], %291 {strides = array<i32>} : memref<8x8x256xf32, #tpu.memory_space<vmem>>, vector<1x8x128xf32>,
    %c8_i32 = arith.constant 8 : i32
    %c0_93 = arith.constant 0 : index
    %c0_94 = arith.constant 0 : index
    %c0_95 = arith.constant 0 : index
    %292 = vector.load %arg13[%c0_93, %c0_94, %c0_95] : memref<8x8x256xf32, #tpu.memory_space<vmem>>, vector<8x8x256xf32>
    %293 = vector.shape_cast %292 : vector<8x8x256xf32> to vector<64x256xf32>
    %c0_96 = arith.constant 0 : index
    %c0_97 = arith.constant 0 : index
    %294 = vector.load %arg5[%c0_96, %c0_97] : memref<256x384xf32, #tpu.memory_space<vmem>>, vector<256x384xf32>
    %cst_98 = arith.constant dense<0.000000e+00> : vector<64x384xf32>
    %295 = tpu.matmul %293, %294, %cst_98 {dimension_numbers = #tpu.dot_dimension_numbers<[1], [0], [0], [1], [0, 0, 1, 1], [], []>} : vector<64x256xf32>, vector<256x384xf32>, vector<64x384xf32> -> vector<64x384xf32>
    %c0_99 = arith.constant 0 : index
    %c0_100 = arith.constant 0 : index
    %296 = vector.load %arg6[%c0_99, %c0_100] : memref<1x384xf32, #tpu.memory_space<vmem>>, vector<1x384xf32>
    %297 = vector.broadcast %296 : vector<1x384xf32> to vector<64x384xf32>
    %298 = arith.addf %295, %297 : vector<64x384xf32>
    %299 = vector.shape_cast %298 : vector<64x384xf32> to vector<8x8x384xf32>
    %c0_101 = arith.constant 0 : index
    %c0_102 = arith.constant 0 : index
    %c0_103 = arith.constant 0 : index
    %300 = vector.load %arg12[%c0_101, %c0_102, %c0_103] : memref<8x8x384xf32, #tpu.memory_space<vmem>>, vector<8x8x384xf32>
    tpu.vector_store %arg12[%c0_101, %c0_102, %c0_103], %299 {strides = array<i32>} : memref<8x8x384xf32, #tpu.memory_space<vmem>>, vector<8x8x384xf32>,
    %c0_104 = arith.constant 0 : index
    %c0_105 = arith.constant 0 : index
    %301 = vector.load %arg7[%c0_104, %c0_105] : memref<128x384xf32, #tpu.memory_space<vmem>>, vector<128x384xf32>
    %c0_106 = arith.constant 0 : index
    %c0_107 = arith.constant 0 : index
    %302 = vector.load %arg8[%c0_106, %c0_107] : memref<1x384xf32, #tpu.memory_space<vmem>>, vector<1x384xf32>
    %cst_108 = arith.constant 0.000000e+00 : f32
    %303 = vector.broadcast %cst_108 : f32 to vector<8x128xf32>
    %c0_i32_109 = arith.constant 0 : i32
    %c7_i32_110 = arith.constant 7 : i32
    %304 = arith.subi %c7_i32_110, %c0_i32_109 : i32
    %305 = arith.index_cast %c0_i32_109 : i32 to index
    %c0_111 = arith.constant 0 : index
    %c0_112 = arith.constant 0 : index
    %306 = vector.load %arg12[%305, %c0_111, %c0_112] : memref<8x8x384xf32, #tpu.memory_space<vmem>>, vector<1x8x384xf32>
    %307 = vector.shape_cast %306 : vector<1x8x384xf32> to vector<8x384xf32>
    %cst_113 = arith.constant dense<0.000000e+00> : vector<8x384xf32>
    %308 = tpu.matmul %303, %301, %cst_113 {dimension_numbers = #tpu.dot_dimension_numbers<[1], [0], [0], [1], [0, 0, 1, 1], [], []>} : vector<8x128xf32>, vector<128x384xf32>, vector<8x384xf32> -> vector<8x384xf32>
    %309 = vector.broadcast %302 : vector<1x384xf32> to vector<8x384xf32>
    %310 = arith.addf %308, %309 : vector<8x384xf32>
    %311 = vector.extract_strided_slice %307 {offsets = [0, 0], sizes = [8, 256], strides = [1, 1]} : vector<8x384xf32> to vector<8x256xf32>
    %312 = vector.extract_strided_slice %310 {offsets = [0, 0], sizes = [8, 256], strides = [1, 1]} : vector<8x384xf32> to vector<8x256xf32>
    %313 = arith.addf %311, %312 : vector<8x256xf32>
    %314 = arith.negf %313 : vector<8x256xf32>
    %315 = math.exp %314 : vector<8x256xf32>
    %cst_114 = arith.constant 1.000000e+00 : f32
    %316 = vector.broadcast %cst_114 : f32 to vector<8x256xf32>
    %317 = arith.addf %316, %315 : vector<8x256xf32>
    %318 = arith.divf %316, %317 : vector<8x256xf32>
    %319 = vector.extract_strided_slice %318 {offsets = [0, 0], sizes = [8, 128], strides = [1, 1]} : vector<8x256xf32> to vector<8x128xf32>
    %320 = vector.extract_strided_slice %318 {offsets = [0, 128], sizes = [8, 128], strides = [1, 1]} : vector<8x256xf32> to vector<8x128xf32>
    %321 = vector.extract_strided_slice %307 {offsets = [0, 256], sizes = [8, 128], strides = [1, 1]} : vector<8x384xf32> to vector<8x128xf32>
    %322 = vector.extract_strided_slice %310 {offsets = [0, 256], sizes = [8, 128], strides = [1, 1]} : vector<8x384xf32> to vector<8x128xf32>
    %323 = arith.mulf %319, %322 : vector<8x128xf32>
    %324 = arith.addf %321, %323 : vector<8x128xf32>
    %325 = math.tanh %324 : vector<8x128xf32>
    %cst_115 = arith.constant 1.000000e+00 : f32
    %326 = vector.broadcast %cst_115 : f32 to vector<8x128xf32>
    %327 = arith.subf %326, %320 : vector<8x128xf32>
    %328 = arith.mulf %327, %325 : vector<8x128xf32>
    %329 = arith.mulf %320, %303 : vector<8x128xf32>
    %330 = arith.addf %328, %329 : vector<8x128xf32>
    %331 = arith.index_cast %c0_i32_109 : i32 to index
    %c0_116 = arith.constant 0 : index
    %c0_117 = arith.constant 0 : index
    %332 = vector.load %arg14[%331, %c0_116, %c0_117] : memref<8x8x256xf32, #tpu.memory_space<vmem>>, vector<1x8x128xf32>
    %333 = vector.shape_cast %332 : vector<1x8x128xf32> to vector<8x128xf32>
    %334 = vector.shape_cast %330 : vector<8x128xf32> to vector<1x8x128xf32>
    tpu.vector_store %arg14[%331, %c0_116, %c0_117], %334 {strides = array<i32>} : memref<8x8x256xf32, #tpu.memory_space<vmem>>, vector<1x8x128xf32>,
    %335 = arith.index_cast %304 : i32 to index
    %c0_118 = arith.constant 0 : index
    %c128_119 = arith.constant 128 : index
    %336 = vector.load %arg14[%335, %c0_118, %c128_119] : memref<8x8x256xf32, #tpu.memory_space<vmem>>, vector<1x8x128xf32>
    %337 = vector.shape_cast %336 : vector<1x8x128xf32> to vector<8x128xf32>
    %338 = vector.shape_cast %330 : vector<8x128xf32> to vector<1x8x128xf32>
    tpu.vector_store %arg14[%335, %c0_118, %c128_119], %338 {strides = array<i32>} : memref<8x8x256xf32, #tpu.memory_space<vmem>>, vector<1x8x128xf32>,
    %c1_i32_120 = arith.constant 1 : i32
    %c7_i32_121 = arith.constant 7 : i32
    %339 = arith.subi %c7_i32_121, %c1_i32_120 : i32
    %340 = arith.index_cast %c1_i32_120 : i32 to index
    %c0_122 = arith.constant 0 : index
    %c0_123 = arith.constant 0 : index
    %341 = vector.load %arg12[%340, %c0_122, %c0_123] : memref<8x8x384xf32, #tpu.memory_space<vmem>>, vector<1x8x384xf32>
    %342 = vector.shape_cast %341 : vector<1x8x384xf32> to vector<8x384xf32>
    %cst_124 = arith.constant dense<0.000000e+00> : vector<8x384xf32>
    %343 = tpu.matmul %330, %301, %cst_124 {dimension_numbers = #tpu.dot_dimension_numbers<[1], [0], [0], [1], [0, 0, 1, 1], [], []>} : vector<8x128xf32>, vector<128x384xf32>, vector<8x384xf32> -> vector<8x384xf32>
    %344 = vector.broadcast %302 : vector<1x384xf32> to vector<8x384xf32>
    %345 = arith.addf %343, %344 : vector<8x384xf32>
    %346 = vector.extract_strided_slice %342 {offsets = [0, 0], sizes = [8, 256], strides = [1, 1]} : vector<8x384xf32> to vector<8x256xf32>
    %347 = vector.extract_strided_slice %345 {offsets = [0, 0], sizes = [8, 256], strides = [1, 1]} : vector<8x384xf32> to vector<8x256xf32>
    %348 = arith.addf %346, %347 : vector<8x256xf32>
    %349 = arith.negf %348 : vector<8x256xf32>
    %350 = math.exp %349 : vector<8x256xf32>
    %cst_125 = arith.constant 1.000000e+00 : f32
    %351 = vector.broadcast %cst_125 : f32 to vector<8x256xf32>
    %352 = arith.addf %351, %350 : vector<8x256xf32>
    %353 = arith.divf %351, %352 : vector<8x256xf32>
    %354 = vector.extract_strided_slice %353 {offsets = [0, 0], sizes = [8, 128], strides = [1, 1]} : vector<8x256xf32> to vector<8x128xf32>
    %355 = vector.extract_strided_slice %353 {offsets = [0, 128], sizes = [8, 128], strides = [1, 1]} : vector<8x256xf32> to vector<8x128xf32>
    %356 = vector.extract_strided_slice %342 {offsets = [0, 256], sizes = [8, 128], strides = [1, 1]} : vector<8x384xf32> to vector<8x128xf32>
    %357 = vector.extract_strided_slice %345 {offsets = [0, 256], sizes = [8, 128], strides = [1, 1]} : vector<8x384xf32> to vector<8x128xf32>
    %358 = arith.mulf %354, %357 : vector<8x128xf32>
    %359 = arith.addf %356, %358 : vector<8x128xf32>
    %360 = math.tanh %359 : vector<8x128xf32>
    %cst_126 = arith.constant 1.000000e+00 : f32
    %361 = vector.broadcast %cst_126 : f32 to vector<8x128xf32>
    %362 = arith.subf %361, %355 : vector<8x128xf32>
    %363 = arith.mulf %362, %360 : vector<8x128xf32>
    %364 = arith.mulf %355, %330 : vector<8x128xf32>
    %365 = arith.addf %363, %364 : vector<8x128xf32>
    %366 = arith.index_cast %c1_i32_120 : i32 to index
    %c0_127 = arith.constant 0 : index
    %c0_128 = arith.constant 0 : index
    %367 = vector.load %arg14[%366, %c0_127, %c0_128] : memref<8x8x256xf32, #tpu.memory_space<vmem>>, vector<1x8x128xf32>
    %368 = vector.shape_cast %367 : vector<1x8x128xf32> to vector<8x128xf32>
    %369 = vector.shape_cast %365 : vector<8x128xf32> to vector<1x8x128xf32>
    tpu.vector_store %arg14[%366, %c0_127, %c0_128], %369 {strides = array<i32>} : memref<8x8x256xf32, #tpu.memory_space<vmem>>, vector<1x8x128xf32>,
    %370 = arith.index_cast %339 : i32 to index
    %c0_129 = arith.constant 0 : index
    %c128_130 = arith.constant 128 : index
    %371 = vector.load %arg14[%370, %c0_129, %c128_130] : memref<8x8x256xf32, #tpu.memory_space<vmem>>, vector<1x8x128xf32>
    %372 = vector.shape_cast %371 : vector<1x8x128xf32> to vector<8x128xf32>
    %373 = vector.shape_cast %365 : vector<8x128xf32> to vector<1x8x128xf32>
    tpu.vector_store %arg14[%370, %c0_129, %c128_130], %373 {strides = array<i32>} : memref<8x8x256xf32, #tpu.memory_space<vmem>>, vector<1x8x128xf32>,
    %c2_i32_131 = arith.constant 2 : i32
    %c7_i32_132 = arith.constant 7 : i32
    %374 = arith.subi %c7_i32_132, %c2_i32_131 : i32
    %375 = arith.index_cast %c2_i32_131 : i32 to index
    %c0_133 = arith.constant 0 : index
    %c0_134 = arith.constant 0 : index
    %376 = vector.load %arg12[%375, %c0_133, %c0_134] : memref<8x8x384xf32, #tpu.memory_space<vmem>>, vector<1x8x384xf32>
    %377 = vector.shape_cast %376 : vector<1x8x384xf32> to vector<8x384xf32>
    %cst_135 = arith.constant dense<0.000000e+00> : vector<8x384xf32>
    %378 = tpu.matmul %365, %301, %cst_135 {dimension_numbers = #tpu.dot_dimension_numbers<[1], [0], [0], [1], [0, 0, 1, 1], [], []>} : vector<8x128xf32>, vector<128x384xf32>, vector<8x384xf32> -> vector<8x384xf32>
    %379 = vector.broadcast %302 : vector<1x384xf32> to vector<8x384xf32>
    %380 = arith.addf %378, %379 : vector<8x384xf32>
    %381 = vector.extract_strided_slice %377 {offsets = [0, 0], sizes = [8, 256], strides = [1, 1]} : vector<8x384xf32> to vector<8x256xf32>
    %382 = vector.extract_strided_slice %380 {offsets = [0, 0], sizes = [8, 256], strides = [1, 1]} : vector<8x384xf32> to vector<8x256xf32>
    %383 = arith.addf %381, %382 : vector<8x256xf32>
    %384 = arith.negf %383 : vector<8x256xf32>
    %385 = math.exp %384 : vector<8x256xf32>
    %cst_136 = arith.constant 1.000000e+00 : f32
    %386 = vector.broadcast %cst_136 : f32 to vector<8x256xf32>
    %387 = arith.addf %386, %385 : vector<8x256xf32>
    %388 = arith.divf %386, %387 : vector<8x256xf32>
    %389 = vector.extract_strided_slice %388 {offsets = [0, 0], sizes = [8, 128], strides = [1, 1]} : vector<8x256xf32> to vector<8x128xf32>
    %390 = vector.extract_strided_slice %388 {offsets = [0, 128], sizes = [8, 128], strides = [1, 1]} : vector<8x256xf32> to vector<8x128xf32>
    %391 = vector.extract_strided_slice %377 {offsets = [0, 256], sizes = [8, 128], strides = [1, 1]} : vector<8x384xf32> to vector<8x128xf32>
    %392 = vector.extract_strided_slice %380 {offsets = [0, 256], sizes = [8, 128], strides = [1, 1]} : vector<8x384xf32> to vector<8x128xf32>
    %393 = arith.mulf %389, %392 : vector<8x128xf32>
    %394 = arith.addf %391, %393 : vector<8x128xf32>
    %395 = math.tanh %394 : vector<8x128xf32>
    %cst_137 = arith.constant 1.000000e+00 : f32
    %396 = vector.broadcast %cst_137 : f32 to vector<8x128xf32>
    %397 = arith.subf %396, %390 : vector<8x128xf32>
    %398 = arith.mulf %397, %395 : vector<8x128xf32>
    %399 = arith.mulf %390, %365 : vector<8x128xf32>
    %400 = arith.addf %398, %399 : vector<8x128xf32>
    %401 = arith.index_cast %c2_i32_131 : i32 to index
    %c0_138 = arith.constant 0 : index
    %c0_139 = arith.constant 0 : index
    %402 = vector.load %arg14[%401, %c0_138, %c0_139] : memref<8x8x256xf32, #tpu.memory_space<vmem>>, vector<1x8x128xf32>
    %403 = vector.shape_cast %402 : vector<1x8x128xf32> to vector<8x128xf32>
    %404 = vector.shape_cast %400 : vector<8x128xf32> to vector<1x8x128xf32>
    tpu.vector_store %arg14[%401, %c0_138, %c0_139], %404 {strides = array<i32>} : memref<8x8x256xf32, #tpu.memory_space<vmem>>, vector<1x8x128xf32>,
    %405 = arith.index_cast %374 : i32 to index
    %c0_140 = arith.constant 0 : index
    %c128_141 = arith.constant 128 : index
    %406 = vector.load %arg14[%405, %c0_140, %c128_141] : memref<8x8x256xf32, #tpu.memory_space<vmem>>, vector<1x8x128xf32>
    %407 = vector.shape_cast %406 : vector<1x8x128xf32> to vector<8x128xf32>
    %408 = vector.shape_cast %400 : vector<8x128xf32> to vector<1x8x128xf32>
    tpu.vector_store %arg14[%405, %c0_140, %c128_141], %408 {strides = array<i32>} : memref<8x8x256xf32, #tpu.memory_space<vmem>>, vector<1x8x128xf32>,
    %c3_i32_142 = arith.constant 3 : i32
    %c7_i32_143 = arith.constant 7 : i32
    %409 = arith.subi %c7_i32_143, %c3_i32_142 : i32
    %410 = arith.index_cast %c3_i32_142 : i32 to index
    %c0_144 = arith.constant 0 : index
    %c0_145 = arith.constant 0 : index
    %411 = vector.load %arg12[%410, %c0_144, %c0_145] : memref<8x8x384xf32, #tpu.memory_space<vmem>>, vector<1x8x384xf32>
    %412 = vector.shape_cast %411 : vector<1x8x384xf32> to vector<8x384xf32>
    %cst_146 = arith.constant dense<0.000000e+00> : vector<8x384xf32>
    %413 = tpu.matmul %400, %301, %cst_146 {dimension_numbers = #tpu.dot_dimension_numbers<[1], [0], [0], [1], [0, 0, 1, 1], [], []>} : vector<8x128xf32>, vector<128x384xf32>, vector<8x384xf32> -> vector<8x384xf32>
    %414 = vector.broadcast %302 : vector<1x384xf32> to vector<8x384xf32>
    %415 = arith.addf %413, %414 : vector<8x384xf32>
    %416 = vector.extract_strided_slice %412 {offsets = [0, 0], sizes = [8, 256], strides = [1, 1]} : vector<8x384xf32> to vector<8x256xf32>
    %417 = vector.extract_strided_slice %415 {offsets = [0, 0], sizes = [8, 256], strides = [1, 1]} : vector<8x384xf32> to vector<8x256xf32>
    %418 = arith.addf %416, %417 : vector<8x256xf32>
    %419 = arith.negf %418 : vector<8x256xf32>
    %420 = math.exp %419 : vector<8x256xf32>
    %cst_147 = arith.constant 1.000000e+00 : f32
    %421 = vector.broadcast %cst_147 : f32 to vector<8x256xf32>
    %422 = arith.addf %421, %420 : vector<8x256xf32>
    %423 = arith.divf %421, %422 : vector<8x256xf32>
    %424 = vector.extract_strided_slice %423 {offsets = [0, 0], sizes = [8, 128], strides = [1, 1]} : vector<8x256xf32> to vector<8x128xf32>
    %425 = vector.extract_strided_slice %423 {offsets = [0, 128], sizes = [8, 128], strides = [1, 1]} : vector<8x256xf32> to vector<8x128xf32>
    %426 = vector.extract_strided_slice %412 {offsets = [0, 256], sizes = [8, 128], strides = [1, 1]} : vector<8x384xf32> to vector<8x128xf32>
    %427 = vector.extract_strided_slice %415 {offsets = [0, 256], sizes = [8, 128], strides = [1, 1]} : vector<8x384xf32> to vector<8x128xf32>
    %428 = arith.mulf %424, %427 : vector<8x128xf32>
    %429 = arith.addf %426, %428 : vector<8x128xf32>
    %430 = math.tanh %429 : vector<8x128xf32>
    %cst_148 = arith.constant 1.000000e+00 : f32
    %431 = vector.broadcast %cst_148 : f32 to vector<8x128xf32>
    %432 = arith.subf %431, %425 : vector<8x128xf32>
    %433 = arith.mulf %432, %430 : vector<8x128xf32>
    %434 = arith.mulf %425, %400 : vector<8x128xf32>
    %435 = arith.addf %433, %434 : vector<8x128xf32>
    %436 = arith.index_cast %c3_i32_142 : i32 to index
    %c0_149 = arith.constant 0 : index
    %c0_150 = arith.constant 0 : index
    %437 = vector.load %arg14[%436, %c0_149, %c0_150] : memref<8x8x256xf32, #tpu.memory_space<vmem>>, vector<1x8x128xf32>
    %438 = vector.shape_cast %437 : vector<1x8x128xf32> to vector<8x128xf32>
    %439 = vector.shape_cast %435 : vector<8x128xf32> to vector<1x8x128xf32>
    tpu.vector_store %arg14[%436, %c0_149, %c0_150], %439 {strides = array<i32>} : memref<8x8x256xf32, #tpu.memory_space<vmem>>, vector<1x8x128xf32>,
    %440 = arith.index_cast %409 : i32 to index
    %c0_151 = arith.constant 0 : index
    %c128_152 = arith.constant 128 : index
    %441 = vector.load %arg14[%440, %c0_151, %c128_152] : memref<8x8x256xf32, #tpu.memory_space<vmem>>, vector<1x8x128xf32>
    %442 = vector.shape_cast %441 : vector<1x8x128xf32> to vector<8x128xf32>
    %443 = vector.shape_cast %435 : vector<8x128xf32> to vector<1x8x128xf32>
    tpu.vector_store %arg14[%440, %c0_151, %c128_152], %443 {strides = array<i32>} : memref<8x8x256xf32, #tpu.memory_space<vmem>>, vector<1x8x128xf32>,
    %c4_i32_153 = arith.constant 4 : i32
    %c7_i32_154 = arith.constant 7 : i32
    %444 = arith.subi %c7_i32_154, %c4_i32_153 : i32
    %445 = arith.index_cast %c4_i32_153 : i32 to index
    %c0_155 = arith.constant 0 : index
    %c0_156 = arith.constant 0 : index
    %446 = vector.load %arg12[%445, %c0_155, %c0_156] : memref<8x8x384xf32, #tpu.memory_space<vmem>>, vector<1x8x384xf32>
    %447 = vector.shape_cast %446 : vector<1x8x384xf32> to vector<8x384xf32>
    %cst_157 = arith.constant dense<0.000000e+00> : vector<8x384xf32>
    %448 = tpu.matmul %435, %301, %cst_157 {dimension_numbers = #tpu.dot_dimension_numbers<[1], [0], [0], [1], [0, 0, 1, 1], [], []>} : vector<8x128xf32>, vector<128x384xf32>, vector<8x384xf32> -> vector<8x384xf32>
    %449 = vector.broadcast %302 : vector<1x384xf32> to vector<8x384xf32>
    %450 = arith.addf %448, %449 : vector<8x384xf32>
    %451 = vector.extract_strided_slice %447 {offsets = [0, 0], sizes = [8, 256], strides = [1, 1]} : vector<8x384xf32> to vector<8x256xf32>
    %452 = vector.extract_strided_slice %450 {offsets = [0, 0], sizes = [8, 256], strides = [1, 1]} : vector<8x384xf32> to vector<8x256xf32>
    %453 = arith.addf %451, %452 : vector<8x256xf32>
    %454 = arith.negf %453 : vector<8x256xf32>
    %455 = math.exp %454 : vector<8x256xf32>
    %cst_158 = arith.constant 1.000000e+00 : f32
    %456 = vector.broadcast %cst_158 : f32 to vector<8x256xf32>
    %457 = arith.addf %456, %455 : vector<8x256xf32>
    %458 = arith.divf %456, %457 : vector<8x256xf32>
    %459 = vector.extract_strided_slice %458 {offsets = [0, 0], sizes = [8, 128], strides = [1, 1]} : vector<8x256xf32> to vector<8x128xf32>
    %460 = vector.extract_strided_slice %458 {offsets = [0, 128], sizes = [8, 128], strides = [1, 1]} : vector<8x256xf32> to vector<8x128xf32>
    %461 = vector.extract_strided_slice %447 {offsets = [0, 256], sizes = [8, 128], strides = [1, 1]} : vector<8x384xf32> to vector<8x128xf32>
    %462 = vector.extract_strided_slice %450 {offsets = [0, 256], sizes = [8, 128], strides = [1, 1]} : vector<8x384xf32> to vector<8x128xf32>
    %463 = arith.mulf %459, %462 : vector<8x128xf32>
    %464 = arith.addf %461, %463 : vector<8x128xf32>
    %465 = math.tanh %464 : vector<8x128xf32>
    %cst_159 = arith.constant 1.000000e+00 : f32
    %466 = vector.broadcast %cst_159 : f32 to vector<8x128xf32>
    %467 = arith.subf %466, %460 : vector<8x128xf32>
    %468 = arith.mulf %467, %465 : vector<8x128xf32>
    %469 = arith.mulf %460, %435 : vector<8x128xf32>
    %470 = arith.addf %468, %469 : vector<8x128xf32>
    %471 = arith.index_cast %c4_i32_153 : i32 to index
    %c0_160 = arith.constant 0 : index
    %c0_161 = arith.constant 0 : index
    %472 = vector.load %arg14[%471, %c0_160, %c0_161] : memref<8x8x256xf32, #tpu.memory_space<vmem>>, vector<1x8x128xf32>
    %473 = vector.shape_cast %472 : vector<1x8x128xf32> to vector<8x128xf32>
    %474 = vector.shape_cast %470 : vector<8x128xf32> to vector<1x8x128xf32>
    tpu.vector_store %arg14[%471, %c0_160, %c0_161], %474 {strides = array<i32>} : memref<8x8x256xf32, #tpu.memory_space<vmem>>, vector<1x8x128xf32>,
    %475 = arith.index_cast %444 : i32 to index
    %c0_162 = arith.constant 0 : index
    %c128_163 = arith.constant 128 : index
    %476 = vector.load %arg14[%475, %c0_162, %c128_163] : memref<8x8x256xf32, #tpu.memory_space<vmem>>, vector<1x8x128xf32>
    %477 = vector.shape_cast %476 : vector<1x8x128xf32> to vector<8x128xf32>
    %478 = vector.shape_cast %470 : vector<8x128xf32> to vector<1x8x128xf32>
    tpu.vector_store %arg14[%475, %c0_162, %c128_163], %478 {strides = array<i32>} : memref<8x8x256xf32, #tpu.memory_space<vmem>>, vector<1x8x128xf32>,
    %c5_i32_164 = arith.constant 5 : i32
    %c7_i32_165 = arith.constant 7 : i32
    %479 = arith.subi %c7_i32_165, %c5_i32_164 : i32
    %480 = arith.index_cast %c5_i32_164 : i32 to index
    %c0_166 = arith.constant 0 : index
    %c0_167 = arith.constant 0 : index
    %481 = vector.load %arg12[%480, %c0_166, %c0_167] : memref<8x8x384xf32, #tpu.memory_space<vmem>>, vector<1x8x384xf32>
    %482 = vector.shape_cast %481 : vector<1x8x384xf32> to vector<8x384xf32>
    %cst_168 = arith.constant dense<0.000000e+00> : vector<8x384xf32>
    %483 = tpu.matmul %470, %301, %cst_168 {dimension_numbers = #tpu.dot_dimension_numbers<[1], [0], [0], [1], [0, 0, 1, 1], [], []>} : vector<8x128xf32>, vector<128x384xf32>, vector<8x384xf32> -> vector<8x384xf32>
    %484 = vector.broadcast %302 : vector<1x384xf32> to vector<8x384xf32>
    %485 = arith.addf %483, %484 : vector<8x384xf32>
    %486 = vector.extract_strided_slice %482 {offsets = [0, 0], sizes = [8, 256], strides = [1, 1]} : vector<8x384xf32> to vector<8x256xf32>
    %487 = vector.extract_strided_slice %485 {offsets = [0, 0], sizes = [8, 256], strides = [1, 1]} : vector<8x384xf32> to vector<8x256xf32>
    %488 = arith.addf %486, %487 : vector<8x256xf32>
    %489 = arith.negf %488 : vector<8x256xf32>
    %490 = math.exp %489 : vector<8x256xf32>
    %cst_169 = arith.constant 1.000000e+00 : f32
    %491 = vector.broadcast %cst_169 : f32 to vector<8x256xf32>
    %492 = arith.addf %491, %490 : vector<8x256xf32>
    %493 = arith.divf %491, %492 : vector<8x256xf32>
    %494 = vector.extract_strided_slice %493 {offsets = [0, 0], sizes = [8, 128], strides = [1, 1]} : vector<8x256xf32> to vector<8x128xf32>
    %495 = vector.extract_strided_slice %493 {offsets = [0, 128], sizes = [8, 128], strides = [1, 1]} : vector<8x256xf32> to vector<8x128xf32>
    %496 = vector.extract_strided_slice %482 {offsets = [0, 256], sizes = [8, 128], strides = [1, 1]} : vector<8x384xf32> to vector<8x128xf32>
    %497 = vector.extract_strided_slice %485 {offsets = [0, 256], sizes = [8, 128], strides = [1, 1]} : vector<8x384xf32> to vector<8x128xf32>
    %498 = arith.mulf %494, %497 : vector<8x128xf32>
    %499 = arith.addf %496, %498 : vector<8x128xf32>
    %500 = math.tanh %499 : vector<8x128xf32>
    %cst_170 = arith.constant 1.000000e+00 : f32
    %501 = vector.broadcast %cst_170 : f32 to vector<8x128xf32>
    %502 = arith.subf %501, %495 : vector<8x128xf32>
    %503 = arith.mulf %502, %500 : vector<8x128xf32>
    %504 = arith.mulf %495, %470 : vector<8x128xf32>
    %505 = arith.addf %503, %504 : vector<8x128xf32>
    %506 = arith.index_cast %c5_i32_164 : i32 to index
    %c0_171 = arith.constant 0 : index
    %c0_172 = arith.constant 0 : index
    %507 = vector.load %arg14[%506, %c0_171, %c0_172] : memref<8x8x256xf32, #tpu.memory_space<vmem>>, vector<1x8x128xf32>
    %508 = vector.shape_cast %507 : vector<1x8x128xf32> to vector<8x128xf32>
    %509 = vector.shape_cast %505 : vector<8x128xf32> to vector<1x8x128xf32>
    tpu.vector_store %arg14[%506, %c0_171, %c0_172], %509 {strides = array<i32>} : memref<8x8x256xf32, #tpu.memory_space<vmem>>, vector<1x8x128xf32>,
    %510 = arith.index_cast %479 : i32 to index
    %c0_173 = arith.constant 0 : index
    %c128_174 = arith.constant 128 : index
    %511 = vector.load %arg14[%510, %c0_173, %c128_174] : memref<8x8x256xf32, #tpu.memory_space<vmem>>, vector<1x8x128xf32>
    %512 = vector.shape_cast %511 : vector<1x8x128xf32> to vector<8x128xf32>
    %513 = vector.shape_cast %505 : vector<8x128xf32> to vector<1x8x128xf32>
    tpu.vector_store %arg14[%510, %c0_173, %c128_174], %513 {strides = array<i32>} : memref<8x8x256xf32, #tpu.memory_space<vmem>>, vector<1x8x128xf32>,
    %c6_i32_175 = arith.constant 6 : i32
    %c7_i32_176 = arith.constant 7 : i32
    %514 = arith.subi %c7_i32_176, %c6_i32_175 : i32
    %515 = arith.index_cast %c6_i32_175 : i32 to index
    %c0_177 = arith.constant 0 : index
    %c0_178 = arith.constant 0 : index
    %516 = vector.load %arg12[%515, %c0_177, %c0_178] : memref<8x8x384xf32, #tpu.memory_space<vmem>>, vector<1x8x384xf32>
    %517 = vector.shape_cast %516 : vector<1x8x384xf32> to vector<8x384xf32>
    %cst_179 = arith.constant dense<0.000000e+00> : vector<8x384xf32>
    %518 = tpu.matmul %505, %301, %cst_179 {dimension_numbers = #tpu.dot_dimension_numbers<[1], [0], [0], [1], [0, 0, 1, 1], [], []>} : vector<8x128xf32>, vector<128x384xf32>, vector<8x384xf32> -> vector<8x384xf32>
    %519 = vector.broadcast %302 : vector<1x384xf32> to vector<8x384xf32>
    %520 = arith.addf %518, %519 : vector<8x384xf32>
    %521 = vector.extract_strided_slice %517 {offsets = [0, 0], sizes = [8, 256], strides = [1, 1]} : vector<8x384xf32> to vector<8x256xf32>
    %522 = vector.extract_strided_slice %520 {offsets = [0, 0], sizes = [8, 256], strides = [1, 1]} : vector<8x384xf32> to vector<8x256xf32>
    %523 = arith.addf %521, %522 : vector<8x256xf32>
    %524 = arith.negf %523 : vector<8x256xf32>
    %525 = math.exp %524 : vector<8x256xf32>
    %cst_180 = arith.constant 1.000000e+00 : f32
    %526 = vector.broadcast %cst_180 : f32 to vector<8x256xf32>
    %527 = arith.addf %526, %525 : vector<8x256xf32>
    %528 = arith.divf %526, %527 : vector<8x256xf32>
    %529 = vector.extract_strided_slice %528 {offsets = [0, 0], sizes = [8, 128], strides = [1, 1]} : vector<8x256xf32> to vector<8x128xf32>
    %530 = vector.extract_strided_slice %528 {offsets = [0, 128], sizes = [8, 128], strides = [1, 1]} : vector<8x256xf32> to vector<8x128xf32>
    %531 = vector.extract_strided_slice %517 {offsets = [0, 256], sizes = [8, 128], strides = [1, 1]} : vector<8x384xf32> to vector<8x128xf32>
    %532 = vector.extract_strided_slice %520 {offsets = [0, 256], sizes = [8, 128], strides = [1, 1]} : vector<8x384xf32> to vector<8x128xf32>
    %533 = arith.mulf %529, %532 : vector<8x128xf32>
    %534 = arith.addf %531, %533 : vector<8x128xf32>
    %535 = math.tanh %534 : vector<8x128xf32>
    %cst_181 = arith.constant 1.000000e+00 : f32
    %536 = vector.broadcast %cst_181 : f32 to vector<8x128xf32>
    %537 = arith.subf %536, %530 : vector<8x128xf32>
    %538 = arith.mulf %537, %535 : vector<8x128xf32>
    %539 = arith.mulf %530, %505 : vector<8x128xf32>
    %540 = arith.addf %538, %539 : vector<8x128xf32>
    %541 = arith.index_cast %c6_i32_175 : i32 to index
    %c0_182 = arith.constant 0 : index
    %c0_183 = arith.constant 0 : index
    %542 = vector.load %arg14[%541, %c0_182, %c0_183] : memref<8x8x256xf32, #tpu.memory_space<vmem>>, vector<1x8x128xf32>
    %543 = vector.shape_cast %542 : vector<1x8x128xf32> to vector<8x128xf32>
    %544 = vector.shape_cast %540 : vector<8x128xf32> to vector<1x8x128xf32>
    tpu.vector_store %arg14[%541, %c0_182, %c0_183], %544 {strides = array<i32>} : memref<8x8x256xf32, #tpu.memory_space<vmem>>, vector<1x8x128xf32>,
    %545 = arith.index_cast %514 : i32 to index
    %c0_184 = arith.constant 0 : index
    %c128_185 = arith.constant 128 : index
    %546 = vector.load %arg14[%545, %c0_184, %c128_185] : memref<8x8x256xf32, #tpu.memory_space<vmem>>, vector<1x8x128xf32>
    %547 = vector.shape_cast %546 : vector<1x8x128xf32> to vector<8x128xf32>
    %548 = vector.shape_cast %540 : vector<8x128xf32> to vector<1x8x128xf32>
    tpu.vector_store %arg14[%545, %c0_184, %c128_185], %548 {strides = array<i32>} : memref<8x8x256xf32, #tpu.memory_space<vmem>>, vector<1x8x128xf32>,
    %c7_i32_186 = arith.constant 7 : i32
    %c7_i32_187 = arith.constant 7 : i32
    %549 = arith.subi %c7_i32_187, %c7_i32_186 : i32
    %550 = arith.index_cast %c7_i32_186 : i32 to index
    %c0_188 = arith.constant 0 : index
    %c0_189 = arith.constant 0 : index
    %551 = vector.load %arg12[%550, %c0_188, %c0_189] : memref<8x8x384xf32, #tpu.memory_space<vmem>>, vector<1x8x384xf32>
    %552 = vector.shape_cast %551 : vector<1x8x384xf32> to vector<8x384xf32>
    %cst_190 = arith.constant dense<0.000000e+00> : vector<8x384xf32>
    %553 = tpu.matmul %540, %301, %cst_190 {dimension_numbers = #tpu.dot_dimension_numbers<[1], [0], [0], [1], [0, 0, 1, 1], [], []>} : vector<8x128xf32>, vector<128x384xf32>, vector<8x384xf32> -> vector<8x384xf32>
    %554 = vector.broadcast %302 : vector<1x384xf32> to vector<8x384xf32>
    %555 = arith.addf %553, %554 : vector<8x384xf32>
    %556 = vector.extract_strided_slice %552 {offsets = [0, 0], sizes = [8, 256], strides = [1, 1]} : vector<8x384xf32> to vector<8x256xf32>
    %557 = vector.extract_strided_slice %555 {offsets = [0, 0], sizes = [8, 256], strides = [1, 1]} : vector<8x384xf32> to vector<8x256xf32>
    %558 = arith.addf %556, %557 : vector<8x256xf32>
    %559 = arith.negf %558 : vector<8x256xf32>
    %560 = math.exp %559 : vector<8x256xf32>
    %cst_191 = arith.constant 1.000000e+00 : f32
    %561 = vector.broadcast %cst_191 : f32 to vector<8x256xf32>
    %562 = arith.addf %561, %560 : vector<8x256xf32>
    %563 = arith.divf %561, %562 : vector<8x256xf32>
    %564 = vector.extract_strided_slice %563 {offsets = [0, 0], sizes = [8, 128], strides = [1, 1]} : vector<8x256xf32> to vector<8x128xf32>
    %565 = vector.extract_strided_slice %563 {offsets = [0, 128], sizes = [8, 128], strides = [1, 1]} : vector<8x256xf32> to vector<8x128xf32>
    %566 = vector.extract_strided_slice %552 {offsets = [0, 256], sizes = [8, 128], strides = [1, 1]} : vector<8x384xf32> to vector<8x128xf32>
    %567 = vector.extract_strided_slice %555 {offsets = [0, 256], sizes = [8, 128], strides = [1, 1]} : vector<8x384xf32> to vector<8x128xf32>
    %568 = arith.mulf %564, %567 : vector<8x128xf32>
    %569 = arith.addf %566, %568 : vector<8x128xf32>
    %570 = math.tanh %569 : vector<8x128xf32>
    %cst_192 = arith.constant 1.000000e+00 : f32
    %571 = vector.broadcast %cst_192 : f32 to vector<8x128xf32>
    %572 = arith.subf %571, %565 : vector<8x128xf32>
    %573 = arith.mulf %572, %570 : vector<8x128xf32>
    %574 = arith.mulf %565, %540 : vector<8x128xf32>
    %575 = arith.addf %573, %574 : vector<8x128xf32>
    %576 = arith.index_cast %c7_i32_186 : i32 to index
    %c0_193 = arith.constant 0 : index
    %c0_194 = arith.constant 0 : index
    %577 = vector.load %arg14[%576, %c0_193, %c0_194] : memref<8x8x256xf32, #tpu.memory_space<vmem>>, vector<1x8x128xf32>
    %578 = vector.shape_cast %577 : vector<1x8x128xf32> to vector<8x128xf32>
    %579 = vector.shape_cast %575 : vector<8x128xf32> to vector<1x8x128xf32>
    tpu.vector_store %arg14[%576, %c0_193, %c0_194], %579 {strides = array<i32>} : memref<8x8x256xf32, #tpu.memory_space<vmem>>, vector<1x8x128xf32>,
    %580 = arith.index_cast %549 : i32 to index
    %c0_195 = arith.constant 0 : index
    %c128_196 = arith.constant 128 : index
    %581 = vector.load %arg14[%580, %c0_195, %c128_196] : memref<8x8x256xf32, #tpu.memory_space<vmem>>, vector<1x8x128xf32>
    %582 = vector.shape_cast %581 : vector<1x8x128xf32> to vector<8x128xf32>
    %583 = vector.shape_cast %575 : vector<8x128xf32> to vector<1x8x128xf32>
    tpu.vector_store %arg14[%580, %c0_195, %c128_196], %583 {strides = array<i32>} : memref<8x8x256xf32, #tpu.memory_space<vmem>>, vector<1x8x128xf32>,
    %c8_i32_197 = arith.constant 8 : i32
    %c0_198 = arith.constant 0 : index
    %c0_199 = arith.constant 0 : index
    %c0_200 = arith.constant 0 : index
    %584 = vector.load %arg14[%c0_198, %c0_199, %c0_200] : memref<8x8x256xf32, #tpu.memory_space<vmem>>, vector<8x8x256xf32>
    %585 = vector.extract_strided_slice %584 {offsets = [0, 3, 0], sizes = [8, 1, 256], strides = [1, 1, 1]} : vector<8x8x256xf32> to vector<8x1x256xf32>
    %586 = vector.shape_cast %585 : vector<8x1x256xf32> to vector<8x256xf32>
    %c0_201 = arith.constant 0 : index
    %c0_202 = arith.constant 0 : index
    %587 = vector.load %arg9[%c0_201, %c0_202] : memref<256x8xf32, #tpu.memory_space<vmem>>, vector<256x8xf32>
    %cst_203 = arith.constant dense<0.000000e+00> : vector<8x8xf32>
    %588 = tpu.matmul %586, %587, %cst_203 {dimension_numbers = #tpu.dot_dimension_numbers<[1], [0], [0], [1], [0, 0, 1, 1], [], []>} : vector<8x256xf32>, vector<256x8xf32>, vector<8x8xf32> -> vector<8x8xf32>
    %c0_204 = arith.constant 0 : index
    %c0_205 = arith.constant 0 : index
    %589 = vector.load %arg10[%c0_204, %c0_205] : memref<1x8xf32, #tpu.memory_space<vmem>>, vector<1x8xf32>
    %590 = vector.broadcast %589 : vector<1x8xf32> to vector<8x8xf32>
    %591 = arith.addf %588, %590 : vector<8x8xf32>
    %c0_206 = arith.constant 0 : index
    %c0_207 = arith.constant 0 : index
    %592 = vector.load %arg11[%c0_206, %c0_207] : memref<8x8xf32, #tpu.memory_space<vmem>>, vector<8x8xf32>
    tpu.vector_store %arg11[%c0_206, %c0_207], %591 {strides = array<i32>} : memref<8x8xf32, #tpu.memory_space<vmem>>, vector<8x8xf32>,
    return
  }
}

</mosaic_0001>

<bundles_post_ra>
// kernel: bigru_forward.1
= control target key start
LH: loop header
LB: loop body
LE: loop exit
PB: predicated region body
PF: predicated region fallthrough
CT: control target
= control target key end

     0   :  { %16 = vsyncpa [#allocation6], 0  ;;  %s7626_s0 = inlined_call_operand.vmem [shape: f32[8,8,32], index: 0, kind: input, shape index: {}]   ;;  %s7627_s1 = inlined_call_operand.vmem [shape: f32[32,384], index: 1, kind: input, shape index: {}]   ;;  %s7628_s2 = inlined_call_operand.vmem [shape: f32[1,384], index: 2, kind: input, shape index: {}]   ;;  %s7629_s3 = inlined_call_operand.hbm [shape: f32[128,384], index: 3, kind: input, shape index: {}]   ;;  %s7630_s4 = inlined_call_operand.vmem [shape: f32[1,384], index: 4, kind: input, shape index: {}]   ;;  %s7631_s5 = inlined_call_operand.vmem [shape: f32[256,384], index: 5, kind: input, shape index: {}]   ;;  %s7632_s6 = inlined_call_operand.vmem [shape: f32[1,384], index: 6, kind: input, shape index: {}]   ;;  %s7633_s7 = inlined_call_operand.hbm [shape: f32[128,384], index: 7, kind: input, shape index: {}]   ;;  %s7634_s8 = inlined_call_operand.vmem [shape: f32[1,384], index: 8, kind: input, shape index: {}]   ;;  %s7635_s9 = inlined_call_operand.vmem [shape: f32[256,8], index: 9, kind: input, shape index: {}]   ;;  %s7636_s10 = inlined_call_operand.vmem [shape: f32[1,8], index: 10, kind: input, shape index: {}]   ;;  %s7637_s11 = inlined_call_operand.hbm [shape: f32[8,8], index: 11, kind: output, shape index: {}]  }
   0x1   :  { %17 = vsyncpa [#allocation9], 0 }
   0x2   :  { %18 = vsyncpa [#allocation7], 0  ;;  %s6141_s17 = smov [#allocation5]   ;;  %s6069_s21 = scalar_lea.hbm %s7629_s3, 6144 }
   0x3   :  { %s30_s18 = sshll.u32 %s6141_s17, 4  ;;  %p6070_p0 = scmp.ne.s32.totalorder %s7629_s3, %s6069_s21  ;;  %s31_s18 = int_to_ptr.vmem [resolvable:$true] %s30_s18 }
   0x4   :  { %p6073_p1 = scmp.lt.u32.totalorder %s6069_s21, %s7629_s3 }
   0x6   :  { %p6075_p2 = pnand %p6073_p1, %p6070_p0 }
   0x8   :  { %6078 = shalt.err (!%p6075_p2)
}
   0x9   :  { %s6079_s26 = scalar_lea.vmem %s31_s18, 6144  ;;  %p6084_p4 = scmp.lt.s32.totalorder %s31_s18, %s31_s18 }
   0xa   :  { %p6080_p3 = scmp.ne.s32.totalorder %s31_s18, %s6079_s26  ;;  %p6085_p5 = scmp.lt.s32.totalorder %s6079_s26, %s6079_s26 }
   0xc   :  { %p6086_p6 = por %p6085_p5, %p6084_p4 }
   0xe   :  { %p6087_p7 = pnand %p6086_p6, %p6080_p3 }
  0x10   :  { %6090 = shalt.err (!%p6087_p7)
}
  0x11   :  { %s6142_s27 = smov 384   ;;  %s6143_s28 = smov 24  }
  0x12   :  { %36 = dma.hbm_to_vmem [thread:$0]  %s7629_s3, 6144, %s31_s18, [#allocation6], %s6142_s27, %s6142_s27, %s6143_s28  }
  0x13   :  { %s6144_s12 = smov [#allocation8]   ;;  %s6091_s16 = scalar_lea.hbm %s7633_s7, 6144 }
  0x14   :  { %s48_s13 = sshll.u32 %s6144_s12, 4  ;;  %p6092_p8 = scmp.ne.s32.totalorder %s7633_s7, %s6091_s16  ;;  %s49_s13 = int_to_ptr.vmem [resolvable:$true] %s48_s13 }
  0x15   :  { %p6095_p9 = scmp.lt.u32.totalorder %s6091_s16, %s7633_s7 }
  0x17   :  { %p6097_p10 = pnand %p6095_p9, %p6092_p8 }
  0x19   :  { %6100 = shalt.err (!%p6097_p10)
}
  0x1a   :  { %s6101_s22 = scalar_lea.vmem %s49_s13, 6144  ;;  %p6106_p12 = scmp.lt.s32.totalorder %s49_s13, %s49_s13 }
  0x1b   :  { %p6102_p11 = scmp.ne.s32.totalorder %s49_s13, %s6101_s22  ;;  %p6107_p13 = scmp.lt.s32.totalorder %s6101_s22, %s6101_s22 }
  0x1d   :  { %p6108_p0 = por %p6107_p13, %p6106_p12 }
  0x1f   :  { %p6109_p1 = pnand %p6108_p0, %p6102_p11 }
  0x21   :  { %6112 = shalt.err (!%p6109_p1)
}
  0x22   :  { %54 = dma.hbm_to_vmem [thread:$0]  %s7633_s7, 6144, %s49_s13, [#allocation9], %s6142_s27, %s6142_s27, %s6143_s28  }
  0x23   :  { %6135 = dma.done.wait [#allocation6], 6144  }
  0x24   :  { %6136 = vsyncadd [#allocation6], 4294961152 }
  0x25   :  { %6137 = dma.done.wait [#allocation9], 6144  }
  0x26   :  { %6138 = vsyncadd [#allocation9], 4294961152  ;;  %v6145_v0 = vmov 0.0   ;;  %v76_v1 = vld [vmem:[%s7627_s1 + $0x8] sm:$0xff]  ;;  %v79_v2 = vld [vmem:[%s7627_s1 + $0x20] sm:$0xff]  ;;  %vm104_vm0 = vcmask 261120  }
  0x27   :  { %193 = vmatprep.mubr.f32.mxu0 %v6145_v0  ;;  %v75_v3 = vld [vmem:[%s7627_s1] sm:$0xff]  ;;  %v4765_v4 = vpack.c.bf16 %v79_v2, %v76_v1  ;;  %v78_v5 = vld [vmem:[%s7627_s1 + $0x18] sm:$0xff]  ;;  %v85_v7 = vld [vmem:[%s7627_s1 + $0x50] sm:$0xff]  ;;  %v6146_v57 = vmov 0.0|0.0   ;;  %vm6147_vm1 = vmmov 0   ;;  %vm3638_vm2 = vcmask 1041409  }
  0x28   :  { %v82_v6 = vld [vmem:[%s7627_s1 + $0x38] sm:$0xff]  ;;  %v4767_v8 = vpack.c.bf16 %v78_v5, %v75_v3  ;;  %v81_v10 = vld [vmem:[%s7627_s1 + $0x30] sm:$0xff]  ;;  %v84_v11 = vld [vmem:[%s7627_s1 + $0x48] sm:$0xff]  ;;  %vm3641_vm3 = vcmask 1042434   ;;  %vm3643_vm4 = vcmask 1043459   ;;  %vm3646_vm5 = vcmask 1044484  }
  0x29   :  { %v4769_v9 = vpack.c.bf16 %v85_v7, %v82_v6  ;;  %v67_v12 = vld [vmem:[%s7626_s0] sm:$0xff]  ;;  %4766 = vmatprep.subr.bf16.mxu0 %v4765_v4  ;;  %v372_v13 = vld [vmem:[#allocation5 + $0x8] sm:$0xff]  ;;  %v4771_v15 = vpack.c.bf16 %v84_v11, %v81_v10  ;;  %v374_v18 = vld [vmem:[#allocation5 + $0x18] sm:$0xff]  ;;  %vm3649_vm6 = vcmask 1045509   ;;  %vm3652_vm7 = vcmask 1046534   ;;  %s6148_s23 = smov [#allocation10]  }
  0x2a   :  { %v375_v14 = vld [vmem:[#allocation5 + $0x20] sm:$0xff]  ;;  %4193 = vmatprep.mubr.msk.f32.mxu1 %vm104_vm0, %v67_v12  ;;  %4768 = vmatpush1.bf16.msra.mxu0 %v4767_v8  ;;  %v378_v19 = vld [vmem:[#allocation5 + $0x38] sm:$0xff]  ;;  %v381_v20 = vld [vmem:[#allocation5 + $0x50] sm:$0xff]  ;;  %vm3655_vm8 = vcmask 1047559   ;;  %s3751_s24 = sshll.u32 %s6148_s23, 4  ;;  %vm3743_vm9 = vcmask 64512   ;;  %s3752_s24 = int_to_ptr.vmem [resolvable:$true] %s3751_s24 }
  0x2b   :  { %4770 = vmatprep.subr.bf16.mxu0 %v4769_v9  ;;  %v6262_v16 = vpack.c.bf16 %v375_v14, %v372_v13  ;;  %v371_v17 = vld [vmem:[#allocation5] sm:$0xff]  ;;  %v6267_v22 = vpack.c.bf16 %v381_v20, %v378_v19  ;;  %v377_v23 = vld [vmem:[#allocation5 + $0x30] sm:$0xff]  ;;  %v380_v24 = vld [vmem:[#allocation5 + $0x48] sm:$0xff]  ;;  %s6113_s25 = scalar_lea.vmem %s3752_s24, 128  ;;  %p6118_p3 = scmp.lt.s32.totalorder %s3752_s24, %s3752_s24 }
  0x2c   :  { %v6264_v21 = vpack.c.bf16 %v374_v18, %v371_v17  ;;  %v384_v25 = vld [vmem:[#allocation5 + $0x68] sm:$0xff]  ;;  %v387_v26 = vld [vmem:[#allocation5 + $0x80] sm:$0xff]  ;;  %v77_v27 = vld [vmem:[%s7627_s1 + $0x10] sm:$0xff]  ;;  %v6281_v30 = vpack.c.bf16 %v380_v24, %v377_v23  ;;  %p6114_p2 = scmp.ne.s32.totalorder %s3752_s24, %s6113_s25  ;;  %p6119_p4 = scmp.lt.s32.totalorder %s6113_s25, %s6113_s25 }
  0x2d   :  { %v80_v28 = vld [vmem:[%s7627_s1 + $0x28] sm:$0xff]  ;;  %v383_v31 = vld [vmem:[#allocation5 + $0x60] sm:$0xff]  ;;  %v6284_v33 = vpack.c.bf16 %v387_v26, %v384_v25  ;;  %v386_v34 = vld [vmem:[#allocation5 + $0x78] sm:$0xff] }
  0x2e   :  { %4772 = vmatpush1.bf16.msra.mxu0 %v4771_v15  ;;  %v68_v29 = vld [vmem:[%s7626_s0 + $0x8] sm:$0xff]  ;;  %v4773_v32 = vpack.c.bf16 %v80_v28, %v77_v27  ;;  %v83_v35 = vld [vmem:[%s7627_s1 + $0x40] sm:$0xff]  ;;  %v86_v36 = vld [vmem:[%s7627_s1 + $0x58] sm:$0xff]  ;;  %v6298_v41 = vpack.c.bf16 %v386_v34, %v383_v31  ;;  %p6120_p5 = por %p6119_p4, %p6118_p3 }
  0x2f   :  { %4782 = vmatprep.subr.bf16.mxu0 %v6262_v16  ;;  %v390_v37 = vld [vmem:[#allocation5 + $0x98] sm:$0xff]  ;;  %v393_v38 = vld [vmem:[#allocation5 + $0xb0] sm:$0xff]  ;;  %v4777_v39 = vpack.c.bf16 %v86_v36, %v83_v35  ;;  %v376_v43 = vld [vmem:[#allocation5 + $0x28] sm:$0xff] }
  0x30   :  { %4774 = vmatprep.subr.bf16.mxu1 %v4773_v32  ;;  %v69_v40 = vld [vmem:[%s7626_s0 + $0x10] sm:$0xff]  ;;  %v6301_v44 = vpack.c.bf16 %v393_v38, %v390_v37  ;;  %v392_v46 = vld [vmem:[#allocation5 + $0xa8] sm:$0xff]  ;;  %v399_v48 = vld [vmem:[#allocation5 + $0xe0] sm:$0xff]  ;;  %p6121_p6 = pnand %p6120_p5, %p6114_p2 }
  0x31   :  { %3761 = vmatmul.mubr.msk.f32.vlgmr.msra.gmra.mrb[0].mxu0 %vm104_vm0, %v67_v12  ;;  %4776 = vmatpush3.bf16.msra.mxu1 %v4773_v32  ;;  %v373_v42 = vld [vmem:[#allocation5 + $0x10] sm:$0xff]  ;;  %v396_v47 = vld [vmem:[#allocation5 + $0xc8] sm:$0xff]  ;;  %v70_v50 = vld [vmem:[%s7626_s0 + $0x18] sm:$0xff] }
  0x32   :  { %4784 = vmatpush1.bf16.msra.mxu0 %v6264_v21  ;;  %199 = vmatprep.mubr.f32.mxu0 %v6145_v0  ;;  %v389_v45 = vld [vmem:[#allocation5 + $0x90] sm:$0xff]  ;;  %v6304_v49 = vpack.c.bf16 %v376_v43, %v373_v42  ;;  %v379_v52 = vld [vmem:[#allocation5 + $0x40] sm:$0xff]  ;;  %v382_v53 = vld [vmem:[#allocation5 + $0x58] sm:$0xff]  ;;  %v6314_v54 = vpack.c.bf16 %v399_v48, %v396_v47  ;;  %v89_v43 = vlaneseq }
  0x33   :  { %4786 = vmatprep.subr.bf16.mxu0 %v6267_v22  ;;  %4778 = vmatprep.subr.bf16.mxu1 %v4777_v39  ;;  %v6311_v51 = vpack.c.bf16 %v392_v46, %v389_v45  ;;  %v395_v55 = vld [vmem:[#allocation5 + $0xc0] sm:$0xff]  ;;  %v398_v56 = vld [vmem:[#allocation5 + $0xd8] sm:$0xff]  ;;  %v405_v59 = vld [vmem:[#allocation5 + $0x110] sm:$0xff]  ;;  %v6320_v60 = vpack.c.bf16 %v382_v53, %v379_v52 }
  0x34   :  { %v402_v58 = vld [vmem:[#allocation5 + $0xf8] sm:$0xff]  ;;  %v71_v61 = vld [vmem:[%s7626_s0 + $0x20] sm:$0xff]  ;;  %v6327_v62 = vpack.c.bf16 %v398_v56, %v395_v55  ;;  %v385_v63 = vld [vmem:[#allocation5 + $0x70] sm:$0xff]  ;;  %v90_v45 = vshrl.u32 %v89_v43, 7 }
  0x35   :  { %3762 = vmatmul.mubr.msk.f32.gmra.mrb[2].mxu0 %vm104_vm0, %v68_v29  ;;  %4780 = vmatpush3.bf16.msra.mxu1 %v4777_v39  ;;  %v388_v1 = vld [vmem:[#allocation5 + $0x88] sm:$0xff]  ;;  %v6330_v2 = vpack.c.bf16 %v405_v59, %v402_v58  ;;  %v401_v3 = vld [vmem:[#allocation5 + $0xf0] sm:$0xff]  ;;  %v411_v6 = vld [vmem:[#allocation5 + $0x140] sm:$0xff] }
  0x36   :  { %4788 = vmatpush1.bf16.msra.mxu0 %v6281_v30  ;;  %205 = vmatprep.mubr.f32.mxu0 %v6145_v0  ;;  %v404_v4 = vld [vmem:[#allocation5 + $0x108] sm:$0xff]  ;;  %v6336_v7 = vpack.c.bf16 %v388_v1, %v385_v63  ;;  %v391_v10 = vld [vmem:[#allocation5 + $0xa0] sm:$0xff]  ;;  %v394_v11 = vld [vmem:[#allocation5 + $0xb8] sm:$0xff]  ;;  %v6439_v46 = vsub.s32 2, %v90_v45  ;;  %v6449_v59 = vsub.s32 0, %v90_v45  ;;  %v6456_v1 = vsub.s32 1, %v90_v45 }
  0x37   :  { %4790 = vmatprep.subr.bf16.mxu0 %v6284_v33  ;;  %4813 = vmatprep.subr.bf16.mxu1 %v6146_v57  ;;  %v408_v5 = vld [vmem:[#allocation5 + $0x128] sm:$0xff]  ;;  %v6343_v9 = vpack.c.bf16 %v404_v4, %v401_v3  ;;  %v407_v13 = vld [vmem:[#allocation5 + $0x120] sm:$0xff]  ;;  %v410_v14 = vld [vmem:[#allocation5 + $0x138] sm:$0xff]  ;;  %v6352_v18 = vpack.c.bf16 %v394_v11, %v391_v10 }
  0x38   :  { %4194 = vmatmul.mubr.msk.f32.vlgmr.msra.gmra.mrb[0].mxu1 %vm104_vm0, %v68_v29  ;;  %v72_v8 = vld [vmem:[%s7626_s0 + $0x28] sm:$0xff]  ;;  %v6346_v12 = vpack.c.bf16 %v411_v6, %v408_v5  ;;  %v414_v15 = vld [vmem:[#allocation5 + $0x158] sm:$0xff]  ;;  %v417_v17 = vld [vmem:[#allocation5 + $0x170] sm:$0xff]  ;;  %v6359_v20 = vpack.c.bf16 %v410_v14, %v407_v13 }
  0x39   :  { %3763 = vmatmul.mubr.msk.f32.gmra.mrb[4].mxu0 %vm104_vm0, %v69_v40  ;;  %4815 = vmatpush3.bf16.msra.mxu1 %v6304_v49  ;;  %v73_v19 = vld [vmem:[%s7626_s0 + $0x30] sm:$0xff]  ;;  %v400_v24 = vld [vmem:[#allocation5 + $0xe8] sm:$0xff]  ;;  %v6362_v25 = vpack.c.bf16 %v417_v17, %v414_v15  ;;  %v74_v29 = vld [vmem:[%s7626_s0 + $0x38] sm:$0xff] }
  0x3a   :  { %4792 = vmatpush1.bf16.msra.mxu0 %v6298_v41  ;;  %211 = vmatprep.mubr.f32.mxu0 %v6145_v0  ;;  %v397_v23 = vld [vmem:[#allocation5 + $0xd0] sm:$0xff]  ;;  %v416_v27 = vld [vmem:[#allocation5 + $0x168] sm:$0xff]  ;;  %v403_v32 = vld [vmem:[#allocation5 + $0x100] sm:$0xff] }
  0x3b   :  { %4794 = vmatprep.subr.bf16.mxu0 %v6301_v44  ;;  %4816 = vmatprep.subr.bf16.mxu1 %v6146_v57  ;;  %v413_v26 = vld [vmem:[#allocation5 + $0x150] sm:$0xff]  ;;  %v6368_v28 = vpack.c.bf16 %v400_v24, %v397_v23  ;;  %v406_v34 = vld [vmem:[#allocation5 + $0x118] sm:$0xff]  ;;  %v412_v37 = vld [vmem:[#allocation5 + $0x148] sm:$0xff] }
  0x3c   :  { %4196 = vmatprep.mubr.msk.f32.mxu1 %vm104_vm0, %v69_v40  ;;  %v6375_v31 = vpack.c.bf16 %v416_v27, %v413_v26  ;;  %v6382_v35 = vpack.c.bf16 %v406_v34, %v403_v32  ;;  %v409_v36 = vld [vmem:[#allocation5 + $0x130] sm:$0xff]  ;;  %v415_v39 = vld [vmem:[#allocation5 + $0x160] sm:$0xff]  ;;  %v418_v40 = vld [vmem:[#allocation5 + $0x178] sm:$0xff] }
  0x3d   :  { %3764 = vmatmul.mubr.msk.f32.gmra.mrb[6].mxu0 %vm104_vm0, %v70_v50  ;;  %4818 = vmatpush3.bf16.msra.mxu1 %v6320_v60  ;;  %v6392_v38 = vpack.c.bf16 %v412_v37, %v409_v36  ;;  %v6401_v42 = vpack.c.bf16 %v418_v40, %v415_v39  ;;  %v87_v47 = vld [vmem:[%s7628_s2] sm:$0x7] }
  0x3e   :  { %4796 = vmatpush1.bf16.msra.mxu0 %v6311_v51  ;;  %217 = vmatprep.mubr.f32.mxu0 %v6145_v0  ;;  %v100_v48 = vrot.slane %v87_v47, %v6439_v46  ;;  %v419_v63 = vld [vmem:[%s7630_s4] sm:$0x7]  ;;  %v92_v3 = vrot.slane %v87_v47, %v6449_v59  ;;  %v96_v6 = vrot.slane %v87_v47, %v6456_v1 }
  0x3f   :  { %4798 = vmatprep.subr.bf16.mxu0 %v6314_v54  ;;  %4819 = vmatprep.subr.bf16.mxu1 %v6146_v57  ;;  %v427_v4 = vrot.slane %v419_v63, %v6449_v59  ;;  %v6477_v45 = vrot.slane %v419_v63, %v6439_v46 }
  0x40   :  { %4197 = vmatmul.mubr.msk.f32.gmra.mrb[2].mxu1 %vm104_vm0, %v70_v50 }
  0x41   :  { %3765 = vmatmul.mubr.msk.f32.gmra.mrb[8].mxu0 %vm104_vm0, %v71_v61  ;;  %4821 = vmatpush3.bf16.msra.mxu1 %v6336_v7  ;;  %v6464_v13 = vadd.f32 %v427_v4, %v92_v3 }
  0x42   :  { %4800 = vmatpush1.bf16.msra.mxu0 %v6327_v62  ;;  %223 = vmatprep.mubr.f32.mxu0 %v6145_v0 }
  0x43   :  { %4802 = vmatprep.subr.bf16.mxu0 %v6330_v2  ;;  %4822 = vmatprep.subr.bf16.mxu1 %v6146_v57 }
  0x44   :  { %4199 = vmatprep.mubr.msk.f32.mxu1 %vm104_vm0, %v71_v61 }
  0x45   :  { %3766 = vmatmul.mubr.msk.f32.gmra.mrb[10].mxu0 %vm104_vm0, %v72_v8  ;;  %4824 = vmatpush3.bf16.msra.mxu1 %v6352_v18 }
  0x46   :  { %4804 = vmatpush1.bf16.msra.mxu0 %v6343_v9  ;;  %229 = vmatprep.mubr.f32.mxu0 %v6145_v0 }
  0x47   :  { %4806 = vmatprep.subr.bf16.mxu0 %v6346_v12  ;;  %4825 = vmatprep.subr.bf16.mxu1 %v6146_v57 }
  0x48   :  { %4200 = vmatmul.mubr.msk.f32.gmra.mrb[4].mxu1 %vm104_vm0, %v72_v8  ;;  %v431_v8 = vrot.slane %v419_v63, %v6456_v1 }
  0x49   :  { %3767 = vmatmul.mubr.msk.f32.gmra.mrb[12].mxu0 %vm104_vm0, %v73_v19  ;;  %4827 = vmatpush3.bf16.msra.mxu1 %v6368_v28 }
  0x4a   :  { %4808 = vmatpush1.bf16.msra.mxu0 %v6359_v20  ;;  %235 = vmatprep.mubr.f32.mxu0 %v6145_v0 }
  0x4b   :  { %4810 = vmatprep.subr.bf16.mxu0 %v6362_v25  ;;  %4828 = vmatprep.subr.bf16.mxu1 %v6146_v57 }
  0x4c   :  { %4202 = vmatprep.mubr.msk.f32.mxu1 %vm104_vm0, %v73_v19  ;;  %v6468_v19 = vadd.f32 %v431_v8, %v96_v6 }
  0x4d   :  { %3768 = vmatmul.mubr.msk.f32.gmra.mrb[14].mxu0 %vm104_vm0, %v74_v29  ;;  %4203 = vmatmul.mubr.msk.f32.gmra.mrb[6].mxu1 %vm104_vm0, %v74_v29 }
  0x4e   :  { %4812 = vmatpush1.bf16.msra.mxu0 %v6375_v31  ;;  %503 = vmatprep.mubr.f32.mxu0 %v6145_v0 }
  0x4f   :  { %4838 = vmatprep.subr.bf16.mxu0 %v6262_v16  ;;  %4830 = vmatpush3.bf16.msra.mxu1 %v6382_v35 }
  0x50   :  { %4831 = vmatprep.subr.bf16.mxu1 %v6146_v57  ;;  %4237 = vmatprep.mubr.msk.f32.mxu1 %vm6147_vm1, %v6145_v0 }
  0x51   :  { %504 = vmatmul.mubr.f32.vlgmr.msra.gmra.mrb[0].mxu0 %v6145_v0 }
  0x52   :  { %4840 = vmatpush1.bf16.msra.mxu0 %v6264_v21  ;;  %672 = vmatprep.mubr.f32.mxu0 %v6145_v0 }
  0x53   :  { %4842 = vmatprep.subr.bf16.mxu0 %v6267_v22  ;;  %4833 = vmatpush3.bf16.msra.mxu1 %v6392_v38 }
  0x54   :  { %4834 = vmatprep.subr.bf16.mxu1 %v6146_v57 }
  0x56   :  { %4844 = vmatpush1.bf16.msra.mxu0 %v6281_v30 }
  0x57   :  { %4846 = vmatprep.subr.bf16.mxu0 %v6284_v33  ;;  %4836 = vmatpush3.bf16.msra.mxu1 %v6401_v42 }
  0x58   :  { %4869 = vmatprep.subr.bf16.mxu1 %v6146_v57 }
  0x5a   :  { %4848 = vmatpush1.bf16.msra.mxu0 %v6298_v41  ;;  %4238 = vmatmul.mubr.f32.vlgmr.msra.gmra.mrb[8].mxu1 %v6145_v0 }
  0x5b   :  { %4850 = vmatprep.subr.bf16.mxu0 %v6301_v44  ;;  %4871 = vmatpush3.bf16.msra.mxu1 %v6304_v49 }
  0x5c   :  { %4272 = vmatprep.mubr.msk.f32.mxu1 %vm6147_vm1, %v6145_v0  ;;  %4872 = vmatprep.subr.bf16.mxu1 %v6146_v57 }
  0x5e   :  { %4852 = vmatpush1.bf16.msra.mxu0 %v6311_v51 }
  0x5f   :  { %4854 = vmatprep.subr.bf16.mxu0 %v6314_v54  ;;  %4874 = vmatpush3.bf16.msra.mxu1 %v6320_v60 }
  0x60   :  { %4875 = vmatprep.subr.bf16.mxu1 %v6146_v57 }
  0x62   :  { %4856 = vmatpush1.bf16.msra.mxu0 %v6327_v62 }
  0x63   :  { %4858 = vmatprep.subr.bf16.mxu0 %v6330_v2  ;;  %4877 = vmatpush3.bf16.msra.mxu1 %v6336_v7 }
  0x64   :  { %4878 = vmatprep.subr.bf16.mxu1 %v6146_v57 }
  0x66   :  { %4860 = vmatpush1.bf16.msra.mxu0 %v6343_v9 }
  0x67   :  { %4862 = vmatprep.subr.bf16.mxu0 %v6346_v12  ;;  %4880 = vmatpush3.bf16.msra.mxu1 %v6352_v18 }
  0x68   :  { %4881 = vmatprep.subr.bf16.mxu1 %v6146_v57 }
  0x6a   :  { %4864 = vmatpush1.bf16.msra.mxu0 %v6359_v20 }
  0x6b   :  { %4866 = vmatprep.subr.bf16.mxu0 %v6362_v25  ;;  %4883 = vmatpush3.bf16.msra.mxu1 %v6368_v28 }
  0x6c   :  { %4884 = vmatprep.subr.bf16.mxu1 %v6146_v57 }
  0x6e   :  { %4868 = vmatpush1.bf16.msra.mxu0 %v6375_v31 }
  0x6f   :  { %4894 = vmatprep.subr.bf16.mxu0 %v6262_v16  ;;  %4886 = vmatpush3.bf16.msra.mxu1 %v6382_v35 }
  0x70   :  { %4887 = vmatprep.subr.bf16.mxu1 %v6146_v57 }
  0x73   :  { %4889 = vmatpush3.bf16.msra.mxu1 %v6392_v38 }
  0x74   :  { %4890 = vmatprep.subr.bf16.mxu1 %v6146_v57 }
  0x77   :  { %4892 = vmatpush3.bf16.msra.mxu1 %v6401_v42 }
  0x78   :  { %4925 = vmatprep.subr.bf16.mxu1 %v6146_v57 }
 0x10b   :  { %v4195_v50 = vpop.f32.mrb[0].mxu1 }
 0x10c   :  { %v6445_v52 = vadd.f32 %v4195_v50, %v100_v48  ;;  %v308_v53 = vpop.f32.mrb[1].mxu1 }
 0x10d   :  { %v309_v3 = vadd.f32 %v308_v53, %v100_v48 }
 0x113   :  { %v4198_v55 = vpop.f32.mrb[2].mxu1 }
 0x114   :  { %v6447_v56 = vadd.f32 %v4198_v55, %v100_v48  ;;  %v318_v58 = vpop.f32.mrb[3].mxu1 }
 0x115   :  { %v6451_v61 = vadd.f32 %v318_v58, %v100_v48 }
 0x11b   :  { %v4201_v5 = vpop.f32.mrb[4].mxu1 }
 0x11c   :  { %v6462_v10 = vadd.f32 %v4201_v5, %v100_v48  ;;  %v328_v11 = vpop.f32.mrb[5].mxu1 }
 0x11d   :  { %v6466_v14 = vadd.f32 %v328_v11, %v100_v48 }
 0x120   :  { %v4204_v15 = vpop.f32.mrb[6].mxu1 }
 0x121   :  { %v6470_v23 = vadd.f32 %v4204_v15, %v100_v48  ;;  %v338_v24 = vpop.f32.mrb[7].mxu1 }
 0x122   :  { %v6473_v29 = vadd.f32 %v338_v24, %v100_v48 }
 0x124   :  { %v505_v17 = vpop.f32.mrb[0].mxu0 }
 0x125   :  { %v5806_v26 = vadd.f32 %v6464_v13, %v505_v17  ;;  %v507_v27 = vpop.f32.mrb[1].mxu0 }
 0x126   :  { %v5808_v34 = vadd.f32 %v6468_v19, %v507_v27 }
 0x127   :  { %v3777_v32 = vmul.f32 -1.442695, %v5806_v26 }
 0x128   :  { %v3778_v36 = vmul.f32 -1.442695, %v5808_v34 }
 0x129   :  { %5909 = vpow2.f32 %v3777_v32 }
 0x12a   :  { %5911 = vpow2.f32 %v3778_v36 }
 0x12d   :  { %v576_v37 = vpop.f32.mrb[8].mxu1 }
 0x12e   :  { %v4239_v39 = vpop.f32.mrb[9].mxu1  ;;  %v577_v55 = vadd.f32 %v576_v37, %v6477_v45 }
 0x133   :  { %v5910_v40 = vpop.eup %5909 }
 0x134   :  { %v588_v43 = vadd.f32 1.0, %v5910_v40  ;;  %v5912_v47 = vpop.eup %5911 }
 0x135   :  { %v589_v50 = vadd.f32 1.0, %v5912_v47 }
 0x136   :  { %5913 = vrcp.f32 %v588_v43 }
 0x137   :  { %5915 = vrcp.f32 %v589_v50 }
 0x140   :  { %v5914_v58 = vpop.eup %5913 }
 0x141   :  { %v594_v4 = vmul.f32 %v5914_v58, %v577_v55  ;;  %v5916_v6 = vpop.eup %5915 }
 0x142   :  { %v597_v8 = vsub.f32 1.0, %v5916_v6  ;;  %v599_v15 = vmul.f32 0.0, %v5916_v6 }
 0x143   :  { %v595_v5 = vadd.f32 %v594_v4, %v309_v3 }
 0x145   :  { %5917 = vtanh.f32 %v595_v5 }
 0x14f   :  { %v5918_v11 = vpop.eup %5917 }
 0x150   :  { %v598_v17 = vmul.f32 %v5918_v11, %v597_v8 }
 0x152   :  { %v6480_v24 = vadd.f32 %v599_v15, %v598_v17 }
 0x154   :  { %673 = vmatmul.mubr.f32.vlgmr.msra.gmra.mrb[2].mxu0 %v6480_v24  ;;  %4273 = vmatmul.mubr.f32.vlgmr.msra.gmra.mrb[10].mxu1 %v6480_v24 }
 0x155   :  { %4896 = vmatpush1.bf16.msra.mxu0 %v6264_v21  ;;  %4927 = vmatpush3.bf16.msra.mxu1 %v6304_v49 }
 0x156   :  { %4898 = vmatprep.subr.bf16.mxu0 %v6267_v22  ;;  %4928 = vmatprep.subr.bf16.mxu1 %v6146_v57 }
 0x157   :  { %842 = vmatprep.mubr.f32.mxu0 %v6145_v0  ;;  %4307 = vmatprep.mubr.msk.f32.mxu1 %vm6147_vm1, %v6145_v0 }
 0x159   :  { %4900 = vmatpush1.bf16.msra.mxu0 %v6281_v30  ;;  %4930 = vmatpush3.bf16.msra.mxu1 %v6320_v60 }
 0x15a   :  { %4902 = vmatprep.subr.bf16.mxu0 %v6284_v33  ;;  %4931 = vmatprep.subr.bf16.mxu1 %v6146_v57 }
 0x15d   :  { %4904 = vmatpush1.bf16.msra.mxu0 %v6298_v41  ;;  %4933 = vmatpush3.bf16.msra.mxu1 %v6336_v7 }
 0x15e   :  { %4906 = vmatprep.subr.bf16.mxu0 %v6301_v44  ;;  %4934 = vmatprep.subr.bf16.mxu1 %v6146_v57 }
 0x161   :  { %4908 = vmatpush1.bf16.msra.mxu0 %v6311_v51  ;;  %4936 = vmatpush3.bf16.msra.mxu1 %v6352_v18 }
 0x162   :  { %4910 = vmatprep.subr.bf16.mxu0 %v6314_v54  ;;  %4937 = vmatprep.subr.bf16.mxu1 %v6146_v57 }
 0x165   :  { %4912 = vmatpush1.bf16.msra.mxu0 %v6327_v62  ;;  %4939 = vmatpush3.bf16.msra.mxu1 %v6368_v28 }
 0x166   :  { %4914 = vmatprep.subr.bf16.mxu0 %v6330_v2  ;;  %4940 = vmatprep.subr.bf16.mxu1 %v6146_v57 }
 0x169   :  { %4916 = vmatpush1.bf16.msra.mxu0 %v6343_v9  ;;  %4942 = vmatpush3.bf16.msra.mxu1 %v6382_v35 }
 0x16a   :  { %4918 = vmatprep.subr.bf16.mxu0 %v6346_v12  ;;  %4943 = vmatprep.subr.bf16.mxu1 %v6146_v57 }
 0x16d   :  { %4920 = vmatpush1.bf16.msra.mxu0 %v6359_v20  ;;  %4945 = vmatpush3.bf16.msra.mxu1 %v6392_v38 }
 0x16e   :  { %4922 = vmatprep.subr.bf16.mxu0 %v6362_v25  ;;  %4946 = vmatprep.subr.bf16.mxu1 %v6146_v57 }
 0x171   :  { %4924 = vmatpush1.bf16.msra.mxu0 %v6375_v31  ;;  %4948 = vmatpush3.bf16.msra.mxu1 %v6401_v42 }
 0x172   :  { %4950 = vmatprep.subr.bf16.mxu0 %v6262_v16  ;;  %4981 = vmatprep.subr.bf16.mxu1 %v6146_v57 }
 0x227   :  { %v674_v48 = vpop.f32.mrb[2].mxu0  ;;  %v745_v53 = vpop.f32.mrb[10].mxu1 }
 0x228   :  { %v5810_v63 = vadd.f32 %v6464_v13, %v674_v48  ;;  %v676_v26 = vpop.f32.mrb[3].mxu0  ;;  %v4274_v27 = vpop.f32.mrb[11].mxu1  ;;  %v746_v47 = vadd.f32 %v745_v53, %v6477_v45 }
 0x229   :  { %v5812_v34 = vadd.f32 %v6468_v19, %v676_v26 }
 0x22a   :  { %v3779_v32 = vmul.f32 -1.442695, %v5810_v63 }
 0x22b   :  { %v3780_v36 = vmul.f32 -1.442695, %v5812_v34 }
 0x22c   :  { %5919 = vpow2.f32 %v3779_v32 }
 0x22d   :  { %5921 = vpow2.f32 %v3780_v36 }
 0x236   :  { %v5920_v37 = vpop.eup %5919 }
 0x237   :  { %v757_v39 = vadd.f32 1.0, %v5920_v37  ;;  %v5922_v40 = vpop.eup %5921 }
 0x238   :  { %v758_v43 = vadd.f32 1.0, %v5922_v40 }
 0x239   :  { %5923 = vrcp.f32 %v757_v39 }
 0x23a   :  { %5925 = vrcp.f32 %v758_v43 }
 0x243   :  { %v5924_v50 = vpop.eup %5923 }
 0x244   :  { %v763_v55 = vmul.f32 %v5924_v50, %v746_v47  ;;  %v5926_v3 = vpop.eup %5925 }
 0x245   :  { %v766_v4 = vsub.f32 1.0, %v5926_v3  ;;  %v768_v8 = vmul.f32 %v5926_v3, %v6480_v24 }
 0x246   :  { %v764_v58 = vadd.f32 %v763_v55, %v6445_v52 }
 0x248   :  { %5927 = vtanh.f32 %v764_v58 }
 0x252   :  { %v5928_v5 = vpop.eup %5927 }
 0x253   :  { %v767_v6 = vmul.f32 %v5928_v5, %v766_v4 }
 0x255   :  { %v6524_v11 = vadd.f32 %v768_v8, %v767_v6 }
 0x257   :  { %843 = vmatmul.mubr.f32.vlgmr.msra.gmra.mrb[4].mxu0 %v6524_v11  ;;  %4308 = vmatmul.mubr.f32.vlgmr.msra.gmra.mrb[12].mxu1 %v6524_v11 }
 0x258   :  { %4952 = vmatpush1.bf16.msra.mxu0 %v6264_v21  ;;  %4983 = vmatpush3.bf16.msra.mxu1 %v6304_v49 }
 0x259   :  { %4954 = vmatprep.subr.bf16.mxu0 %v6267_v22  ;;  %4984 = vmatprep.subr.bf16.mxu1 %v6146_v57 }
 0x25a   :  { %1012 = vmatprep.mubr.f32.mxu0 %v6145_v0  ;;  %4342 = vmatprep.mubr.msk.f32.mxu1 %vm6147_vm1, %v6145_v0 }
 0x25c   :  { %4956 = vmatpush1.bf16.msra.mxu0 %v6281_v30  ;;  %4986 = vmatpush3.bf16.msra.mxu1 %v6320_v60 }
 0x25d   :  { %4958 = vmatprep.subr.bf16.mxu0 %v6284_v33  ;;  %4987 = vmatprep.subr.bf16.mxu1 %v6146_v57 }
 0x260   :  { %4960 = vmatpush1.bf16.msra.mxu0 %v6298_v41  ;;  %4989 = vmatpush3.bf16.msra.mxu1 %v6336_v7 }
 0x261   :  { %4962 = vmatprep.subr.bf16.mxu0 %v6301_v44  ;;  %4990 = vmatprep.subr.bf16.mxu1 %v6146_v57 }
 0x264   :  { %4964 = vmatpush1.bf16.msra.mxu0 %v6311_v51  ;;  %4992 = vmatpush3.bf16.msra.mxu1 %v6352_v18 }
 0x265   :  { %4966 = vmatprep.subr.bf16.mxu0 %v6314_v54  ;;  %4993 = vmatprep.subr.bf16.mxu1 %v6146_v57 }
 0x268   :  { %4968 = vmatpush1.bf16.msra.mxu0 %v6327_v62  ;;  %4995 = vmatpush3.bf16.msra.mxu1 %v6368_v28 }
 0x269   :  { %4970 = vmatprep.subr.bf16.mxu0 %v6330_v2  ;;  %4996 = vmatprep.subr.bf16.mxu1 %v6146_v57 }
 0x26c   :  { %4972 = vmatpush1.bf16.msra.mxu0 %v6343_v9  ;;  %4998 = vmatpush3.bf16.msra.mxu1 %v6382_v35 }
 0x26d   :  { %4974 = vmatprep.subr.bf16.mxu0 %v6346_v12  ;;  %4999 = vmatprep.subr.bf16.mxu1 %v6146_v57 }
 0x270   :  { %4976 = vmatpush1.bf16.msra.mxu0 %v6359_v20  ;;  %5001 = vmatpush3.bf16.msra.mxu1 %v6392_v38 }
 0x271   :  { %4978 = vmatprep.subr.bf16.mxu0 %v6362_v25  ;;  %5002 = vmatprep.subr.bf16.mxu1 %v6146_v57 }
 0x274   :  { %4980 = vmatpush1.bf16.msra.mxu0 %v6375_v31  ;;  %5004 = vmatpush3.bf16.msra.mxu1 %v6401_v42 }
 0x275   :  { %5006 = vmatprep.subr.bf16.mxu0 %v6262_v16  ;;  %5037 = vmatprep.subr.bf16.mxu1 %v6146_v57 }
 0x32a   :  { %v844_v52 = vpop.f32.mrb[4].mxu0  ;;  %v915_v15 = vpop.f32.mrb[12].mxu1 }
 0x32b   :  { %v5814_v17 = vadd.f32 %v6464_v13, %v844_v52  ;;  %v846_v48 = vpop.f32.mrb[5].mxu0  ;;  %v4309_v53 = vpop.f32.mrb[13].mxu1  ;;  %v916_v39 = vadd.f32 %v915_v15, %v6477_v45 }
 0x32c   :  { %v5816_v26 = vadd.f32 %v6468_v19, %v846_v48 }
 0x32d   :  { %v3781_v63 = vmul.f32 -1.442695, %v5814_v17 }
 0x32e   :  { %v3782_v27 = vmul.f32 -1.442695, %v5816_v26 }
 0x32f   :  { %5929 = vpow2.f32 %v3781_v63 }
 0x330   :  { %5931 = vpow2.f32 %v3782_v27 }
 0x339   :  { %v5930_v32 = vpop.eup %5929 }
 0x33a   :  { %v927_v34 = vadd.f32 1.0, %v5930_v32  ;;  %v5932_v36 = vpop.eup %5931 }
 0x33b   :  { %v928_v37 = vadd.f32 1.0, %v5932_v36 }
 0x33c   :  { %5933 = vrcp.f32 %v927_v34 }
 0x33d   :  { %5935 = vrcp.f32 %v928_v37 }
 0x346   :  { %v5934_v40 = vpop.eup %5933 }
 0x347   :  { %v933_v43 = vmul.f32 %v5934_v40, %v916_v39  ;;  %v5936_v50 = vpop.eup %5935 }
 0x348   :  { %v936_v55 = vsub.f32 1.0, %v5936_v50  ;;  %v938_v4 = vmul.f32 %v5936_v50, %v6524_v11 }
 0x349   :  { %v934_v47 = vadd.f32 %v933_v43, %v6451_v61 }
 0x34b   :  { %5937 = vtanh.f32 %v934_v47 }
 0x355   :  { %v5938_v58 = vpop.eup %5937 }
 0x356   :  { %v937_v3 = vmul.f32 %v5938_v58, %v936_v55 }
 0x358   :  { %v6568_v5 = vadd.f32 %v938_v4, %v937_v3 }
 0x35a   :  { %1013 = vmatmul.mubr.f32.vlgmr.msra.gmra.mrb[6].mxu0 %v6568_v5  ;;  %4343 = vmatmul.mubr.f32.vlgmr.msra.gmra.mrb[14].mxu1 %v6568_v5 }
 0x35b   :  { %5008 = vmatpush1.bf16.msra.mxu0 %v6264_v21  ;;  %5039 = vmatpush3.bf16.msra.mxu1 %v6304_v49 }
 0x35c   :  { %5010 = vmatprep.subr.bf16.mxu0 %v6267_v22  ;;  %5040 = vmatprep.subr.bf16.mxu1 %v6146_v57 }
 0x35d   :  { %1182 = vmatprep.mubr.f32.mxu0 %v6145_v0  ;;  %4377 = vmatprep.mubr.msk.f32.mxu1 %vm6147_vm1, %v6145_v0 }
 0x35f   :  { %5012 = vmatpush1.bf16.msra.mxu0 %v6281_v30  ;;  %5042 = vmatpush3.bf16.msra.mxu1 %v6320_v60 }
 0x360   :  { %5014 = vmatprep.subr.bf16.mxu0 %v6284_v33  ;;  %5043 = vmatprep.subr.bf16.mxu1 %v6146_v57 }
 0x363   :  { %5016 = vmatpush1.bf16.msra.mxu0 %v6298_v41  ;;  %5045 = vmatpush3.bf16.msra.mxu1 %v6336_v7 }
 0x364   :  { %5018 = vmatprep.subr.bf16.mxu0 %v6301_v44  ;;  %5046 = vmatprep.subr.bf16.mxu1 %v6146_v57 }
 0x367   :  { %5020 = vmatpush1.bf16.msra.mxu0 %v6311_v51  ;;  %5048 = vmatpush3.bf16.msra.mxu1 %v6352_v18 }
 0x368   :  { %5022 = vmatprep.subr.bf16.mxu0 %v6314_v54  ;;  %5049 = vmatprep.subr.bf16.mxu1 %v6146_v57 }
 0x36b   :  { %5024 = vmatpush1.bf16.msra.mxu0 %v6327_v62  ;;  %5051 = vmatpush3.bf16.msra.mxu1 %v6368_v28 }
 0x36c   :  { %5026 = vmatprep.subr.bf16.mxu0 %v6330_v2  ;;  %5052 = vmatprep.subr.bf16.mxu1 %v6146_v57 }
 0x36f   :  { %5028 = vmatpush1.bf16.msra.mxu0 %v6343_v9  ;;  %5054 = vmatpush3.bf16.msra.mxu1 %v6382_v35 }
 0x370   :  { %5030 = vmatprep.subr.bf16.mxu0 %v6346_v12  ;;  %5055 = vmatprep.subr.bf16.mxu1 %v6146_v57 }
 0x373   :  { %5032 = vmatpush1.bf16.msra.mxu0 %v6359_v20  ;;  %5057 = vmatpush3.bf16.msra.mxu1 %v6392_v38 }
 0x374   :  { %5034 = vmatprep.subr.bf16.mxu0 %v6362_v25  ;;  %5058 = vmatprep.subr.bf16.mxu1 %v6146_v57 }
 0x377   :  { %5036 = vmatpush1.bf16.msra.mxu0 %v6375_v31  ;;  %5060 = vmatpush3.bf16.msra.mxu1 %v6401_v42 }
 0x378   :  { %5062 = vmatprep.subr.bf16.mxu0 %v6262_v16  ;;  %5093 = vmatprep.subr.bf16.mxu1 %v6146_v57 }
 0x42d   :  { %v1014_v61 = vpop.f32.mrb[6].mxu0  ;;  %v1085_v6 = vpop.f32.mrb[14].mxu1 }
 0x42e   :  { %v5818_v8 = vadd.f32 %v6464_v13, %v1014_v61  ;;  %v1016_v52 = vpop.f32.mrb[7].mxu0  ;;  %v4344_v15 = vpop.f32.mrb[15].mxu1  ;;  %v1086_v34 = vadd.f32 %v1085_v6, %v6477_v45 }
 0x42f   :  { %v5820_v48 = vadd.f32 %v6468_v19, %v1016_v52 }
 0x430   :  { %v3783_v17 = vmul.f32 -1.442695, %v5818_v8 }
 0x431   :  { %v3784_v53 = vmul.f32 -1.442695, %v5820_v48 }
 0x432   :  { %5939 = vpow2.f32 %v3783_v17 }
 0x433   :  { %5941 = vpow2.f32 %v3784_v53 }
 0x43c   :  { %v5940_v63 = vpop.eup %5939 }
 0x43d   :  { %v1097_v26 = vadd.f32 1.0, %v5940_v63  ;;  %v5942_v27 = vpop.eup %5941 }
 0x43e   :  { %v1098_v32 = vadd.f32 1.0, %v5942_v27 }
 0x43f   :  { %5943 = vrcp.f32 %v1097_v26 }
 0x440   :  { %5945 = vrcp.f32 %v1098_v32 }
 0x449   :  { %v5944_v36 = vpop.eup %5943 }
 0x44a   :  { %v1103_v37 = vmul.f32 %v5944_v36, %v1086_v34  ;;  %v5946_v40 = vpop.eup %5945 }
 0x44b   :  { %v1106_v43 = vsub.f32 1.0, %v5946_v40  ;;  %v1108_v55 = vmul.f32 %v5946_v40, %v6568_v5 }
 0x44c   :  { %v1104_v39 = vadd.f32 %v1103_v37, %v6447_v56 }
 0x44e   :  { %5947 = vtanh.f32 %v1104_v39 }
 0x458   :  { %v5948_v47 = vpop.eup %5947 }
 0x459   :  { %v1107_v50 = vmul.f32 %v5948_v47, %v1106_v43 }
 0x45b   :  { %v6612_v58 = vadd.f32 %v1108_v55, %v1107_v50 }
 0x45d   :  { %1183 = vmatmul.mubr.f32.vlgmr.msra.gmra.mrb[8].mxu0 %v6612_v58  ;;  %4378 = vmatmul.mubr.f32.vlgmr.msra.gmra.mrb[16].mxu1 %v6612_v58 }
 0x45e   :  { %5064 = vmatpush1.bf16.msra.mxu0 %v6264_v21  ;;  %5095 = vmatpush3.bf16.msra.mxu1 %v6304_v49 }
 0x45f   :  { %5066 = vmatprep.subr.bf16.mxu0 %v6267_v22  ;;  %5096 = vmatprep.subr.bf16.mxu1 %v6146_v57 }
 0x460   :  { %1350 = vmatprep.mubr.f32.mxu0 %v6145_v0  ;;  %4412 = vmatprep.mubr.msk.f32.mxu1 %vm6147_vm1, %v6145_v0 }
 0x462   :  { %5068 = vmatpush1.bf16.msra.mxu0 %v6281_v30  ;;  %5098 = vmatpush3.bf16.msra.mxu1 %v6320_v60 }
 0x463   :  { %5070 = vmatprep.subr.bf16.mxu0 %v6284_v33  ;;  %5099 = vmatprep.subr.bf16.mxu1 %v6146_v57 }
 0x466   :  { %5072 = vmatpush1.bf16.msra.mxu0 %v6298_v41  ;;  %5101 = vmatpush3.bf16.msra.mxu1 %v6336_v7 }
 0x467   :  { %5074 = vmatprep.subr.bf16.mxu0 %v6301_v44  ;;  %5102 = vmatprep.subr.bf16.mxu1 %v6146_v57 }
 0x46a   :  { %5076 = vmatpush1.bf16.msra.mxu0 %v6311_v51  ;;  %5104 = vmatpush3.bf16.msra.mxu1 %v6352_v18 }
 0x46b   :  { %5078 = vmatprep.subr.bf16.mxu0 %v6314_v54  ;;  %5105 = vmatprep.subr.bf16.mxu1 %v6146_v57 }
 0x46e   :  { %5080 = vmatpush1.bf16.msra.mxu0 %v6327_v62  ;;  %5107 = vmatpush3.bf16.msra.mxu1 %v6368_v28 }
 0x46f   :  { %5082 = vmatprep.subr.bf16.mxu0 %v6330_v2  ;;  %5108 = vmatprep.subr.bf16.mxu1 %v6146_v57 }
 0x472   :  { %5084 = vmatpush1.bf16.msra.mxu0 %v6343_v9  ;;  %5110 = vmatpush3.bf16.msra.mxu1 %v6382_v35 }
 0x473   :  { %5086 = vmatprep.subr.bf16.mxu0 %v6346_v12  ;;  %5111 = vmatprep.subr.bf16.mxu1 %v6146_v57 }
 0x476   :  { %5088 = vmatpush1.bf16.msra.mxu0 %v6359_v20  ;;  %5113 = vmatpush3.bf16.msra.mxu1 %v6392_v38 }
 0x477   :  { %5090 = vmatprep.subr.bf16.mxu0 %v6362_v25  ;;  %5114 = vmatprep.subr.bf16.mxu1 %v6146_v57 }
 0x47a   :  { %5092 = vmatpush1.bf16.msra.mxu0 %v6375_v31  ;;  %5116 = vmatpush3.bf16.msra.mxu1 %v6401_v42 }
 0x47b   :  { %5118 = vmatprep.subr.bf16.mxu0 %v6262_v16  ;;  %5149 = vmatprep.subr.bf16.mxu1 %v6146_v57 }
 0x530   :  { %v1184_v56 = vpop.f32.mrb[8].mxu0  ;;  %v1255_v3 = vpop.f32.mrb[16].mxu1 }
 0x531   :  { %v5822_v4 = vadd.f32 %v6464_v13, %v1184_v56  ;;  %v1186_v61 = vpop.f32.mrb[9].mxu0  ;;  %v4379_v6 = vpop.f32.mrb[17].mxu1  ;;  %v1256_v26 = vadd.f32 %v1255_v3, %v6477_v45 }
 0x532   :  { %v5824_v52 = vadd.f32 %v6468_v19, %v1186_v61 }
 0x533   :  { %v3785_v8 = vmul.f32 -1.442695, %v5822_v4 }
 0x534   :  { %v3786_v15 = vmul.f32 -1.442695, %v5824_v52 }
 0x535   :  { %5949 = vpow2.f32 %v3785_v8 }
 0x536   :  { %5951 = vpow2.f32 %v3786_v15 }
 0x53f   :  { %v5950_v17 = vpop.eup %5949 }
 0x540   :  { %v1267_v48 = vadd.f32 1.0, %v5950_v17  ;;  %v5952_v53 = vpop.eup %5951 }
 0x541   :  { %v1268_v63 = vadd.f32 1.0, %v5952_v53 }
 0x542   :  { %5953 = vrcp.f32 %v1267_v48 }
 0x543   :  { %5955 = vrcp.f32 %v1268_v63 }
 0x54c   :  { %v5954_v27 = vpop.eup %5953 }
 0x54d   :  { %v1273_v32 = vmul.f32 %v5954_v27, %v1256_v26  ;;  %v5956_v36 = vpop.eup %5955 }
 0x54e   :  { %v1276_v37 = vsub.f32 1.0, %v5956_v36  ;;  %v1278_v43 = vmul.f32 %v5956_v36, %v6612_v58 }
 0x54f   :  { %v1274_v34 = vadd.f32 %v1273_v32, %v6466_v14 }
 0x551   :  { %5957 = vtanh.f32 %v1274_v34 }
 0x55b   :  { %v5958_v39 = vpop.eup %5957 }
 0x55c   :  { %v1277_v40 = vmul.f32 %v5958_v39, %v1276_v37  ;;  %v1809_v39 = vld [vmem:[%s7631_s5 + $0x38] sm:$0xff] }
 0x55e   :  { %v6656_v47 = vadd.f32 %v1278_v43, %v1277_v40 }
 0x560   :  { %1351 = vmatmul.mubr.f32.vlgmr.msra.gmra.mrb[10].mxu0 %v6656_v47  ;;  %4413 = vmatmul.mubr.f32.vlgmr.msra.gmra.mrb[18].mxu1 %v6656_v47 }
 0x561   :  { %5120 = vmatpush1.bf16.msra.mxu0 %v6264_v21  ;;  %5151 = vmatpush3.bf16.msra.mxu1 %v6304_v49 }
 0x562   :  { %5122 = vmatprep.subr.bf16.mxu0 %v6267_v22  ;;  %5152 = vmatprep.subr.bf16.mxu1 %v6146_v57 }
 0x563   :  { %1518 = vmatprep.mubr.f32.mxu0 %v6145_v0  ;;  %4447 = vmatprep.mubr.msk.f32.mxu1 %vm6147_vm1, %v6145_v0 }
 0x565   :  { %5124 = vmatpush1.bf16.msra.mxu0 %v6281_v30  ;;  %5154 = vmatpush3.bf16.msra.mxu1 %v6320_v60 }
 0x566   :  { %5126 = vmatprep.subr.bf16.mxu0 %v6284_v33  ;;  %5155 = vmatprep.subr.bf16.mxu1 %v6146_v57 }
 0x569   :  { %5128 = vmatpush1.bf16.msra.mxu0 %v6298_v41  ;;  %5157 = vmatpush3.bf16.msra.mxu1 %v6336_v7 }
 0x56a   :  { %5130 = vmatprep.subr.bf16.mxu0 %v6301_v44  ;;  %5158 = vmatprep.subr.bf16.mxu1 %v6146_v57 }
 0x56d   :  { %5132 = vmatpush1.bf16.msra.mxu0 %v6311_v51  ;;  %5160 = vmatpush3.bf16.msra.mxu1 %v6352_v18 }
 0x56e   :  { %5134 = vmatprep.subr.bf16.mxu0 %v6314_v54  ;;  %5161 = vmatprep.subr.bf16.mxu1 %v6146_v57 }
 0x571   :  { %5136 = vmatpush1.bf16.msra.mxu0 %v6327_v62  ;;  %5163 = vmatpush3.bf16.msra.mxu1 %v6368_v28 }
 0x572   :  { %5138 = vmatprep.subr.bf16.mxu0 %v6330_v2  ;;  %5164 = vmatprep.subr.bf16.mxu1 %v6146_v57 }
 0x575   :  { %5140 = vmatpush1.bf16.msra.mxu0 %v6343_v9  ;;  %5166 = vmatpush3.bf16.msra.mxu1 %v6382_v35 }
 0x576   :  { %5142 = vmatprep.subr.bf16.mxu0 %v6346_v12  ;;  %5167 = vmatprep.subr.bf16.mxu1 %v6146_v57 }
 0x579   :  { %5144 = vmatpush1.bf16.msra.mxu0 %v6359_v20  ;;  %5169 = vmatpush3.bf16.msra.mxu1 %v6392_v38 }
 0x57a   :  { %5146 = vmatprep.subr.bf16.mxu0 %v6362_v25  ;;  %5170 = vmatprep.subr.bf16.mxu1 %v6146_v57 }
 0x57d   :  { %5148 = vmatpush1.bf16.msra.mxu0 %v6375_v31  ;;  %5172 = vmatpush3.bf16.msra.mxu1 %v6401_v42 }
 0x57e   :  { %5174 = vmatprep.subr.bf16.mxu0 %v6262_v16  ;;  %5205 = vmatprep.subr.bf16.mxu1 %v6146_v57 }
 0x633   :  { %v1352_v14 = vpop.f32.mrb[10].mxu0  ;;  %v1423_v50 = vpop.f32.mrb[18].mxu1 }
 0x634   :  { %v5826_v55 = vadd.f32 %v6464_v13, %v1352_v14  ;;  %v1354_v56 = vpop.f32.mrb[11].mxu0  ;;  %v4414_v3 = vpop.f32.mrb[19].mxu1  ;;  %v1424_v16 = vadd.f32 %v1423_v50, %v6477_v45 }
 0x635   :  { %v5828_v61 = vadd.f32 %v6468_v19, %v1354_v56  ;;  %v1808_v56 = vld [vmem:[%s7631_s5 + $0x30] sm:$0xff]  ;;  %v1811_v3 = vld [vmem:[%s7631_s5 + $0x48] sm:$0xff] }
 0x636   :  { %v3787_v4 = vmul.f32 -1.442695, %v5826_v55 }
 0x637   :  { %v3788_v6 = vmul.f32 -1.442695, %v5828_v61  ;;  %v1818_v61 = vld [vmem:[%s7631_s5 + $0x80] sm:$0xff] }
 0x638   :  { %5959 = vpow2.f32 %v3787_v4  ;;  %v1815_v4 = vld [vmem:[%s7631_s5 + $0x68] sm:$0xff] }
 0x639   :  { %5961 = vpow2.f32 %v3788_v6  ;;  %v5235_v6 = vpack.c.bf16 %v1811_v3, %v1808_v56  ;;  %v1804_v56 = vld [vmem:[%s7631_s5 + $0x10] sm:$0xff]  ;;  %v1807_v3 = vld [vmem:[%s7631_s5 + $0x28] sm:$0xff] }
 0x642   :  { %v5960_v8 = vpop.eup %5959 }
 0x643   :  { %v1435_v52 = vadd.f32 1.0, %v5960_v8  ;;  %v5962_v15 = vpop.eup %5961  ;;  %v5237_v8 = vpack.c.bf16 %v1818_v61, %v1815_v4  ;;  %v5295_v4 = vpack.c.bf16 %v1807_v3, %v1804_v56  ;;  %v1857_v61 = vld [vmem:[%s7631_s5 + $0x1b8] sm:$0xff]  ;;  %v1828_v56 = vld [vmem:[%s7631_s5 + $0xd0] sm:$0xff]  ;;  %v1831_v3 = vld [vmem:[%s7631_s5 + $0xe8] sm:$0xff] }
 0x644   :  { %v1436_v17 = vadd.f32 1.0, %v5962_v15  ;;  %v1817_v15 = vld [vmem:[%s7631_s5 + $0x78] sm:$0xff] }
 0x645   :  { %5963 = vrcp.f32 %v1435_v52  ;;  %v1814_v52 = vld [vmem:[%s7631_s5 + $0x60] sm:$0xff] }
 0x646   :  { %5965 = vrcp.f32 %v1436_v17  ;;  %v1821_v17 = vld [vmem:[%s7631_s5 + $0x98] sm:$0xff] }
 0x64f   :  { %v5964_v48 = vpop.eup %5963 }
 0x650   :  { %v1441_v53 = vmul.f32 %v5964_v48, %v1424_v16  ;;  %v5966_v26 = vpop.eup %5965  ;;  %v1824_v16 = vld [vmem:[%s7631_s5 + $0xb0] sm:$0xff]  ;;  %v5239_v48 = vpack.c.bf16 %v1817_v15, %v1814_v52  ;;  %v1861_v15 = vld [vmem:[%s7631_s5 + $0x1d8] sm:$0xff] }
 0x651   :  { %v1444_v27 = vsub.f32 1.0, %v5966_v26  ;;  %v1446_v36 = vmul.f32 %v5966_v26, %v6656_v47  ;;  %v1823_v26 = vld [vmem:[%s7631_s5 + $0xa8] sm:$0xff] }
 0x652   :  { %v1442_v63 = vadd.f32 %v1441_v53, %v6462_v10  ;;  %v5241_v53 = vpack.c.bf16 %v1824_v16, %v1821_v17  ;;  %v1856_v17 = vld [vmem:[%s7631_s5 + $0x1b0] sm:$0xff]  ;;  %v1859_v16 = vld [vmem:[%s7631_s5 + $0x1c8] sm:$0xff] }
 0x654   :  { %5967 = vtanh.f32 %v1442_v63  ;;  %v1820_v63 = vld [vmem:[%s7631_s5 + $0x90] sm:$0xff] }
 0x65e   :  { %v5968_v32 = vpop.eup %5967 }
 0x65f   :  { %v1445_v34 = vmul.f32 %v5968_v32, %v1444_v27  ;;  %v5243_v27 = vpack.c.bf16 %v1823_v26, %v1820_v63  ;;  %v1827_v32 = vld [vmem:[%s7631_s5 + $0xc8] sm:$0xff]  ;;  %v1810_v63 = vld [vmem:[%s7631_s5 + $0x40] sm:$0xff]  ;;  %v1813_v26 = vld [vmem:[%s7631_s5 + $0x58] sm:$0xff] }
 0x661   :  { %v6700_v37 = vadd.f32 %v1446_v36, %v1445_v34  ;;  %v1830_v34 = vld [vmem:[%s7631_s5 + $0xe0] sm:$0xff] }
 0x662   :  { %v5245_v36 = vpack.c.bf16 %v1830_v34, %v1827_v32  ;;  %v1863_v32 = vld [vmem:[%s7631_s5 + $0x1e8] sm:$0xff]  ;;  %v1866_v34 = vld [vmem:[%s7631_s5 + $0x200] sm:$0xff] }
 0x663   :  { %1519 = vmatmul.mubr.f32.vlgmr.msra.gmra.mrb[12].mxu0 %v6700_v37  ;;  %4448 = vmatmul.mubr.f32.vlgmr.msra.gmra.mrb[20].mxu1 %v6700_v37 }
 0x664   :  { %5176 = vmatpush1.bf16.msra.mxu0 %v6264_v21  ;;  %5207 = vmatpush3.bf16.msra.mxu1 %v6304_v49  ;;  %v1803_v21 = vld [vmem:[%s7631_s5 + $0x8] sm:$0xff] }
 0x665   :  { %5178 = vmatprep.subr.bf16.mxu0 %v6267_v22  ;;  %5208 = vmatprep.subr.bf16.mxu1 %v6146_v57  ;;  %v1806_v22 = vld [vmem:[%s7631_s5 + $0x20] sm:$0xff] }
 0x666   :  { %1686 = vmatprep.mubr.f32.mxu0 %v6145_v0  ;;  %4482 = vmatprep.mubr.msk.f32.mxu1 %vm6147_vm1, %v6145_v0 }
 0x668   :  { %5180 = vmatpush1.bf16.msra.mxu0 %v6281_v30  ;;  %5210 = vmatpush3.bf16.msra.mxu1 %v6320_v60  ;;  %v5229_v30 = vpack.c.bf16 %v1806_v22, %v1803_v21  ;;  %v1826_v21 = vld [vmem:[%s7631_s5 + $0xc0] sm:$0xff]  ;;  %v1829_v22 = vld [vmem:[%s7631_s5 + $0xd8] sm:$0xff] }
 0x669   :  { %5182 = vmatprep.subr.bf16.mxu0 %v6284_v33  ;;  %5211 = vmatprep.subr.bf16.mxu1 %v6146_v57 }
 0x66c   :  { %5184 = vmatpush1.bf16.msra.mxu0 %v6298_v41  ;;  %5213 = vmatpush3.bf16.msra.mxu1 %v6336_v7 }
 0x66d   :  { %5186 = vmatprep.subr.bf16.mxu0 %v6301_v44  ;;  %5214 = vmatprep.subr.bf16.mxu1 %v6146_v57 }
 0x670   :  { %5188 = vmatpush1.bf16.msra.mxu0 %v6311_v51  ;;  %5216 = vmatpush3.bf16.msra.mxu1 %v6352_v18 }
 0x671   :  { %5190 = vmatprep.subr.bf16.mxu0 %v6314_v54  ;;  %5217 = vmatprep.subr.bf16.mxu1 %v6146_v57 }
 0x674   :  { %5192 = vmatpush1.bf16.msra.mxu0 %v6327_v62  ;;  %5219 = vmatpush3.bf16.msra.mxu1 %v6368_v28 }
 0x675   :  { %5194 = vmatprep.subr.bf16.mxu0 %v6330_v2  ;;  %5220 = vmatprep.subr.bf16.mxu1 %v6146_v57 }
 0x678   :  { %5196 = vmatpush1.bf16.msra.mxu0 %v6343_v9  ;;  %5222 = vmatpush3.bf16.msra.mxu1 %v6382_v35 }
 0x679   :  { %5198 = vmatprep.subr.bf16.mxu0 %v6346_v12  ;;  %5223 = vmatprep.subr.bf16.mxu1 %v6146_v57 }
 0x67c   :  { %5200 = vmatpush1.bf16.msra.mxu0 %v6359_v20  ;;  %5225 = vmatpush3.bf16.msra.mxu1 %v6392_v38  ;;  %v1802_v38 = vld [vmem:[%s7631_s5] sm:$0xff] }
 0x67d   :  { %5202 = vmatprep.subr.bf16.mxu0 %v6362_v25  ;;  %5226 = vmatprep.subr.bf16.mxu1 %v6146_v57 }
 0x680   :  { %5204 = vmatpush1.bf16.msra.mxu0 %v6375_v31  ;;  %5228 = vmatpush3.bf16.msra.mxu1 %v6401_v42  ;;  %v1805_v42 = vld [vmem:[%s7631_s5 + $0x18] sm:$0xff] }
 0x681   :  { %5230 = vmatprep.subr.bf16.mxu0 %v5229_v30  ;;  %v5231_v14 = vpack.c.bf16 %v1805_v42, %v1802_v38  ;;  %v5247_v30 = vpack.c.bf16 %v1829_v22, %v1826_v21  ;;  %v1851_v38 = vld [vmem:[%s7631_s5 + $0x188] sm:$0xff]  ;;  %v1854_v42 = vld [vmem:[%s7631_s5 + $0x1a0] sm:$0xff]  ;;  %v5269_v21 = vpack.c.bf16 %v1866_v34, %v1863_v32 }
 0x682   :  { %v1867_v22 = vld [vmem:[%s7631_s5 + $0x208] sm:$0xff]  ;;  %v1890_v34 = vld [vmem:[%s7631_s5 + $0x2c0] sm:$0xff] }
 0x736   :  { %v1520_v33 = vpop.f32.mrb[12].mxu0  ;;  %v1591_v41 = vpop.f32.mrb[20].mxu1 }
 0x737   :  { %v5830_v44 = vadd.f32 %v6464_v13, %v1520_v33  ;;  %v1522_v49 = vpop.f32.mrb[13].mxu0  ;;  %v4449_v51 = vpop.f32.mrb[21].mxu1  ;;  %v1592_v18 = vadd.f32 %v1591_v41, %v6477_v45  ;;  %v1833_v33 = vld [vmem:[%s7631_s5 + $0xf8] sm:$0xff]  ;;  %v1836_v41 = vld [vmem:[%s7631_s5 + $0x110] sm:$0xff] }
 0x738   :  { %v5832_v60 = vadd.f32 %v6468_v19, %v1522_v49  ;;  %v1832_v49 = vld [vmem:[%s7631_s5 + $0xf0] sm:$0xff]  ;;  %v1835_v51 = vld [vmem:[%s7631_s5 + $0x108] sm:$0xff] }
 0x739   :  { %v3789_v54 = vmul.f32 -1.442695, %v5830_v44  ;;  %v5249_v44 = vpack.c.bf16 %v1836_v41, %v1833_v33  ;;  %v1865_v33 = vld [vmem:[%s7631_s5 + $0x1f8] sm:$0xff] }
 0x73a   :  { %v3790_v62 = vmul.f32 -1.442695, %v5832_v60  ;;  %v1839_v60 = vld [vmem:[%s7631_s5 + $0x128] sm:$0xff] }
 0x73b   :  { %5969 = vpow2.f32 %v3789_v54  ;;  %v5251_v54 = vpack.c.bf16 %v1835_v51, %v1832_v49  ;;  %v1816_v49 = vld [vmem:[%s7631_s5 + $0x70] sm:$0xff]  ;;  %v1819_v51 = vld [vmem:[%s7631_s5 + $0x88] sm:$0xff] }
 0x73c   :  { %5971 = vpow2.f32 %v3790_v62  ;;  %v1842_v62 = vld [vmem:[%s7631_s5 + $0x140] sm:$0xff] }
 0x745   :  { %v5970_v2 = vpop.eup %5969 }
 0x746   :  { %v1603_v7 = vadd.f32 1.0, %v5970_v2  ;;  %v5972_v9 = vpop.eup %5971  ;;  %v5253_v2 = vpack.c.bf16 %v1842_v62, %v1839_v60  ;;  %v1869_v60 = vld [vmem:[%s7631_s5 + $0x218] sm:$0xff]  ;;  %v1872_v62 = vld [vmem:[%s7631_s5 + $0x230] sm:$0xff] }
 0x747   :  { %v1604_v12 = vadd.f32 1.0, %v5972_v9  ;;  %v1841_v9 = vld [vmem:[%s7631_s5 + $0x138] sm:$0xff] }
 0x748   :  { %5973 = vrcp.f32 %v1603_v7  ;;  %v1838_v7 = vld [vmem:[%s7631_s5 + $0x120] sm:$0xff] }
 0x749   :  { %5975 = vrcp.f32 %v1604_v12  ;;  %v5255_v12 = vpack.c.bf16 %v1841_v9, %v1838_v7  ;;  %v5273_v7 = vpack.c.bf16 %v1872_v62, %v1869_v60  ;;  %v1873_v9 = vld [vmem:[%s7631_s5 + $0x238] sm:$0xff]  ;;  %v1896_v60 = vld [vmem:[%s7631_s5 + $0x2f0] sm:$0xff] }
 0x752   :  { %v5974_v20 = vpop.eup %5973 }
 0x753   :  { %v1609_v25 = vmul.f32 %v5974_v20, %v1592_v18  ;;  %v5976_v31 = vpop.eup %5975  ;;  %v1845_v18 = vld [vmem:[%s7631_s5 + $0x158] sm:$0xff]  ;;  %v1848_v20 = vld [vmem:[%s7631_s5 + $0x170] sm:$0xff] }
 0x754   :  { %v1612_v35 = vsub.f32 1.0, %v5976_v31  ;;  %v1614_v43 = vmul.f32 %v5976_v31, %v6700_v37  ;;  %v1847_v31 = vld [vmem:[%s7631_s5 + $0x168] sm:$0xff] }
 0x755   :  { %v1610_v28 = vadd.f32 %v1609_v25, %v6473_v29  ;;  %v1812_v29 = vld [vmem:[%s7631_s5 + $0x50] sm:$0xff]  ;;  %v5257_v25 = vpack.c.bf16 %v1848_v20, %v1845_v18  ;;  %v1871_v18 = vld [vmem:[%s7631_s5 + $0x228] sm:$0xff] }
 0x756   :  { %v5233_v55 = vpack.c.bf16 %v1812_v29, %v1809_v39  ;;  %v5261_v39 = vpack.c.bf16 %v1854_v42, %v1851_v38  ;;  %v1855_v29 = vld [vmem:[%s7631_s5 + $0x1a8] sm:$0xff]  ;;  %v1878_v42 = vld [vmem:[%s7631_s5 + $0x260] sm:$0xff] }
 0x757   :  { %5977 = vtanh.f32 %v1610_v28  ;;  %v1844_v28 = vld [vmem:[%s7631_s5 + $0x150] sm:$0xff]  ;;  %v1875_v38 = vld [vmem:[%s7631_s5 + $0x248] sm:$0xff] }
 0x761   :  { %v5978_v10 = vpop.eup %5977 }
 0x762   :  { %v1613_v40 = vmul.f32 %v5978_v10, %v1612_v35  ;;  %v5259_v35 = vpack.c.bf16 %v1847_v31, %v1844_v28  ;;  %v1852_v10 = vld [vmem:[%s7631_s5 + $0x190] sm:$0xff]  ;;  %v1822_v28 = vld [vmem:[%s7631_s5 + $0xa0] sm:$0xff]  ;;  %v1825_v31 = vld [vmem:[%s7631_s5 + $0xb8] sm:$0xff] }
 0x764   :  { %v6760_v50 = vadd.f32 %v1614_v43, %v1613_v40  ;;  %v1850_v40 = vld [vmem:[%s7631_s5 + $0x180] sm:$0xff]  ;;  %v1853_v43 = vld [vmem:[%s7631_s5 + $0x198] sm:$0xff] }
 0x766   :  { %1687 = vmatmul.mubr.f32.vlgmr.msra.gmra.mrb[14].mxu0 %v6760_v50  ;;  %4483 = vmatmul.mubr.f32.vlgmr.msra.gmra.mrb[22].mxu1 %v6760_v50 }
 0x767   :  { %5232 = vmatpush1.bf16.msra.mxu0 %v5231_v14  ;;  %v5293_v14 = vpack.c.bf16 %v1855_v29, %v1852_v10  ;;  %v1876_v10 = vld [vmem:[%s7631_s5 + $0x250] sm:$0xff]  ;;  %v1879_v29 = vld [vmem:[%s7631_s5 + $0x268] sm:$0xff] }
 0x768   :  { %5234 = vmatprep.subr.bf16.mxu0 %v5233_v55  ;;  %v5263_v55 = vpack.c.bf16 %v1853_v43, %v1850_v40  ;;  %v1874_v40 = vld [vmem:[%s7631_s5 + $0x240] sm:$0xff]  ;;  %v1877_v43 = vld [vmem:[%s7631_s5 + $0x258] sm:$0xff] }
 0x769   :  { %5294 = vmatprep.subr.bf16.mxu1 %v5293_v14  ;;  %v5309_v14 = vpack.c.bf16 %v1879_v29, %v1876_v10 }
 0x76a   :  { %5296 = vmatpush3.bf16.msra.mxu1 %v5295_v4  ;;  %v5311_v4 = vpack.c.bf16 %v1831_v3, %v1828_v56 }
 0x76b   :  { %5236 = vmatpush1.bf16.msra.mxu0 %v5235_v6  ;;  %v1860_v6 = vld [vmem:[%s7631_s5 + $0x1d0] sm:$0xff] }
 0x76c   :  { %5238 = vmatprep.subr.bf16.mxu0 %v5237_v8  ;;  %v1858_v8 = vld [vmem:[%s7631_s5 + $0x1c0] sm:$0xff]  ;;  %v5265_v52 = vpack.c.bf16 %v1860_v6, %v1857_v61  ;;  %v1881_v61 = vld [vmem:[%s7631_s5 + $0x278] sm:$0xff]  ;;  %v1884_v6 = vld [vmem:[%s7631_s5 + $0x290] sm:$0xff] }
 0x76f   :  { %5240 = vmatpush1.bf16.msra.mxu0 %v5239_v48  ;;  %v5297_v48 = vpack.c.bf16 %v1861_v15, %v1858_v8  ;;  %v1882_v8 = vld [vmem:[%s7631_s5 + $0x280] sm:$0xff]  ;;  %v1885_v15 = vld [vmem:[%s7631_s5 + $0x298] sm:$0xff] }
 0x770   :  { %5242 = vmatprep.subr.bf16.mxu0 %v5241_v53  ;;  %v5267_v53 = vpack.c.bf16 %v1859_v16, %v1856_v17  ;;  %v1880_v17 = vld [vmem:[%s7631_s5 + $0x270] sm:$0xff]  ;;  %v1883_v16 = vld [vmem:[%s7631_s5 + $0x288] sm:$0xff] }
 0x771   :  { %5298 = vmatprep.subr.bf16.mxu1 %v5297_v48  ;;  %v5313_v48 = vpack.c.bf16 %v1885_v15, %v1882_v8 }
 0x773   :  { %5244 = vmatpush1.bf16.msra.mxu0 %v5243_v27  ;;  %v5299_v27 = vpack.c.bf16 %v1813_v26, %v1810_v63  ;;  %v1834_v63 = vld [vmem:[%s7631_s5 + $0x100] sm:$0xff]  ;;  %v1837_v26 = vld [vmem:[%s7631_s5 + $0x118] sm:$0xff] }
 0x774   :  { %5246 = vmatprep.subr.bf16.mxu0 %v5245_v36  ;;  %v1864_v36 = vld [vmem:[%s7631_s5 + $0x1f0] sm:$0xff]  ;;  %v5315_v32 = vpack.c.bf16 %v1837_v26, %v1834_v63 }
 0x775   :  { %5300 = vmatpush3.bf16.msra.mxu1 %v5299_v27  ;;  %v5301_v41 = vpack.c.bf16 %v1867_v22, %v1864_v36  ;;  %v1887_v27 = vld [vmem:[%s7631_s5 + $0x2a8] sm:$0xff]  ;;  %v1888_v36 = vld [vmem:[%s7631_s5 + $0x2b0] sm:$0xff] }
 0x776   :  { %v5285_v22 = vpack.c.bf16 %v1890_v34, %v1887_v27  ;;  %v2160_v27 = vld [vmem:[#allocation8 + $0x18] sm:$0xff]  ;;  %v2162_v34 = vld [vmem:[#allocation8 + $0x28] sm:$0xff] }
 0x777   :  { %5248 = vmatpush1.bf16.msra.mxu0 %v5247_v30  ;;  %v1862_v30 = vld [vmem:[%s7631_s5 + $0x1e0] sm:$0xff]  ;;  %5302 = vmatprep.subr.bf16.mxu1 %v5301_v41  ;;  %v1889_v41 = vld [vmem:[%s7631_s5 + $0x2b8] sm:$0xff] }
 0x778   :  { %5250 = vmatprep.subr.bf16.mxu0 %v5249_v44  ;;  %v5271_v44 = vpack.c.bf16 %v1865_v33, %v1862_v30  ;;  %v1886_v33 = vld [vmem:[%s7631_s5 + $0x2a0] sm:$0xff] }
 0x77b   :  { %5252 = vmatpush1.bf16.msra.mxu0 %v5251_v54  ;;  %v5303_v54 = vpack.c.bf16 %v1819_v51, %v1816_v49  ;;  %v5287_v49 = vpack.c.bf16 %v1889_v41, %v1886_v33  ;;  %v1843_v51 = vld [vmem:[%s7631_s5 + $0x148] sm:$0xff] }
 0x77c   :  { %5254 = vmatprep.subr.bf16.mxu0 %v5253_v2  ;;  %v1870_v2 = vld [vmem:[%s7631_s5 + $0x220] sm:$0xff]  ;;  %v2166_v41 = vld [vmem:[#allocation8 + $0x48] sm:$0xff] }
 0x77d   :  { %5304 = vmatpush3.bf16.msra.mxu1 %v5303_v54  ;;  %v5305_v20 = vpack.c.bf16 %v1873_v9, %v1870_v2  ;;  %v1893_v54 = vld [vmem:[%s7631_s5 + $0x2d8] sm:$0xff] }
 0x77e   :  { %v5289_v2 = vpack.c.bf16 %v1896_v60, %v1893_v54  ;;  %v1897_v9 = vld [vmem:[%s7631_s5 + $0x2f8] sm:$0xff]  ;;  %v2173_v54 = vld [vmem:[#allocation8 + $0x80] sm:$0xff] }
 0x77f   :  { %5256 = vmatpush1.bf16.msra.mxu0 %v5255_v12  ;;  %v1868_v12 = vld [vmem:[%s7631_s5 + $0x210] sm:$0xff]  ;;  %5306 = vmatprep.subr.bf16.mxu1 %v5305_v20  ;;  %v1895_v20 = vld [vmem:[%s7631_s5 + $0x2e8] sm:$0xff] }
 0x780   :  { %5258 = vmatprep.subr.bf16.mxu0 %v5257_v25  ;;  %v5275_v25 = vpack.c.bf16 %v1871_v18, %v1868_v12  ;;  %v1892_v12 = vld [vmem:[%s7631_s5 + $0x2d0] sm:$0xff] }
 0x783   :  { %5260 = vmatpush1.bf16.msra.mxu0 %v5259_v35  ;;  %v5307_v35 = vpack.c.bf16 %v1825_v31, %v1822_v28  ;;  %v1849_v28 = vld [vmem:[%s7631_s5 + $0x178] sm:$0xff]  ;;  %v5291_v31 = vpack.c.bf16 %v1895_v20, %v1892_v12  ;;  %v2171_v12 = vld [vmem:[#allocation8 + $0x70] sm:$0xff] }
 0x784   :  { %5262 = vmatprep.subr.bf16.mxu0 %v5261_v39  ;;  %v5277_v39 = vpack.c.bf16 %v1878_v42, %v1875_v38  ;;  %v2158_v38 = vld [vmem:[#allocation8 + $0x8] sm:$0xff]  ;;  %v2161_v42 = vld [vmem:[#allocation8 + $0x20] sm:$0xff]  ;;  %v2176_v20 = vld [vmem:[#allocation8 + $0x98] sm:$0xff] }
 0x785   :  { %5308 = vmatpush3.bf16.msra.mxu1 %v5307_v35  ;;  %v7034_v10 = vpack.c.bf16 %v2161_v42, %v2158_v38  ;;  %v2178_v42 = vld [vmem:[#allocation8 + $0xa8] sm:$0xff] }
 0x786   :  { %5310 = vmatprep.subr.bf16.mxu1 %v5309_v14 }
 0x787   :  { %5264 = vmatpush1.bf16.msra.mxu0 %v5263_v55  ;;  %v5279_v55 = vpack.c.bf16 %v1877_v43, %v1874_v40 }
 0x788   :  { %5266 = vmatprep.subr.bf16.mxu0 %v5265_v52  ;;  %v5281_v52 = vpack.c.bf16 %v1884_v6, %v1881_v61 }
 0x789   :  { %5312 = vmatpush3.bf16.msra.mxu1 %v5311_v4 }
 0x78a   :  { %5314 = vmatprep.subr.bf16.mxu1 %v5313_v48 }
 0x78b   :  { %5268 = vmatpush1.bf16.msra.mxu0 %v5267_v53  ;;  %v5283_v53 = vpack.c.bf16 %v1883_v16, %v1880_v17 }
 0x78c   :  { %5270 = vmatprep.subr.bf16.mxu0 %v5269_v21  ;;  %v1891_v21 = vld [vmem:[%s7631_s5 + $0x2c8] sm:$0xff] }
 0x78d   :  { %v5317_v30 = vpack.c.bf16 %v1891_v21, %v1888_v36  ;;  %5316 = vmatpush3.bf16.msra.mxu1 %v5315_v32  ;;  %v2159_v32 = vld [vmem:[#allocation8 + $0x10] sm:$0xff]  ;;  %v2164_v36 = vld [vmem:[#allocation8 + $0x38] sm:$0xff] }
 0x78e   :  { %v2167_v21 = vld [vmem:[#allocation8 + $0x50] sm:$0xff]  ;;  %v7047_v33 = vpack.c.bf16 %v2162_v34, %v2159_v32 }
 0x78f   :  { %5272 = vmatpush1.bf16.msra.mxu0 %v5271_v44  ;;  %v1840_v44 = vld [vmem:[%s7631_s5 + $0x130] sm:$0xff]  ;;  %5318 = vmatprep.subr.bf16.mxu1 %v5317_v30 }
 0x790   :  { %5274 = vmatprep.subr.bf16.mxu0 %v5273_v7  ;;  %v5319_v62 = vpack.c.bf16 %v1843_v51, %v1840_v44  ;;  %v1894_v7 = vld [vmem:[%s7631_s5 + $0x2e0] sm:$0xff]  ;;  %v2163_v30 = vld [vmem:[#allocation8 + $0x30] sm:$0xff]  ;;  %v2170_v51 = vld [vmem:[#allocation8 + $0x68] sm:$0xff] }
 0x791   :  { %v5321_v18 = vpack.c.bf16 %v1897_v9, %v1894_v7  ;;  %v2165_v44 = vld [vmem:[#allocation8 + $0x40] sm:$0xff]  ;;  %v7058_v60 = vpack.c.bf16 %v2166_v41, %v2163_v30  ;;  %v7064_v7 = vpack.c.bf16 %v2173_v54, %v2170_v51  ;;  %v2172_v9 = vld [vmem:[#allocation8 + $0x78] sm:$0xff]  ;;  %v2203_v30 = vld [vmem:[#allocation8 + $0x170] sm:$0xff] }
 0x792   :  { %5320 = vmatpush3.bf16.msra.mxu1 %v5319_v62  ;;  %v2169_v62 = vld [vmem:[#allocation8 + $0x60] sm:$0xff] }
 0x793   :  { %5276 = vmatpush1.bf16.msra.mxu0 %v5275_v25  ;;  %v1846_v25 = vld [vmem:[%s7631_s5 + $0x160] sm:$0xff]  ;;  %5322 = vmatprep.subr.bf16.mxu1 %v5321_v18  ;;  %v2174_v18 = vld [vmem:[#allocation8 + $0x88] sm:$0xff] }
 0x794   :  { %5278 = vmatprep.subr.bf16.mxu0 %v5277_v39  ;;  %v5323_v35 = vpack.c.bf16 %v1849_v28, %v1846_v25  ;;  %v2179_v25 = vld [vmem:[#allocation8 + $0xb0] sm:$0xff]  ;;  %v7072_v28 = vpack.c.bf16 %v2172_v9, %v2169_v62  ;;  %v2201_v54 = vld [vmem:[#allocation8 + $0x160] sm:$0xff]  ;;  %v2204_v62 = vld [vmem:[#allocation8 + $0x178] sm:$0xff] }
 0x795   :  { %v7078_v38 = vpack.c.bf16 %v2179_v25, %v2176_v20  ;;  %v7145_v9 = vpack.c.bf16 %v2204_v62, %v2201_v54 }
 0x796   :  { %5324 = vmatpush3.bf16.msra.mxu1 %v5323_v35  ;;  %v7075_v35 = vpack.c.bf16 %v2174_v18, %v2171_v12  ;;  %v1898_v12 = vld [vmem:[%s7632_s6] sm:$0x7] }
 0x797   :  { %5280 = vmatpush1.bf16.msra.mxu0 %v5279_v55  ;;  %5357 = vmatprep.subr.bf16.mxu1 %v6146_v57  ;;  %v1911_v25 = vrot.slane %v1898_v12, %v6439_v46  ;;  %v1907_v62 = vrot.slane %v1898_v12, %v6456_v1 }
 0x798   :  { %5282 = vmatprep.subr.bf16.mxu0 %v5281_v52 }
 0x79b   :  { %5284 = vmatpush1.bf16.msra.mxu0 %v5283_v53 }
 0x79c   :  { %5286 = vmatprep.subr.bf16.mxu0 %v5285_v22 }
 0x79f   :  { %5288 = vmatpush1.bf16.msra.mxu0 %v5287_v49  ;;  %v2168_v49 = vld [vmem:[#allocation8 + $0x58] sm:$0xff] }
 0x7a0   :  { %5290 = vmatprep.subr.bf16.mxu0 %v5289_v2  ;;  %v7061_v2 = vpack.c.bf16 %v2168_v49, %v2165_v44  ;;  %v2199_v44 = vld [vmem:[#allocation8 + $0x150] sm:$0xff] }
 0x7a3   :  { %5292 = vmatpush1.bf16.msra.mxu0 %v5291_v31  ;;  %v2175_v31 = vld [vmem:[#allocation8 + $0x90] sm:$0xff] }
 0x7a4   :  { %5326 = vmatprep.subr.bf16.mxu0 %v7034_v10 }
 0x839   :  { %v1688_v39 = vpop.f32.mrb[14].mxu0  ;;  %v1759_v29 = vpop.f32.mrb[22].mxu1 }
 0x83a   :  { %v5834_v40 = vadd.f32 %v6464_v13, %v1688_v39  ;;  %v1690_v43 = vpop.f32.mrb[15].mxu0  ;;  %v4484_v14 = vpop.f32.mrb[23].mxu1  ;;  %v1760_v52 = vadd.f32 %v1759_v29, %v6477_v45  ;;  %v2177_v39 = vld [vmem:[#allocation8 + $0xa0] sm:$0xff]  ;;  %v2180_v29 = vld [vmem:[#allocation8 + $0xb8] sm:$0xff] }
 0x83b   :  { %v5836_v56 = vadd.f32 %v6468_v19, %v1690_v43  ;;  %v2157_v19 = vld [vmem:[#allocation8] sm:$0xff]  ;;  %v7086_v14 = vpack.c.bf16 %v2178_v42, %v2175_v31 }
 0x83c   :  { %v3791_v55 = vmul.f32 -1.442695, %v5834_v40  ;;  %v7045_v45 = vpack.c.bf16 %v2160_v27, %v2157_v19  ;;  %v2182_v40 = vld [vmem:[#allocation8 + $0xc8] sm:$0xff]  ;;  %v2185_v43 = vld [vmem:[#allocation8 + $0xe0] sm:$0xff]  ;;  %v2192_v19 = vld [vmem:[#allocation8 + $0x118] sm:$0xff] }
 0x83d   :  { %v3792_v3 = vmul.f32 -1.442695, %v5836_v56  ;;  %v7089_v56 = vpack.c.bf16 %v2180_v29, %v2177_v39  ;;  %v2193_v27 = vld [vmem:[#allocation8 + $0x120] sm:$0xff] }
 0x83e   :  { %5979 = vpow2.f32 %v3791_v55  ;;  %v2181_v55 = vld [vmem:[#allocation8 + $0xc0] sm:$0xff] }
 0x83f   :  { %5981 = vpow2.f32 %v3792_v3  ;;  %v7092_v3 = vpack.c.bf16 %v2185_v43, %v2182_v40 }
 0x848   :  { %v5980_v4 = vpop.eup %5979 }
 0x849   :  { %v1771_v61 = vadd.f32 1.0, %v5980_v4  ;;  %v5982_v6 = vpop.eup %5981  ;;  %v2184_v4 = vld [vmem:[#allocation8 + $0xd8] sm:$0xff] }
 0x84a   :  { %v1772_v8 = vadd.f32 1.0, %v5982_v6  ;;  %v2186_v6 = vld [vmem:[#allocation8 + $0xe8] sm:$0xff] }
 0x84b   :  { %5983 = vrcp.f32 %v1771_v61  ;;  %v2183_v61 = vld [vmem:[#allocation8 + $0xd0] sm:$0xff] }
 0x84c   :  { %5985 = vrcp.f32 %v1772_v8  ;;  %v2188_v8 = vld [vmem:[#allocation8 + $0xf8] sm:$0xff] }
 0x855   :  { %v5984_v15 = vpop.eup %5983 }
 0x856   :  { %v1777_v17 = vmul.f32 %v5984_v15, %v1760_v52  ;;  %v5986_v16 = vpop.eup %5985  ;;  %v2191_v52 = vld [vmem:[#allocation8 + $0x110] sm:$0xff]  ;;  %v7100_v15 = vpack.c.bf16 %v2184_v4, %v2181_v55 }
 0x857   :  { %v1780_v48 = vsub.f32 1.0, %v5986_v16  ;;  %v1782_v26 = vmul.f32 %v5986_v16, %v6760_v50  ;;  %v7106_v16 = vpack.c.bf16 %v2191_v52, %v2188_v8 }
 0x858   :  { %v1778_v13 = vadd.f32 %v1777_v17, %v6470_v23  ;;  %v7051_v23 = vpack.c.bf16 %v2167_v21, %v2164_v36  ;;  %v2187_v17 = vld [vmem:[#allocation8 + $0xf0] sm:$0xff]  ;;  %v2198_v21 = vld [vmem:[#allocation8 + $0x148] sm:$0xff] }
 0x859   :  { %v2195_v36 = vld [vmem:[#allocation8 + $0x130] sm:$0xff] }
 0x85a   :  { %5987 = vtanh.f32 %v1778_v13  ;;  %v7103_v13 = vpack.c.bf16 %v2186_v6, %v2183_v61  ;;  %v7131_v49 = vpack.c.bf16 %v2198_v21, %v2195_v36 }
 0x864   :  { %v5988_v53 = vpop.eup %5987 }
 0x865   :  { %v1781_v63 = vmul.f32 %v5988_v53, %v1780_v48  ;;  %v2190_v48 = vld [vmem:[#allocation8 + $0x108] sm:$0xff]  ;;  %v2189_v53 = vld [vmem:[#allocation8 + $0x100] sm:$0xff] }
 0x866   :  { %v7117_v32 = vpack.c.bf16 %v2192_v19, %v2189_v53 }
 0x867   :  { %v7043_v22 = vadd.f32 %v1782_v26, %v1781_v63  ;;  %v2197_v63 = vld [vmem:[#allocation8 + $0x140] sm:$0xff]  ;;  %v7114_v26 = vpack.c.bf16 %v2190_v48, %v2187_v17 }
 0x869   :  { %1979 = vmatprep.mubr.f32.mxu0 %v7043_v22  ;;  %2092 = vmatprep.mubr.f32.mxu1 %v7043_v22 }
 0x86a   :  { %1980 = vmatmul.mubr.f32.vlgmr.msra.gmra.mrb[16].mxu0 %v6480_v24  ;;  %2093 = vmatmul.mubr.f32.vlgmr.msra.gmra.mrb[24].mxu1 %v6480_v24 }
 0x86b   :  { %1985 = vmatprep.mubr.f32.mxu0 %v6760_v50  ;;  %2097 = vmatprep.mubr.f32.mxu1 %v6760_v50 }
 0x86c   :  { %5328 = vmatpush1.bf16.msra.mxu0 %v7045_v45  ;;  %5359 = vmatpush3.bf16.msra.mxu1 %v7047_v33 }
 0x86d   :  { %5330 = vmatprep.subr.bf16.mxu0 %v7051_v23  ;;  %5360 = vmatprep.subr.bf16.mxu1 %v6146_v57 }
 0x86e   :  { %1986 = vmatmul.mubr.f32.gmra.mrb[18].mxu0 %v6524_v11  ;;  %2098 = vmatmul.mubr.f32.gmra.mrb[26].mxu1 %v6524_v11 }
 0x86f   :  { %1991 = vmatprep.mubr.f32.mxu0 %v6700_v37  ;;  %2102 = vmatprep.mubr.f32.mxu1 %v6700_v37 }
 0x870   :  { %5332 = vmatpush1.bf16.msra.mxu0 %v7058_v60  ;;  %5362 = vmatpush3.bf16.msra.mxu1 %v7061_v2 }
 0x871   :  { %5334 = vmatprep.subr.bf16.mxu0 %v7064_v7  ;;  %5363 = vmatprep.subr.bf16.mxu1 %v6146_v57 }
 0x872   :  { %1992 = vmatmul.mubr.f32.gmra.mrb[20].mxu0 %v6568_v5  ;;  %2103 = vmatmul.mubr.f32.gmra.mrb[28].mxu1 %v6568_v5 }
 0x873   :  { %1997 = vmatprep.mubr.f32.mxu0 %v6656_v47  ;;  %2107 = vmatprep.mubr.f32.mxu1 %v6656_v47 }
 0x874   :  { %5336 = vmatpush1.bf16.msra.mxu0 %v7072_v28  ;;  %5365 = vmatpush3.bf16.msra.mxu1 %v7075_v35 }
 0x875   :  { %5338 = vmatprep.subr.bf16.mxu0 %v7078_v38  ;;  %5366 = vmatprep.subr.bf16.mxu1 %v6146_v57 }
 0x876   :  { %1998 = vmatmul.mubr.f32.gmra.mrb[22].mxu0 %v6612_v58  ;;  %2108 = vmatmul.mubr.f32.gmra.mrb[30].mxu1 %v6612_v58 }
 0x877   :  { %2003 = vmatprep.mubr.f32.mxu0 %v6612_v58  ;;  %2112 = vmatprep.mubr.f32.mxu1 %v6612_v58  ;;  %v2194_v58 = vld [vmem:[#allocation8 + $0x128] sm:$0xff] }
 0x878   :  { %5340 = vmatpush1.bf16.msra.mxu0 %v7086_v14  ;;  %5368 = vmatpush3.bf16.msra.mxu1 %v7089_v56  ;;  %v7120_v34 = vpack.c.bf16 %v2197_v63, %v2194_v58  ;;  %v2205_v63 = vld [vmem:[%s7634_s8] sm:$0x7] }
 0x879   :  { %5342 = vmatprep.subr.bf16.mxu0 %v7092_v3  ;;  %5369 = vmatprep.subr.bf16.mxu1 %v6146_v57 }
 0x87a   :  { %2004 = vmatmul.mubr.f32.gmra.mrb[24].mxu0 %v6656_v47  ;;  %2113 = vmatmul.mubr.f32.gmra.mrb[32].mxu1 %v6656_v47  ;;  %v2196_v47 = vld [vmem:[#allocation8 + $0x138] sm:$0xff] }
 0x87b   :  { %2009 = vmatprep.mubr.f32.mxu0 %v6568_v5  ;;  %2117 = vmatprep.mubr.f32.mxu1 %v6568_v5  ;;  %v2200_v5 = vld [vmem:[#allocation8 + $0x158] sm:$0xff]  ;;  %v7128_v41 = vpack.c.bf16 %v2196_v47, %v2193_v27 }
 0x87c   :  { %5344 = vmatpush1.bf16.msra.mxu0 %v7100_v15  ;;  %5371 = vmatpush3.bf16.msra.mxu1 %v7103_v13  ;;  %v7134_v51 = vpack.c.bf16 %v2203_v30, %v2200_v5  ;;  %v1903_v5 = vrot.slane %v1898_v12, %v6449_v59  ;;  %v2213_v30 = vrot.slane %v2205_v63, %v6449_v59 }
 0x87d   :  { %5346 = vmatprep.subr.bf16.mxu0 %v7106_v16  ;;  %5372 = vmatprep.subr.bf16.mxu1 %v6146_v57 }
 0x87e   :  { %2010 = vmatmul.mubr.f32.gmra.mrb[26].mxu0 %v6700_v37  ;;  %2118 = vmatmul.mubr.f32.gmra.mrb[34].mxu1 %v6700_v37  ;;  %v2202_v37 = vld [vmem:[#allocation8 + $0x168] sm:$0xff] }
 0x87f   :  { %2015 = vmatprep.mubr.f32.mxu0 %v6524_v11  ;;  %2122 = vmatprep.mubr.f32.mxu1 %v6524_v11  ;;  %v7142_v11 = vpack.c.bf16 %v2202_v37, %v2199_v44 }
 0x880   :  { %5348 = vmatpush1.bf16.msra.mxu0 %v7114_v26  ;;  %5374 = vmatpush3.bf16.msra.mxu1 %v7117_v32 }
 0x881   :  { %5350 = vmatprep.subr.bf16.mxu0 %v7120_v34  ;;  %5375 = vmatprep.subr.bf16.mxu1 %v6146_v57 }
 0x882   :  { %2016 = vmatmul.mubr.f32.gmra.mrb[28].mxu0 %v6760_v50  ;;  %2123 = vmatmul.mubr.f32.gmra.mrb[36].mxu1 %v6760_v50 }
 0x883   :  { %2021 = vmatprep.mubr.f32.mxu0 %v6480_v24  ;;  %2127 = vmatprep.mubr.f32.mxu1 %v6480_v24 }
 0x884   :  { %5352 = vmatpush1.bf16.msra.mxu0 %v7128_v41  ;;  %5377 = vmatpush3.bf16.msra.mxu1 %v7131_v49 }
 0x885   :  { %5354 = vmatprep.subr.bf16.mxu0 %v7134_v51  ;;  %5378 = vmatprep.subr.bf16.mxu1 %v6146_v57 }
 0x886   :  { %2022 = vmatmul.mubr.f32.gmra.mrb[30].mxu0 %v7043_v22  ;;  %2128 = vmatmul.mubr.f32.gmra.mrb[38].mxu1 %v7043_v22 }
 0x887   :  { %2289 = vmatprep.mubr.f32.mxu0 %v6145_v0  ;;  %4517 = vmatprep.mubr.msk.f32.mxu1 %vm6147_vm1, %v6145_v0 }
 0x888   :  { %5356 = vmatpush1.bf16.msra.mxu0 %v7142_v11  ;;  %5380 = vmatpush3.bf16.msra.mxu1 %v7145_v9 }
 0x889   :  { %5382 = vmatprep.subr.bf16.mxu0 %v7034_v10  ;;  %5413 = vmatprep.subr.bf16.mxu1 %v6146_v57 }
 0x88b   :  { %2290 = vmatmul.mubr.f32.vlgmr.msra.gmra.mrb[16].mxu0 %v6145_v0  ;;  %4518 = vmatmul.mubr.f32.vlgmr.msra.gmra.mrb[40].mxu1 %v6145_v0 }
 0x88c   :  { %5384 = vmatpush1.bf16.msra.mxu0 %v7045_v45  ;;  %5415 = vmatpush3.bf16.msra.mxu1 %v7047_v33 }
 0x88d   :  { %5386 = vmatprep.subr.bf16.mxu0 %v7051_v23  ;;  %5416 = vmatprep.subr.bf16.mxu1 %v6146_v57 }
 0x88e   :  { %2457 = vmatprep.mubr.f32.mxu0 %v6145_v0  ;;  %4552 = vmatprep.mubr.msk.f32.mxu1 %vm6147_vm1, %v6145_v0 }
 0x890   :  { %5388 = vmatpush1.bf16.msra.mxu0 %v7058_v60  ;;  %5418 = vmatpush3.bf16.msra.mxu1 %v7061_v2 }
 0x891   :  { %5390 = vmatprep.subr.bf16.mxu0 %v7064_v7  ;;  %5419 = vmatprep.subr.bf16.mxu1 %v6146_v57 }
 0x894   :  { %5392 = vmatpush1.bf16.msra.mxu0 %v7072_v28  ;;  %5421 = vmatpush3.bf16.msra.mxu1 %v7075_v35 }
 0x895   :  { %5394 = vmatprep.subr.bf16.mxu0 %v7078_v38  ;;  %5422 = vmatprep.subr.bf16.mxu1 %v6146_v57 }
 0x898   :  { %5396 = vmatpush1.bf16.msra.mxu0 %v7086_v14  ;;  %5424 = vmatpush3.bf16.msra.mxu1 %v7089_v56 }
 0x899   :  { %5398 = vmatprep.subr.bf16.mxu0 %v7092_v3  ;;  %5425 = vmatprep.subr.bf16.mxu1 %v6146_v57 }
 0x89c   :  { %5400 = vmatpush1.bf16.msra.mxu0 %v7100_v15  ;;  %5427 = vmatpush3.bf16.msra.mxu1 %v7103_v13 }
 0x89d   :  { %5402 = vmatprep.subr.bf16.mxu0 %v7106_v16  ;;  %5428 = vmatprep.subr.bf16.mxu1 %v6146_v57 }
 0x8a0   :  { %5404 = vmatpush1.bf16.msra.mxu0 %v7114_v26  ;;  %5430 = vmatpush3.bf16.msra.mxu1 %v7117_v32 }
 0x8a1   :  { %5406 = vmatprep.subr.bf16.mxu0 %v7120_v34  ;;  %5431 = vmatprep.subr.bf16.mxu1 %v6146_v57 }
 0x8a4   :  { %5408 = vmatpush1.bf16.msra.mxu0 %v7128_v41  ;;  %5433 = vmatpush3.bf16.msra.mxu1 %v7131_v49 }
 0x8a5   :  { %5410 = vmatprep.subr.bf16.mxu0 %v7134_v51  ;;  %5434 = vmatprep.subr.bf16.mxu1 %v6146_v57 }
 0x8a8   :  { %5412 = vmatpush1.bf16.msra.mxu0 %v7142_v11  ;;  %5436 = vmatpush3.bf16.msra.mxu1 %v7145_v9 }
 0x8a9   :  { %5438 = vmatprep.subr.bf16.mxu0 %v7034_v10  ;;  %5469 = vmatprep.subr.bf16.mxu1 %v6146_v57 }
 0x93d   :  { %v3990_v24 = vpop.f32.mrb[24].mxu1 }
 0x93e   :  { %v3991_v50 = vpop.f32.mrb[25].mxu1 }
 0x93f   :  { %v3992_v22 = vadd.f32 %v3991_v50, %v3990_v24  ;;  %v2217_v24 = vrot.slane %v2205_v63, %v6456_v1 }
 0x941   :  { %v3993_v18 = vpop.f32.mrb[26].mxu1 }
 0x942   :  { %v3994_v20 = vpop.f32.mrb[27].mxu1 }
 0x943   :  { %v3995_v31 = vadd.f32 %v3994_v20, %v3993_v18  ;;  %v7218_v18 = vadd.f32 %v2213_v30, %v1903_v5 }
 0x945   :  { %v7199_v42 = vadd.f32 %v3995_v31, %v1911_v25  ;;  %v3996_v39 = vpop.f32.mrb[28].mxu1 }
 0x946   :  { %v3997_v29 = vpop.f32.mrb[29].mxu1 }
 0x947   :  { %v3998_v40 = vadd.f32 %v3997_v29, %v3996_v39  ;;  %v7222_v39 = vadd.f32 %v2217_v24, %v1907_v62 }
 0x949   :  { %v7201_v43 = vadd.f32 %v3998_v40, %v1911_v25  ;;  %v3999_v55 = vpop.f32.mrb[30].mxu1 }
 0x94a   :  { %v4000_v4 = vpop.f32.mrb[31].mxu1 }
 0x94b   :  { %v4001_v61 = vadd.f32 %v4000_v4, %v3999_v55 }
 0x94d   :  { %v7203_v6 = vadd.f32 %v4001_v61, %v1911_v25  ;;  %v4002_v8 = vpop.f32.mrb[32].mxu1 }
 0x94e   :  { %v4003_v52 = vpop.f32.mrb[33].mxu1 }
 0x94f   :  { %v4004_v17 = vadd.f32 %v4003_v52, %v4002_v8  ;;  %v7227_v52 = vrot.slane %v2205_v63, %v6439_v46 }
 0x951   :  { %v7205_v48 = vadd.f32 %v4004_v17, %v1911_v25  ;;  %v4005_v53 = vpop.f32.mrb[34].mxu1 }
 0x952   :  { %v4006_v19 = vpop.f32.mrb[35].mxu1 }
 0x953   :  { %v4007_v58 = vadd.f32 %v4006_v19, %v4005_v53 }
 0x955   :  { %v7210_v27 = vadd.f32 %v4007_v58, %v1911_v25  ;;  %v4008_v47 = vpop.f32.mrb[36].mxu1 }
 0x956   :  { %v4009_v36 = vpop.f32.mrb[37].mxu1 }
 0x957   :  { %v4010_v21 = vadd.f32 %v4009_v36, %v4008_v47  ;;  %v2095_v47 = vadd.f32 %v3992_v22, %v1911_v25 }
 0x959   :  { %v7214_v44 = vadd.f32 %v4010_v21, %v1911_v25  ;;  %v4011_v37 = vpop.f32.mrb[38].mxu1 }
 0x95a   :  { %v4012_v54 = vpop.f32.mrb[39].mxu1 }
 0x95b   :  { %v4013_v50 = vadd.f32 %v4012_v54, %v4011_v37 }
 0x95d   :  { %v7220_v20 = vadd.f32 %v4013_v50, %v1911_v25 }
 0x95e   :  { %v2291_v31 = vpop.f32.mrb[16].mxu0  ;;  %v2362_v29 = vpop.f32.mrb[40].mxu1 }
 0x95f   :  { %v5838_v40 = vadd.f32 %v7218_v18, %v2291_v31  ;;  %v2293_v59 = vpop.f32.mrb[17].mxu0  ;;  %v4519_v55 = vpop.f32.mrb[41].mxu1  ;;  %v2363_v19 = vadd.f32 %v2362_v29, %v7227_v52 }
 0x960   :  { %v5840_v61 = vadd.f32 %v7222_v39, %v2293_v59 }
 0x961   :  { %v3793_v4 = vmul.f32 -1.442695, %v5838_v40 }
 0x962   :  { %v3794_v12 = vmul.f32 -1.442695, %v5840_v61 }
 0x963   :  { %5989 = vpow2.f32 %v3793_v4 }
 0x964   :  { %5991 = vpow2.f32 %v3794_v12 }
 0x96d   :  { %v5990_v1 = vpop.eup %5989 }
 0x96e   :  { %v2374_v8 = vadd.f32 1.0, %v5990_v1  ;;  %v5992_v17 = vpop.eup %5991 }
 0x96f   :  { %v2375_v53 = vadd.f32 1.0, %v5992_v17 }
 0x970   :  { %5993 = vrcp.f32 %v2374_v8 }
 0x971   :  { %5995 = vrcp.f32 %v2375_v53 }
 0x97a   :  { %v5994_v58 = vpop.eup %5993 }
 0x97b   :  { %v2380_v36 = vmul.f32 %v5994_v58, %v2363_v19  ;;  %v5996_v5 = vpop.eup %5995 }
 0x97c   :  { %v2383_v30 = vsub.f32 1.0, %v5996_v5  ;;  %v2385_v62 = vmul.f32 0.0, %v5996_v5 }
 0x97d   :  { %v2381_v21 = vadd.f32 %v2380_v36, %v2095_v47 }
 0x97f   :  { %5997 = vtanh.f32 %v2381_v21 }
 0x989   :  { %v5998_v37 = vpop.eup %5997 }
 0x98a   :  { %v2384_v54 = vmul.f32 %v5998_v37, %v2383_v30 }
 0x98c   :  { %v7230_v24 = vadd.f32 %v2385_v62, %v2384_v54 }
 0x98e   :  { %2458 = vmatmul.mubr.f32.vlgmr.msra.gmra.mrb[18].mxu0 %v7230_v24  ;;  %4553 = vmatmul.mubr.f32.vlgmr.msra.gmra.mrb[42].mxu1 %v7230_v24 }
 0x98f   :  { %5440 = vmatpush1.bf16.msra.mxu0 %v7045_v45  ;;  %5471 = vmatpush3.bf16.msra.mxu1 %v7047_v33 }
 0x990   :  { %5442 = vmatprep.subr.bf16.mxu0 %v7051_v23  ;;  %5472 = vmatprep.subr.bf16.mxu1 %v6146_v57 }
 0x991   :  { %2626 = vmatprep.mubr.f32.mxu0 %v6145_v0  ;;  %4587 = vmatprep.mubr.msk.f32.mxu1 %vm6147_vm1, %v6145_v0 }
 0x993   :  { %5444 = vmatpush1.bf16.msra.mxu0 %v7058_v60  ;;  %5474 = vmatpush3.bf16.msra.mxu1 %v7061_v2 }
 0x994   :  { %5446 = vmatprep.subr.bf16.mxu0 %v7064_v7  ;;  %5475 = vmatprep.subr.bf16.mxu1 %v6146_v57 }
 0x997   :  { %5448 = vmatpush1.bf16.msra.mxu0 %v7072_v28  ;;  %5477 = vmatpush3.bf16.msra.mxu1 %v7075_v35 }
 0x998   :  { %5450 = vmatprep.subr.bf16.mxu0 %v7078_v38  ;;  %5478 = vmatprep.subr.bf16.mxu1 %v6146_v57 }
 0x99b   :  { %5452 = vmatpush1.bf16.msra.mxu0 %v7086_v14  ;;  %5480 = vmatpush3.bf16.msra.mxu1 %v7089_v56 }
 0x99c   :  { %5454 = vmatprep.subr.bf16.mxu0 %v7092_v3  ;;  %5481 = vmatprep.subr.bf16.mxu1 %v6146_v57 }
 0x99f   :  { %5456 = vmatpush1.bf16.msra.mxu0 %v7100_v15  ;;  %5483 = vmatpush3.bf16.msra.mxu1 %v7103_v13 }
 0x9a0   :  { %5458 = vmatprep.subr.bf16.mxu0 %v7106_v16  ;;  %5484 = vmatprep.subr.bf16.mxu1 %v6146_v57 }
 0x9a3   :  { %5460 = vmatpush1.bf16.msra.mxu0 %v7114_v26  ;;  %5486 = vmatpush3.bf16.msra.mxu1 %v7117_v32 }
 0x9a4   :  { %5462 = vmatprep.subr.bf16.mxu0 %v7120_v34  ;;  %5487 = vmatprep.subr.bf16.mxu1 %v6146_v57 }
 0x9a7   :  { %5464 = vmatpush1.bf16.msra.mxu0 %v7128_v41  ;;  %5489 = vmatpush3.bf16.msra.mxu1 %v7131_v49 }
 0x9a8   :  { %5466 = vmatprep.subr.bf16.mxu0 %v7134_v51  ;;  %5490 = vmatprep.subr.bf16.mxu1 %v6146_v57 }
 0x9ab   :  { %5468 = vmatpush1.bf16.msra.mxu0 %v7142_v11  ;;  %5492 = vmatpush3.bf16.msra.mxu1 %v7145_v9 }
 0x9ac   :  { %5494 = vmatprep.subr.bf16.mxu0 %v7034_v10  ;;  %5525 = vmatprep.subr.bf16.mxu1 %v6146_v57 }
 0xa61   :  { %v2459_v46 = vpop.f32.mrb[18].mxu0  ;;  %v2530_v22 = vpop.f32.mrb[42].mxu1 }
 0xa62   :  { %v5842_v25 = vadd.f32 %v7218_v18, %v2459_v46  ;;  %v2461_v63 = vpop.f32.mrb[19].mxu0  ;;  %v4554_v50 = vpop.f32.mrb[43].mxu1  ;;  %v2531_v12 = vadd.f32 %v2530_v22, %v7227_v52 }
 0xa63   :  { %v5844_v29 = vadd.f32 %v7222_v39, %v2461_v63 }
 0xa64   :  { %v3795_v31 = vmul.f32 -1.442695, %v5842_v25 }
 0xa65   :  { %v3796_v40 = vmul.f32 -1.442695, %v5844_v29 }
 0xa66   :  { %5999 = vpow2.f32 %v3795_v31 }
 0xa67   :  { %6001 = vpow2.f32 %v3796_v40 }
 0xa70   :  { %v6000_v59 = vpop.eup %5999 }
 0xa71   :  { %v2542_v55 = vadd.f32 1.0, %v6000_v59  ;;  %v6002_v4 = vpop.eup %6001 }
 0xa72   :  { %v2543_v61 = vadd.f32 1.0, %v6002_v4 }
 0xa73   :  { %6003 = vrcp.f32 %v2542_v55 }
 0xa74   :  { %6005 = vrcp.f32 %v2543_v61 }
 0xa7d   :  { %v6004_v1 = vpop.eup %6003 }
 0xa7e   :  { %v2548_v8 = vmul.f32 %v6004_v1, %v2531_v12  ;;  %v6006_v53 = vpop.eup %6005 }
 0xa7f   :  { %v2551_v19 = vsub.f32 1.0, %v6006_v53  ;;  %v2553_v36 = vmul.f32 %v6006_v53, %v7230_v24 }
 0xa80   :  { %v2549_v17 = vadd.f32 %v2548_v8, %v7199_v42 }
 0xa82   :  { %6007 = vtanh.f32 %v2549_v17 }
 0xa8c   :  { %v6008_v58 = vpop.eup %6007 }
 0xa8d   :  { %v2552_v47 = vmul.f32 %v6008_v58, %v2551_v19 }
 0xa8f   :  { %v7274_v21 = vadd.f32 %v2553_v36, %v2552_v47 }
 0xa91   :  { %2627 = vmatmul.mubr.f32.vlgmr.msra.gmra.mrb[20].mxu0 %v7274_v21  ;;  %4588 = vmatmul.mubr.f32.vlgmr.msra.gmra.mrb[44].mxu1 %v7274_v21 }
 0xa92   :  { %5496 = vmatpush1.bf16.msra.mxu0 %v7045_v45  ;;  %5527 = vmatpush3.bf16.msra.mxu1 %v7047_v33 }
 0xa93   :  { %5498 = vmatprep.subr.bf16.mxu0 %v7051_v23  ;;  %5528 = vmatprep.subr.bf16.mxu1 %v6146_v57 }
 0xa94   :  { %2795 = vmatprep.mubr.f32.mxu0 %v6145_v0  ;;  %4622 = vmatprep.mubr.msk.f32.mxu1 %vm6147_vm1, %v6145_v0 }
 0xa96   :  { %5500 = vmatpush1.bf16.msra.mxu0 %v7058_v60  ;;  %5530 = vmatpush3.bf16.msra.mxu1 %v7061_v2 }
 0xa97   :  { %5502 = vmatprep.subr.bf16.mxu0 %v7064_v7  ;;  %5531 = vmatprep.subr.bf16.mxu1 %v6146_v57 }
 0xa9a   :  { %5504 = vmatpush1.bf16.msra.mxu0 %v7072_v28  ;;  %5533 = vmatpush3.bf16.msra.mxu1 %v7075_v35 }
 0xa9b   :  { %5506 = vmatprep.subr.bf16.mxu0 %v7078_v38  ;;  %5534 = vmatprep.subr.bf16.mxu1 %v6146_v57 }
 0xa9e   :  { %5508 = vmatpush1.bf16.msra.mxu0 %v7086_v14  ;;  %5536 = vmatpush3.bf16.msra.mxu1 %v7089_v56 }
 0xa9f   :  { %5510 = vmatprep.subr.bf16.mxu0 %v7092_v3  ;;  %5537 = vmatprep.subr.bf16.mxu1 %v6146_v57 }
 0xaa2   :  { %5512 = vmatpush1.bf16.msra.mxu0 %v7100_v15  ;;  %5539 = vmatpush3.bf16.msra.mxu1 %v7103_v13 }
 0xaa3   :  { %5514 = vmatprep.subr.bf16.mxu0 %v7106_v16  ;;  %5540 = vmatprep.subr.bf16.mxu1 %v6146_v57 }
 0xaa6   :  { %5516 = vmatpush1.bf16.msra.mxu0 %v7114_v26  ;;  %5542 = vmatpush3.bf16.msra.mxu1 %v7117_v32 }
 0xaa7   :  { %5518 = vmatprep.subr.bf16.mxu0 %v7120_v34  ;;  %5543 = vmatprep.subr.bf16.mxu1 %v6146_v57 }
 0xaaa   :  { %5520 = vmatpush1.bf16.msra.mxu0 %v7128_v41  ;;  %5545 = vmatpush3.bf16.msra.mxu1 %v7131_v49 }
 0xaab   :  { %5522 = vmatprep.subr.bf16.mxu0 %v7134_v51  ;;  %5546 = vmatprep.subr.bf16.mxu1 %v6146_v57 }
 0xaae   :  { %5524 = vmatpush1.bf16.msra.mxu0 %v7142_v11  ;;  %5548 = vmatpush3.bf16.msra.mxu1 %v7145_v9 }
 0xaaf   :  { %5550 = vmatprep.subr.bf16.mxu0 %v7034_v10  ;;  %5581 = vmatprep.subr.bf16.mxu1 %v6146_v57 }
 0xb64   :  { %v2628_v42 = vpop.f32.mrb[20].mxu0  ;;  %v2699_v5 = vpop.f32.mrb[44].mxu1 }
 0xb65   :  { %v5846_v30 = vadd.f32 %v7218_v18, %v2628_v42  ;;  %v2630_v37 = vpop.f32.mrb[21].mxu0  ;;  %v4589_v54 = vpop.f32.mrb[45].mxu1  ;;  %v2700_v29 = vadd.f32 %v2699_v5, %v7227_v52 }
 0xb66   :  { %v5848_v46 = vadd.f32 %v7222_v39, %v2630_v37 }
 0xb67   :  { %v3797_v62 = vmul.f32 -1.442695, %v5846_v30 }
 0xb68   :  { %v3798_v22 = vmul.f32 -1.442695, %v5848_v46 }
 0xb69   :  { %6009 = vpow2.f32 %v3797_v62 }
 0xb6a   :  { %6011 = vpow2.f32 %v3798_v22 }
 0xb73   :  { %v6010_v25 = vpop.eup %6009 }
 0xb74   :  { %v2711_v63 = vadd.f32 1.0, %v6010_v25  ;;  %v6012_v50 = vpop.eup %6011 }
 0xb75   :  { %v2712_v31 = vadd.f32 1.0, %v6012_v50 }
 0xb76   :  { %6013 = vrcp.f32 %v2711_v63 }
 0xb77   :  { %6015 = vrcp.f32 %v2712_v31 }
 0xb80   :  { %v6014_v40 = vpop.eup %6013 }
 0xb81   :  { %v2717_v59 = vmul.f32 %v6014_v40, %v2700_v29  ;;  %v6016_v4 = vpop.eup %6015 }
 0xb82   :  { %v2720_v61 = vsub.f32 1.0, %v6016_v4  ;;  %v2722_v8 = vmul.f32 %v6016_v4, %v7274_v21 }
 0xb83   :  { %v2718_v55 = vadd.f32 %v2717_v59, %v7201_v43 }
 0xb85   :  { %6017 = vtanh.f32 %v2718_v55 }
 0xb8f   :  { %v6018_v12 = vpop.eup %6017 }
 0xb90   :  { %v2721_v1 = vmul.f32 %v6018_v12, %v2720_v61 }
 0xb92   :  { %v7318_v17 = vadd.f32 %v2722_v8, %v2721_v1 }
 0xb94   :  { %2796 = vmatmul.mubr.f32.vlgmr.msra.gmra.mrb[22].mxu0 %v7318_v17  ;;  %4623 = vmatmul.mubr.f32.vlgmr.msra.gmra.mrb[46].mxu1 %v7318_v17 }
 0xb95   :  { %5552 = vmatpush1.bf16.msra.mxu0 %v7045_v45  ;;  %5583 = vmatpush3.bf16.msra.mxu1 %v7047_v33 }
 0xb96   :  { %5554 = vmatprep.subr.bf16.mxu0 %v7051_v23  ;;  %5584 = vmatprep.subr.bf16.mxu1 %v6146_v57 }
 0xb97   :  { %2964 = vmatprep.mubr.f32.mxu0 %v6145_v0  ;;  %4657 = vmatprep.mubr.msk.f32.mxu1 %vm6147_vm1, %v6145_v0 }
 0xb99   :  { %5556 = vmatpush1.bf16.msra.mxu0 %v7058_v60  ;;  %5586 = vmatpush3.bf16.msra.mxu1 %v7061_v2 }
 0xb9a   :  { %5558 = vmatprep.subr.bf16.mxu0 %v7064_v7  ;;  %5587 = vmatprep.subr.bf16.mxu1 %v6146_v57 }
 0xb9d   :  { %5560 = vmatpush1.bf16.msra.mxu0 %v7072_v28  ;;  %5589 = vmatpush3.bf16.msra.mxu1 %v7075_v35 }
 0xb9e   :  { %5562 = vmatprep.subr.bf16.mxu0 %v7078_v38  ;;  %5590 = vmatprep.subr.bf16.mxu1 %v6146_v57 }
 0xba1   :  { %5564 = vmatpush1.bf16.msra.mxu0 %v7086_v14  ;;  %5592 = vmatpush3.bf16.msra.mxu1 %v7089_v56 }
 0xba2   :  { %5566 = vmatprep.subr.bf16.mxu0 %v7092_v3  ;;  %5593 = vmatprep.subr.bf16.mxu1 %v6146_v57 }
 0xba5   :  { %5568 = vmatpush1.bf16.msra.mxu0 %v7100_v15  ;;  %5595 = vmatpush3.bf16.msra.mxu1 %v7103_v13 }
 0xba6   :  { %5570 = vmatprep.subr.bf16.mxu0 %v7106_v16  ;;  %5596 = vmatprep.subr.bf16.mxu1 %v6146_v57 }
 0xba9   :  { %5572 = vmatpush1.bf16.msra.mxu0 %v7114_v26  ;;  %5598 = vmatpush3.bf16.msra.mxu1 %v7117_v32 }
 0xbaa   :  { %5574 = vmatprep.subr.bf16.mxu0 %v7120_v34  ;;  %5599 = vmatprep.subr.bf16.mxu1 %v6146_v57 }
 0xbad   :  { %5576 = vmatpush1.bf16.msra.mxu0 %v7128_v41  ;;  %5601 = vmatpush3.bf16.msra.mxu1 %v7131_v49 }
 0xbae   :  { %5578 = vmatprep.subr.bf16.mxu0 %v7134_v51  ;;  %5602 = vmatprep.subr.bf16.mxu1 %v6146_v57 }
 0xbb1   :  { %5580 = vmatpush1.bf16.msra.mxu0 %v7142_v11  ;;  %5604 = vmatpush3.bf16.msra.mxu1 %v7145_v9 }
 0xbb2   :  { %5606 = vmatprep.subr.bf16.mxu0 %v7034_v10  ;;  %5637 = vmatprep.subr.bf16.mxu1 %v6146_v57 }
 0xc67   :  { %v2797_v43 = vpop.f32.mrb[22].mxu0  ;;  %v2868_v53 = vpop.f32.mrb[46].mxu1 }
 0xc68   :  { %v5850_v19 = vadd.f32 %v7218_v18, %v2797_v43  ;;  %v2799_v58 = vpop.f32.mrb[23].mxu0  ;;  %v4624_v47 = vpop.f32.mrb[47].mxu1  ;;  %v2869_v46 = vadd.f32 %v2868_v53, %v7227_v52 }
 0xc69   :  { %v5852_v42 = vadd.f32 %v7222_v39, %v2799_v58 }
 0xc6a   :  { %v3799_v36 = vmul.f32 -1.442695, %v5850_v19 }
 0xc6b   :  { %v3800_v5 = vmul.f32 -1.442695, %v5852_v42 }
 0xc6c   :  { %6019 = vpow2.f32 %v3799_v36 }
 0xc6d   :  { %6021 = vpow2.f32 %v3800_v5 }
 0xc76   :  { %v6020_v30 = vpop.eup %6019 }
 0xc77   :  { %v2880_v37 = vadd.f32 1.0, %v6020_v30  ;;  %v6022_v54 = vpop.eup %6021 }
 0xc78   :  { %v2881_v62 = vadd.f32 1.0, %v6022_v54 }
 0xc79   :  { %6023 = vrcp.f32 %v2880_v37 }
 0xc7a   :  { %6025 = vrcp.f32 %v2881_v62 }
 0xc83   :  { %v6024_v22 = vpop.eup %6023 }
 0xc84   :  { %v2886_v25 = vmul.f32 %v6024_v22, %v2869_v46  ;;  %v6026_v50 = vpop.eup %6025 }
 0xc85   :  { %v2889_v31 = vsub.f32 1.0, %v6026_v50  ;;  %v2891_v59 = vmul.f32 %v6026_v50, %v7318_v17 }
 0xc86   :  { %v2887_v63 = vadd.f32 %v2886_v25, %v7203_v6 }
 0xc88   :  { %6027 = vtanh.f32 %v2887_v63 }
 0xc92   :  { %v6028_v29 = vpop.eup %6027 }
 0xc93   :  { %v2890_v40 = vmul.f32 %v6028_v29, %v2889_v31 }
 0xc95   :  { %v7362_v55 = vadd.f32 %v2891_v59, %v2890_v40 }
 0xc97   :  { %2965 = vmatmul.mubr.f32.vlgmr.msra.gmra.mrb[24].mxu0 %v7362_v55  ;;  %4658 = vmatmul.mubr.f32.vlgmr.msra.gmra.mrb[48].mxu1 %v7362_v55 }
 0xc98   :  { %5608 = vmatpush1.bf16.msra.mxu0 %v7045_v45  ;;  %5639 = vmatpush3.bf16.msra.mxu1 %v7047_v33 }
 0xc99   :  { %5610 = vmatprep.subr.bf16.mxu0 %v7051_v23  ;;  %5640 = vmatprep.subr.bf16.mxu1 %v6146_v57 }
 0xc9a   :  { %3131 = vmatprep.mubr.f32.mxu0 %v6145_v0  ;;  %4692 = vmatprep.mubr.msk.f32.mxu1 %vm6147_vm1, %v6145_v0 }
 0xc9c   :  { %5612 = vmatpush1.bf16.msra.mxu0 %v7058_v60  ;;  %5642 = vmatpush3.bf16.msra.mxu1 %v7061_v2 }
 0xc9d   :  { %5614 = vmatprep.subr.bf16.mxu0 %v7064_v7  ;;  %5643 = vmatprep.subr.bf16.mxu1 %v6146_v57 }
 0xca0   :  { %5616 = vmatpush1.bf16.msra.mxu0 %v7072_v28  ;;  %5645 = vmatpush3.bf16.msra.mxu1 %v7075_v35 }
 0xca1   :  { %5618 = vmatprep.subr.bf16.mxu0 %v7078_v38  ;;  %5646 = vmatprep.subr.bf16.mxu1 %v6146_v57 }
 0xca4   :  { %5620 = vmatpush1.bf16.msra.mxu0 %v7086_v14  ;;  %5648 = vmatpush3.bf16.msra.mxu1 %v7089_v56 }
 0xca5   :  { %5622 = vmatprep.subr.bf16.mxu0 %v7092_v3  ;;  %5649 = vmatprep.subr.bf16.mxu1 %v6146_v57 }
 0xca8   :  { %5624 = vmatpush1.bf16.msra.mxu0 %v7100_v15  ;;  %5651 = vmatpush3.bf16.msra.mxu1 %v7103_v13 }
 0xca9   :  { %5626 = vmatprep.subr.bf16.mxu0 %v7106_v16  ;;  %5652 = vmatprep.subr.bf16.mxu1 %v6146_v57 }
 0xcac   :  { %5628 = vmatpush1.bf16.msra.mxu0 %v7114_v26  ;;  %5654 = vmatpush3.bf16.msra.mxu1 %v7117_v32 }
 0xcad   :  { %5630 = vmatprep.subr.bf16.mxu0 %v7120_v34  ;;  %5655 = vmatprep.subr.bf16.mxu1 %v6146_v57 }
 0xcb0   :  { %5632 = vmatpush1.bf16.msra.mxu0 %v7128_v41  ;;  %5657 = vmatpush3.bf16.msra.mxu1 %v7131_v49 }
 0xcb1   :  { %5634 = vmatprep.subr.bf16.mxu0 %v7134_v51  ;;  %5658 = vmatprep.subr.bf16.mxu1 %v6146_v57 }
 0xcb4   :  { %5636 = vmatpush1.bf16.msra.mxu0 %v7142_v11  ;;  %5660 = vmatpush3.bf16.msra.mxu1 %v7145_v9 }
 0xcb5   :  { %5662 = vmatprep.subr.bf16.mxu0 %v7034_v10  ;;  %5693 = vmatprep.subr.bf16.mxu1 %v6146_v57 }
 0xd6a   :  { %v2966_v6 = vpop.f32.mrb[24].mxu0  ;;  %v3037_v4 = vpop.f32.mrb[48].mxu1 }
 0xd6b   :  { %v5854_v61 = vadd.f32 %v7218_v18, %v2966_v6  ;;  %v2968_v12 = vpop.f32.mrb[25].mxu0  ;;  %v4659_v1 = vpop.f32.mrb[49].mxu1  ;;  %v3038_v42 = vadd.f32 %v3037_v4, %v7227_v52 }
 0xd6c   :  { %v5856_v43 = vadd.f32 %v7222_v39, %v2968_v12 }
 0xd6d   :  { %v3801_v8 = vmul.f32 -1.442695, %v5854_v61 }
 0xd6e   :  { %v3802_v53 = vmul.f32 -1.442695, %v5856_v43 }
 0xd6f   :  { %6029 = vpow2.f32 %v3801_v8 }
 0xd70   :  { %6031 = vpow2.f32 %v3802_v53 }
 0xd79   :  { %v6030_v19 = vpop.eup %6029 }
 0xd7a   :  { %v3049_v58 = vadd.f32 1.0, %v6030_v19  ;;  %v6032_v47 = vpop.eup %6031 }
 0xd7b   :  { %v3050_v36 = vadd.f32 1.0, %v6032_v47 }
 0xd7c   :  { %6033 = vrcp.f32 %v3049_v58 }
 0xd7d   :  { %6035 = vrcp.f32 %v3050_v36 }
 0xd86   :  { %v6034_v5 = vpop.eup %6033 }
 0xd87   :  { %v3055_v30 = vmul.f32 %v6034_v5, %v3038_v42  ;;  %v6036_v54 = vpop.eup %6035 }
 0xd88   :  { %v3058_v62 = vsub.f32 1.0, %v6036_v54  ;;  %v3060_v25 = vmul.f32 %v6036_v54, %v7362_v55  ;;  %v3599_v54 = vld [vmem:[%s7635_s9 + $0x90] sm:$0xff] }
 0xd89   :  { %v3056_v37 = vadd.f32 %v3055_v30, %v7205_v48 }
 0xd8b   :  { %6037 = vtanh.f32 %v3056_v37 }
 0xd95   :  { %v6038_v46 = vpop.eup %6037 }
 0xd96   :  { %v3059_v22 = vmul.f32 %v6038_v46, %v3058_v62  ;;  %v3600_v62 = vld [vmem:[%s7635_s9 + $0x98] sm:$0xff] }
 0xd97   :  { %v5777_v46 = vpack.c.bf16 %v3600_v62, %v3599_v54 }
 0xd98   :  { %v7406_v63 = vadd.f32 %v3060_v25, %v3059_v22  ;;  %v3583_v22 = vld [vmem:[%s7635_s9 + $0x10] sm:$0xff]  ;;  %v3584_v25 = vld [vmem:[%s7635_s9 + $0x18] sm:$0xff] }
 0xd9a   :  { %3132 = vmatmul.mubr.f32.vlgmr.msra.gmra.mrb[26].mxu0 %v7406_v63  ;;  %4693 = vmatmul.mubr.f32.vlgmr.msra.gmra.mrb[50].mxu1 %v7406_v63 }
 0xd9b   :  { %5664 = vmatpush1.bf16.msra.mxu0 %v7045_v45  ;;  %5695 = vmatpush3.bf16.msra.mxu1 %v7047_v33 }
 0xd9c   :  { %5666 = vmatprep.subr.bf16.mxu0 %v7051_v23  ;;  %5696 = vmatprep.subr.bf16.mxu1 %v6146_v57 }
 0xd9d   :  { %3298 = vmatprep.mubr.f32.mxu0 %v6145_v0  ;;  %4727 = vmatprep.mubr.msk.f32.mxu1 %vm6147_vm1, %v6145_v0 }
 0xd9f   :  { %5668 = vmatpush1.bf16.msra.mxu0 %v7058_v60  ;;  %5698 = vmatpush3.bf16.msra.mxu1 %v7061_v2 }
 0xda0   :  { %5670 = vmatprep.subr.bf16.mxu0 %v7064_v7  ;;  %5699 = vmatprep.subr.bf16.mxu1 %v6146_v57 }
 0xda3   :  { %5672 = vmatpush1.bf16.msra.mxu0 %v7072_v28  ;;  %5701 = vmatpush3.bf16.msra.mxu1 %v7075_v35 }
 0xda4   :  { %5674 = vmatprep.subr.bf16.mxu0 %v7078_v38  ;;  %5702 = vmatprep.subr.bf16.mxu1 %v6146_v57 }
 0xda7   :  { %5676 = vmatpush1.bf16.msra.mxu0 %v7086_v14  ;;  %5704 = vmatpush3.bf16.msra.mxu1 %v7089_v56 }
 0xda8   :  { %5678 = vmatprep.subr.bf16.mxu0 %v7092_v3  ;;  %5705 = vmatprep.subr.bf16.mxu1 %v6146_v57 }
 0xdab   :  { %5680 = vmatpush1.bf16.msra.mxu0 %v7100_v15  ;;  %5707 = vmatpush3.bf16.msra.mxu1 %v7103_v13 }
 0xdac   :  { %5682 = vmatprep.subr.bf16.mxu0 %v7106_v16  ;;  %5708 = vmatprep.subr.bf16.mxu1 %v6146_v57 }
 0xdaf   :  { %5684 = vmatpush1.bf16.msra.mxu0 %v7114_v26  ;;  %5710 = vmatpush3.bf16.msra.mxu1 %v7117_v32 }
 0xdb0   :  { %5686 = vmatprep.subr.bf16.mxu0 %v7120_v34  ;;  %5711 = vmatprep.subr.bf16.mxu1 %v6146_v57 }
 0xdb3   :  { %5688 = vmatpush1.bf16.msra.mxu0 %v7128_v41  ;;  %5713 = vmatpush3.bf16.msra.mxu1 %v7131_v49 }
 0xdb4   :  { %5690 = vmatprep.subr.bf16.mxu0 %v7134_v51  ;;  %5714 = vmatprep.subr.bf16.mxu1 %v6146_v57 }
 0xdb7   :  { %5692 = vmatpush1.bf16.msra.mxu0 %v7142_v11  ;;  %5716 = vmatpush3.bf16.msra.mxu1 %v7145_v9 }
 0xdb8   :  { %5718 = vmatprep.subr.bf16.mxu0 %v7034_v10  ;;  %5749 = vmatprep.subr.bf16.mxu1 %v6146_v57 }
 0xe6d   :  { %v3133_v48 = vpop.f32.mrb[26].mxu0  ;;  %v3204_v50 = vpop.f32.mrb[50].mxu1 }
 0xe6e   :  { %v5858_v31 = vadd.f32 %v7218_v18, %v3133_v48  ;;  %v3135_v29 = vpop.f32.mrb[27].mxu0  ;;  %v4694_v40 = vpop.f32.mrb[51].mxu1  ;;  %v3205_v10 = vadd.f32 %v3204_v50, %v7227_v52  ;;  %v5779_v48 = vpack.c.bf16 %v3584_v25, %v3583_v22  ;;  %v3601_v50 = vld [vmem:[%s7635_s9 + $0xa0] sm:$0xff] }
 0xe6f   :  { %v5860_v6 = vadd.f32 %v7222_v39, %v3135_v29  ;;  %v3585_v40 = vld [vmem:[%s7635_s9 + $0x20] sm:$0xff] }
 0xe70   :  { %v3803_v59 = vmul.f32 -1.442695, %v5858_v31  ;;  %v3602_v31 = vld [vmem:[%s7635_s9 + $0xa8] sm:$0xff] }
 0xe71   :  { %v3804_v4 = vmul.f32 -1.442695, %v5860_v6  ;;  %v5781_v29 = vpack.c.bf16 %v3602_v31, %v3601_v50 }
 0xe72   :  { %6039 = vpow2.f32 %v3803_v59  ;;  %v3586_v59 = vld [vmem:[%s7635_s9 + $0x28] sm:$0xff] }
 0xe73   :  { %6041 = vpow2.f32 %v3804_v4  ;;  %v5783_v6 = vpack.c.bf16 %v3586_v59, %v3585_v40  ;;  %v3603_v4 = vld [vmem:[%s7635_s9 + $0xb0] sm:$0xff]  ;;  %v3636_v59 = vrot.slane %v7230_v24, 3 }
 0xe7c   :  { %v6040_v61 = vpop.eup %6039 }
 0xe7d   :  { %v3216_v12 = vadd.f32 1.0, %v6040_v61  ;;  %v6042_v1 = vpop.eup %6041  ;;  %v3604_v61 = vld [vmem:[%s7635_s9 + $0xb8] sm:$0xff] }
 0xe7e   :  { %v3217_v8 = vadd.f32 1.0, %v6042_v1  ;;  %v3587_v1 = vld [vmem:[%s7635_s9 + $0x30] sm:$0xff] }
 0xe7f   :  { %6043 = vrcp.f32 %v3216_v12  ;;  %v5785_v12 = vpack.c.bf16 %v3604_v61, %v3603_v4  ;;  %v3640_v4 = vrot.slane %v7318_v17, 1  ;;  %v3667_v61 = vrot.slane %v7274_v21, 5 }
 0xe80   :  { %6045 = vrcp.f32 %v3217_v8  ;;  %v3588_v8 = vld [vmem:[%s7635_s9 + $0x38] sm:$0xff] }
 0xe89   :  { %v6044_v43 = vpop.eup %6043 }
 0xe8a   :  { %v3222_v53 = vmul.f32 %v6044_v43, %v3205_v10  ;;  %v6046_v58 = vpop.eup %6045  ;;  %v5787_v10 = vpack.c.bf16 %v3588_v8, %v3587_v1  ;;  %v3605_v43 = vld [vmem:[%s7635_s9 + $0xc0] sm:$0xff]  ;;  %v3665_v8 = vrot.slane %v7318_v17, 6 }
 0xe8b   :  { %v3225_v47 = vsub.f32 1.0, %v6046_v58  ;;  %v3227_v5 = vmul.f32 %v6046_v58, %v7406_v63  ;;  %v3589_v58 = vld [vmem:[%s7635_s9 + $0x40] sm:$0xff] }
 0xe8c   :  { %v3223_v19 = vadd.f32 %v3222_v53, %v7210_v27  ;;  %v3581_v27 = vld [vmem:[%s7635_s9] sm:$0xff]  ;;  %v3606_v53 = vld [vmem:[%s7635_s9 + $0xc8] sm:$0xff] }
 0xe8e   :  { %6047 = vtanh.f32 %v3223_v19  ;;  %v5789_v19 = vpack.c.bf16 %v3606_v53, %v3605_v43  ;;  %v3663_v53 = vrot.slane %v7362_v55, 7 }
 0xe98   :  { %v6048_v36 = vpop.eup %6047 }
 0xe99   :  { %v3226_v42 = vmul.f32 %v6048_v36, %v3225_v47  ;;  %v3590_v47 = vld [vmem:[%s7635_s9 + $0x48] sm:$0xff] }
 0xe9a   :  { %v5791_v36 = vpack.c.bf16 %v3590_v47, %v3589_v58 }
 0xe9b   :  { %v7450_v30 = vadd.f32 %v3227_v5, %v3226_v42  ;;  %v3607_v42 = vld [vmem:[%s7635_s9 + $0xd0] sm:$0xff]  ;;  %v3608_v5 = vld [vmem:[%s7635_s9 + $0xd8] sm:$0xff] }
 0xe9d   :  { %3299 = vmatmul.mubr.f32.vlgmr.msra.gmra.mrb[28].mxu0 %v7450_v30  ;;  %4728 = vmatmul.mubr.f32.vlgmr.msra.gmra.mrb[52].mxu1 %v7450_v30 }
 0xe9e   :  { %5720 = vmatpush1.bf16.msra.mxu0 %v7045_v45  ;;  %5751 = vmatpush3.bf16.msra.mxu1 %v7047_v33 }
 0xe9f   :  { %5722 = vmatprep.subr.bf16.mxu0 %v7051_v23  ;;  %5752 = vmatprep.subr.bf16.mxu1 %v6146_v57 }
 0xea0   :  { %3465 = vmatprep.mubr.f32.mxu0 %v6145_v0  ;;  %4762 = vmatprep.mubr.msk.f32.mxu1 %vm6147_vm1, %v6145_v0 }
 0xea2   :  { %5724 = vmatpush1.bf16.msra.mxu0 %v7058_v60  ;;  %5754 = vmatpush3.bf16.msra.mxu1 %v7061_v2 }
 0xea3   :  { %5726 = vmatprep.subr.bf16.mxu0 %v7064_v7  ;;  %5755 = vmatprep.subr.bf16.mxu1 %v6146_v57 }
 0xea6   :  { %5728 = vmatpush1.bf16.msra.mxu0 %v7072_v28  ;;  %5757 = vmatpush3.bf16.msra.mxu1 %v7075_v35 }
 0xea7   :  { %5730 = vmatprep.subr.bf16.mxu0 %v7078_v38  ;;  %5758 = vmatprep.subr.bf16.mxu1 %v6146_v57 }
 0xeaa   :  { %5732 = vmatpush1.bf16.msra.mxu0 %v7086_v14  ;;  %5760 = vmatpush3.bf16.msra.mxu1 %v7089_v56 }
 0xeab   :  { %5734 = vmatprep.subr.bf16.mxu0 %v7092_v3  ;;  %5761 = vmatprep.subr.bf16.mxu1 %v6146_v57 }
 0xeae   :  { %5736 = vmatpush1.bf16.msra.mxu0 %v7100_v15  ;;  %5763 = vmatpush3.bf16.msra.mxu1 %v7103_v13 }
 0xeaf   :  { %5738 = vmatprep.subr.bf16.mxu0 %v7106_v16  ;;  %5764 = vmatprep.subr.bf16.mxu1 %v6146_v57 }
 0xeb2   :  { %5740 = vmatpush1.bf16.msra.mxu0 %v7114_v26  ;;  %5766 = vmatpush3.bf16.msra.mxu1 %v7117_v32 }
 0xeb3   :  { %5742 = vmatprep.subr.bf16.mxu0 %v7120_v34  ;;  %5767 = vmatprep.subr.bf16.mxu1 %v6146_v57 }
 0xeb6   :  { %5744 = vmatpush1.bf16.msra.mxu0 %v7128_v41  ;;  %5769 = vmatpush3.bf16.msra.mxu1 %v7131_v49 }
 0xeb7   :  { %5746 = vmatprep.subr.bf16.mxu0 %v7134_v51  ;;  %5770 = vmatprep.subr.bf16.mxu1 %v6146_v57  ;;  %v3597_v51 = vld [vmem:[%s7635_s9 + $0x80] sm:$0xff] }
 0xeba   :  { %5748 = vmatpush1.bf16.msra.mxu0 %v7142_v11  ;;  %5772 = vmatpush3.bf16.msra.mxu1 %v7145_v9  ;;  %v3598_v11 = vld [vmem:[%s7635_s9 + $0x88] sm:$0xff] }
 0xebb   :  { %v5773_v9 = vpack.c.bf16 %v3598_v11, %v3597_v51 }
 0xebd   :  { %5774 = vmatprep.subr.bf16.mxu1 %v5773_v9 }
 0xf70   :  { %v3300_v0 = vpop.f32.mrb[28].mxu0  ;;  %v3371_v45 = vpop.f32.mrb[52].mxu1 }
 0xf71   :  { %v5862_v33 = vadd.f32 %v7218_v18, %v3300_v0  ;;  %v3302_v23 = vpop.f32.mrb[29].mxu0  ;;  %v4729_v60 = vpop.f32.mrb[53].mxu1  ;;  %v3372_v56 = vadd.f32 %v3371_v45, %v7227_v52  ;;  %v5793_v0 = vpack.c.bf16 %v3608_v5, %v3607_v42  ;;  %v3591_v45 = vld [vmem:[%s7635_s9 + $0x50] sm:$0xff] }
 0xf72   :  { %v5864_v7 = vadd.f32 %v7222_v39, %v3302_v23  ;;  %v3609_v60 = vld [vmem:[%s7635_s9 + $0xe0] sm:$0xff] }
 0xf73   :  { %v3805_v2 = vmul.f32 -1.442695, %v5862_v33  ;;  %v3592_v33 = vld [vmem:[%s7635_s9 + $0x58] sm:$0xff] }
 0xf74   :  { %v3806_v28 = vmul.f32 -1.442695, %v5864_v7  ;;  %v5795_v23 = vpack.c.bf16 %v3592_v33, %v3591_v45  ;;  %v3593_v7 = vld [vmem:[%s7635_s9 + $0x60] sm:$0xff] }
 0xf75   :  { %6049 = vpow2.f32 %v3805_v2  ;;  %v3610_v2 = vld [vmem:[%s7635_s9 + $0xe8] sm:$0xff] }
 0xf76   :  { %6051 = vpow2.f32 %v3806_v28  ;;  %v5797_v28 = vpack.c.bf16 %v3610_v2, %v3609_v60 }
 0xf7f   :  { %v6050_v35 = vpop.eup %6049 }
 0xf80   :  { %v3383_v38 = vadd.f32 1.0, %v6050_v35  ;;  %v6052_v57 = vpop.eup %6051  ;;  %v3594_v35 = vld [vmem:[%s7635_s9 + $0x68] sm:$0xff] }
 0xf81   :  { %v3384_v14 = vadd.f32 1.0, %v6052_v57  ;;  %v3612_v57 = vld [vmem:[%s7635_s9 + $0xf8] sm:$0xff] }
 0xf82   :  { %6053 = vrcp.f32 %v3383_v38  ;;  %v3611_v38 = vld [vmem:[%s7635_s9 + $0xf0] sm:$0xff] }
 0xf83   :  { %6055 = vrcp.f32 %v3384_v14  ;;  %v5799_v14 = vpack.c.bf16 %v3594_v35, %v3593_v7 }
 0xf8c   :  { %v6054_v3 = vpop.eup %6053 }
 0xf8d   :  { %v3389_v15 = vmul.f32 %v6054_v3, %v3372_v56  ;;  %v6056_v16 = vpop.eup %6055  ;;  %v5801_v56 = vpack.c.bf16 %v3612_v57, %v3611_v38  ;;  %v3595_v3 = vld [vmem:[%s7635_s9 + $0x70] sm:$0xff] }
 0xf8e   :  { %v3392_v26 = vsub.f32 1.0, %v6056_v16  ;;  %v3394_v41 = vmul.f32 %v6056_v16, %v7450_v30 }
 0xf8f   :  { %v3390_v13 = vadd.f32 %v3389_v15, %v7214_v44  ;;  %v3582_v44 = vld [vmem:[%s7635_s9 + $0x8] sm:$0xff]  ;;  %v3596_v15 = vld [vmem:[%s7635_s9 + $0x78] sm:$0xff] }
 0xf90   :  { %v5775_v37 = vpack.c.bf16 %v3582_v44, %v3581_v27 }
 0xf91   :  { %6057 = vtanh.f32 %v3390_v13  ;;  %v5803_v13 = vpack.c.bf16 %v3596_v15, %v3595_v3 }
 0xf9b   :  { %v6058_v32 = vpop.eup %6057 }
 0xf9c   :  { %v3393_v34 = vmul.f32 %v6058_v32, %v3392_v26 }
 0xf9e   :  { %v7492_v49 = vadd.f32 %v3394_v41, %v3393_v34 }
 0xfa0   :  { %3466 = vmatmul.mubr.f32.vlgmr.msra.gmra.mrb[30].mxu0 %v7492_v49  ;;  %4763 = vmatmul.mubr.f32.vlgmr.msra.gmra.mrb[54].mxu1 %v7492_v49 }
 0xfa1   :  { %5776 = vmatpush3.bf16.msra.mxu1 %v5775_v37 }
 0xfa2   :  { %5778 = vmatprep.subr.bf16.mxu1 %v5777_v46 }
 0xfa5   :  { %5780 = vmatpush3.bf16.msra.mxu1 %v5779_v48 }
 0xfa6   :  { %5782 = vmatprep.subr.bf16.mxu1 %v5781_v29  ;;  %v3637_v29 = vrot.slane %v7274_v21, 2 }
 0xfa9   :  { %5784 = vmatpush3.bf16.msra.mxu1 %v5783_v6 }
 0xfaa   :  { %5786 = vmatprep.subr.bf16.mxu1 %v5785_v12  ;;  %v3639_v12 = vsel %vm3638_vm2, %v3637_v29, %v3636_v59 }
 0xfab   :  { %v3642_v47 = vsel %vm3641_vm3, %v3640_v4, %v3639_v12 }
 0xfac   :  { %v3644_v42 = vsel %vm3643_vm4, %v7362_v55, %v3642_v47 }
 0xfad   :  { %5788 = vmatpush3.bf16.msra.mxu1 %v5787_v10  ;;  %v3645_v10 = vrot.slane %v7406_v63, 7 }
 0xfae   :  { %5790 = vmatprep.subr.bf16.mxu1 %v5789_v19  ;;  %v3648_v19 = vrot.slane %v7450_v30, 6 }
 0xfaf   :  { %v3647_v45 = vsel %vm3646_vm5, %v3645_v10, %v3644_v42 }
 0xfb1   :  { %5792 = vmatpush3.bf16.msra.mxu1 %v5791_v36  ;;  %v3651_v36 = vrot.slane %v7492_v49, 5 }
 0xfb2   :  { %5794 = vmatprep.subr.bf16.mxu1 %v5793_v0  ;;  %v3669_v0 = vrot.slane %v7230_v24, 4 }
 0xfb5   :  { %5796 = vmatpush3.bf16.msra.mxu1 %v5795_v23  ;;  %v3650_v23 = vsel %vm3649_vm6, %v3648_v19, %v3647_v45 }
 0xfb6   :  { %5798 = vmatprep.subr.bf16.mxu1 %v5797_v28 }
 0xfb9   :  { %5800 = vmatpush3.bf16.msra.mxu1 %v5799_v14 }
 0xfba   :  { %5802 = vmatprep.subr.bf16.mxu1 %v5801_v56 }
 0xfbd   :  { %5804 = vmatpush3.bf16.msra.mxu1 %v5803_v13 }
0x1073   :  { %v3467_v16 = vpop.f32.mrb[30].mxu0  ;;  %v3538_v26 = vpop.f32.mrb[54].mxu1 }
0x1074   :  { %v5866_v32 = vadd.f32 %v7218_v18, %v3467_v16  ;;  %v3469_v34 = vpop.f32.mrb[31].mxu0  ;;  %v4764_v41 = vpop.f32.mrb[55].mxu1  ;;  %v3539_v62 = vadd.f32 %v3538_v26, %v7227_v52  ;;  %v3658_v52 = vrot.slane %v7492_v49, 2 }
0x1075   :  { %v5868_v11 = vadd.f32 %v7222_v39, %v3469_v34 }
0x1076   :  { %v3807_v51 = vmul.f32 -1.442695, %v5866_v32 }
0x1077   :  { %v3808_v9 = vmul.f32 -1.442695, %v5868_v11 }
0x1078   :  { %6059 = vpow2.f32 %v3807_v51 }
0x1079   :  { %6061 = vpow2.f32 %v3808_v9 }
0x1082   :  { %v6060_v27 = vpop.eup %6059 }
0x1083   :  { %v3550_v44 = vadd.f32 1.0, %v6060_v27  ;;  %v6062_v37 = vpop.eup %6061 }
0x1084   :  { %v3551_v54 = vadd.f32 1.0, %v6062_v37 }
0x1085   :  { %6063 = vrcp.f32 %v3550_v44 }
0x1086   :  { %6065 = vrcp.f32 %v3551_v54 }
0x108f   :  { %v6064_v46 = vpop.eup %6063 }
0x1090   :  { %v3556_v22 = vmul.f32 %v6064_v46, %v3539_v62  ;;  %v6066_v25 = vpop.eup %6065 }
0x1091   :  { %v3559_v48 = vsub.f32 1.0, %v6066_v25  ;;  %v3561_v31 = vmul.f32 %v6066_v25, %v7492_v49  ;;  %v3809_v49 = vld [vmem:[%s7636_s10] ss:$0 sm:$0xff] }
0x1092   :  { %v3557_v18 = vadd.f32 %v3556_v22, %v7220_v20  ;;  %v3660_v20 = vrot.slane %v7450_v30, 1  ;;  %v3653_v30 = vsel %vm3652_vm7, %v3651_v36, %v3650_v23 }
0x1094   :  { %6067 = vtanh.f32 %v3557_v18 }
0x109e   :  { %v6068_v50 = vpop.eup %6067 }
0x109f   :  { %v3560_v39 = vmul.f32 %v6068_v50, %v3559_v48 }
0x10a1   :  { %v3562_v40 = vadd.f32 %v3561_v31, %v3560_v39 }
0x10a3   :  { %v3657_v6 = vrot.slane %v3562_v40, 3  ;;  %v3654_v5 = vrot.slane %v3562_v40, 4 }
0x10a5   :  { %v3659_v1 = vsel %vm3638_vm2, %v3658_v52, %v3657_v6  ;;  %v3656_v2 = vsel %vm3655_vm8, %v3654_v5, %v3653_v30 }
0x10a6   :  { %v3661_v43 = vsel %vm3641_vm3, %v3660_v20, %v3659_v1 }
0x10a7   :  { %v3662_v58 = vsel %vm3643_vm4, %v7406_v63, %v3661_v43 }
0x10a8   :  { %v3664_v21 = vsel %vm3646_vm5, %v3663_v53, %v3662_v58 }
0x10a9   :  { %v3666_v17 = vsel %vm3649_vm6, %v3665_v8, %v3664_v21 }
0x10aa   :  { %v3668_v33 = vsel %vm3652_vm7, %v3667_v61, %v3666_v17 }
0x10ab   :  { %v3670_v60 = vsel %vm3655_vm8, %v3669_v0, %v3668_v33 }
0x10ac   :  { %3737 = vmatprep.mubr.f32.mxu1 %v3670_v60 }
0x10ad   :  { %3738 = vmatmul.mubr.f32.vlgmr.msra.gmra.mrb[56].mxu1 %v3656_v2 }
0x1180   :  { %v4182_v63 = vpop.f32.mrb[56].mxu1 }
0x1181   :  { %v4183_v7 = vpop.f32.mrb[57].mxu1 }
0x1182   :  { %v4184_v55 = vadd.f32 %v4183_v7, %v4182_v63 }
0x1184   :  { %v3740_v28 = vadd.f32 %v4184_v55, %v3809_v49 }
0x1186   :  { %3744 = vst.msk [vmem:[#allocation10] sm:$0xff] %vm3743_vm9, %v3740_v28 }
0x1187   :  { %6124 = shalt.err (!%p6121_p6)
}
0x1188   :  { %s6125_s30 = scalar_lea.hbm %s7637_s11, 128 }
0x1189   :  { %p6126_p7 = scmp.ne.s32.totalorder %s7637_s11, %s6125_s30  ;;  %p6129_p8 = scmp.lt.u32.totalorder %s6125_s30, %s7637_s11 }
0x118b   :  { %p6131_p9 = pnand %p6129_p8, %p6126_p7 }
0x118d   :  { %6134 = shalt.err (!%p6131_p9)
}
0x118e   :  { %3754 = dma.vmem_to_hbm [thread:$0]  %s3752_s24, 128, %s7637_s11, [#allocation7]  }
0x118f   :  { %6139 = dma.done.wait [#allocation7], 128  }
0x1190   :  { %6140 = vsyncadd [#allocation7], 4294967168 }
0x1191   :  { %3758 = vsyncpa [#allocation6], 1 }
0x1192   :  { %3759 = vsyncpa [#allocation9], 1 }
0x1193   :  { %3760 = vsyncpa [#allocation7], 1 }

</bundles_post_ra>
